<compile_context>
chip_gen: v5e
topology: v5e:2x2
jax: 0.10.0
libtpu: 0.0.40
codegen_flags: <defaults>
</compile_context>

<pallas_src>
import functools

import jax
import jax.numpy as jnp
from jax.experimental import pallas as pl
from jax.experimental.pallas import tpu as pltpu

EPS = 1e-5          # PyTorch BatchNorm2d default
LANES = 128


def _round_up(x, m):
    return (x + m - 1) // m * m


def _pick_row_chunk(h, w):
    """Output-row chunk so the in-vreg f32 accumulator is ~(128, Cp) = 16 vregs."""
    target = max(1, min(h, 128 // max(w, 1)))
    for ch in range(target, 0, -1):
        if h % ch == 0:
            return ch
    return 1


def _pick_row_block(total_rows):
    """Row tile for the elementwise BN+ReLU pass (>=512 rows when possible)."""
    for rb in (1024, 512, 256, 128, 64, 32, 16, 8):
        if total_rows % rb == 0:
            return rb
    return total_rows


def _vmem_limit_bytes(*nbytes):
    est = int(sum(nbytes))
    return int(min(max(4 * est, 32 * 1024 * 1024), 64 * 1024 * 1024))


# ----------------------------- kernels --------------------------------------

def _conv3x3_stats_kernel(x_ref, scale_ref, shift_ref, w_ref,
                          y_ref, stats_ref, s0, s1, s2, *, apply_relu):
    """One (batch, row-chunk) step:
       fused input affine(+ReLU)  ->  3x3 conv (no bias, SAME padding)
       -> raw conv output chunk + per-chunk (sum, sum-of-squares) BN stats."""
    H, W, Cp = x_ref.shape            # full image of this batch element
    CH = y_ref.shape[0]               # output rows handled this step
    cdt = s0.dtype                    # MXU operand dtype (bf16 or f32)

    c = pl.program_id(1)
    n_chunks = pl.num_programs(1)
    r0 = pl.multiple_of(c * CH, CH)   # first output row of this chunk

    def act(v):
        v = v.astype(jnp.float32) * scale_ref[0, :] + shift_ref[0, :]
        return jnp.maximum(v, 0.0) if apply_relu else v

    # Activated input rows r0-1 .. r0+CH (CH+2 rows incl. the 3x3 row halo).
    hc = act(x_ref[pl.ds(r0, CH), :, :])                                # (CH, W, Cp)
    ht = act(x_ref[pl.ds(jnp.maximum(r0 - 1, 0), 1), :, :])             # (1, W, Cp)
    hb = act(x_ref[pl.ds(jnp.minimum(r0 + CH, H - 1), 1), :, :])        # (1, W, Cp)
    ht = ht * jnp.where(c == 0, 0.0, 1.0)              # top image border -> 0
    hb = hb * jnp.where(c == n_chunks - 1, 0.0, 1.0)   # bottom image border -> 0
    h = jnp.concatenate([ht, hc, hb], axis=0).astype(cdt)   # (CH+2, W, Cp)

    # Three column-shifted slabs (one per kw) built once per step, so every
    # tap window below is a contiguous leading-axis slice (free reshape) and
    # there is no per-tap unaligned slice+reshape copy.
    zcol = jnp.zeros((CH + 2, 1, Cp), cdt)
    s1[...] = h                           # kw = 1 (center)
    s0[:, 1:, :] = s1[:, :W - 1, :]       # kw = 0: shift right, zero left border
    s0[:, :1, :] = zcol
    s2[:, :W - 1, :] = s1[:, 1:, :]       # kw = 2: shift left, zero right border
    s2[:, W - 1:, :] = zcol

    # 9 taps = 9 aligned (CH*W, Cp) x (Cp, Cp) MXU matmuls accumulated in
    # vregs (f32).  No VMEM accumulator round-trips.  Conv bias intentionally
    # omitted: train-mode BN cancels it exactly.
    slabs = (s0, s1, s2)
    acc = None
    for kh in range(3):
        for kw in range(3):
            win = slabs[kw][kh:kh + CH, :, :].reshape(CH * W, Cp)
            p = jnp.dot(win, w_ref[3 * kh + kw],
                        preferred_element_type=jnp.float32)
            acc = p if acc is None else acc + p

    y_ref[...] = acc.reshape(CH, W, Cp).astype(y_ref.dtype)

    # Partial BN statistics straight from the in-vreg f32 accumulator,
    # written with a single combined store.
    ssum = jnp.sum(acc, axis=0, keepdims=True)
    ssq = jnp.sum(acc * acc, axis=0, keepdims=True)
    stats_ref[...] = jnp.concatenate([ssum, ssq], axis=0)


def _bn_relu_kernel(y_ref, scale_ref, shift_ref, o_ref, *, cout):
    v = y_ref[...].astype(jnp.float32) * scale_ref[0, :] + shift_ref[0, :]
    v = jnp.maximum(v, 0.0)
    o_ref[...] = v[:, :cout].astype(o_ref.dtype)   # fused channel un-padding


# ----------------------------- wrappers -------------------------------------

def _conv3x3_stats(x, scale, shift, w9, *, apply_relu, out_dtype):
    N, H, W, Cp = x.shape
    ch = _pick_row_chunk(H, W)
    n_chunks = H // ch
    cdt = w9.dtype
    isz = jnp.dtype(cdt).itemsize

    limit = _vmem_limit_bytes(
        2 * H * W * Cp * x.dtype.itemsize,              # input image (dbl-buf)
        2 * 9 * Cp * Cp * isz,                          # weights (dbl-buf)
        2 * ch * W * Cp * jnp.dtype(out_dtype).itemsize,  # output chunk
        3 * (ch + 2) * W * Cp * isz)                    # shifted slabs

    kern = functools.partial(_conv3x3_stats_kernel, apply_relu=apply_relu)
    # TODO(synk): at realistic image sizes the full-image input block should
    # become a row-strip (+1 halo) block; here the whole image fits easily.
    return pl.pallas_call(
        kern,
        out_shape=(jax.ShapeDtypeStruct((N, H, W, Cp), out_dtype),
                   jax.ShapeDtypeStruct((N, n_chunks, 2, Cp), jnp.float32)),
        grid=(N, n_chunks),
        in_specs=[
            # full image; block index independent of the chunk axis -> re-used
            pl.BlockSpec((None, H, W, Cp), lambda n, c: (n, 0, 0, 0)),
            pl.BlockSpec((1, Cp), lambda n, c: (0, 0)),      # scale
            pl.BlockSpec((1, Cp), lambda n, c: (0, 0)),      # shift
            pl.BlockSpec((9, Cp, Cp), lambda n, c: (0, 0, 0)),  # weights
        ],
        out_specs=(
            pl.BlockSpec((None, ch, W, Cp), lambda n, c: (n, c, 0, 0)),
            pl.BlockSpec((None, None, 2, Cp), lambda n, c: (n, c, 0, 0)),
        ),
        scratch_shapes=[pltpu.VMEM((ch + 2, W, Cp), cdt)] * 3,
        compiler_params=pltpu.CompilerParams(
            dimension_semantics=("parallel", "arbitrary"),
            vmem_limit_bytes=limit),
    )(x, scale, shift, w9)


def _bn_relu(y_flat, scale, shift, cout):
    R, Cp = y_flat.shape
    rb = _pick_row_block(R)
    limit = _vmem_limit_bytes(2 * rb * Cp * y_flat.dtype.itemsize,
                              2 * rb * cout * 4)
    return pl.pallas_call(
        functools.partial(_bn_relu_kernel, cout=cout),
        out_shape=jax.ShapeDtypeStruct((R, cout), jnp.float32),
        grid=(R // rb,),
        in_specs=[
            pl.BlockSpec((rb, Cp), lambda i: (i, 0)),
            pl.BlockSpec((1, Cp), lambda i: (0, 0)),
            pl.BlockSpec((1, Cp), lambda i: (0, 0)),
        ],
        out_specs=pl.BlockSpec((rb, cout), lambda i: (i, 0)),
        compiler_params=pltpu.CompilerParams(
            dimension_semantics=("parallel",),
            vmem_limit_bytes=limit),
    )(y_flat, scale, shift)


def _bn_affine(stats, gamma, beta, count):
    """Fold batch statistics into per-channel (scale, shift):
    y_norm = y*scale + shift, scale = g*rsqrt(var+eps), shift = b - mean*scale
    (biased variance, matching train-mode BatchNorm2d)."""
    s = jnp.sum(stats[:, :, 0, :], axis=(0, 1))
    sq = jnp.sum(stats[:, :, 1, :], axis=(0, 1))
    mean = s / count
    var = jnp.maximum(sq / count - mean * mean, 0.0)
    scale = gamma * jax.lax.rsqrt(var + EPS)
    shift = beta - mean * scale
    return scale.reshape(1, -1), shift.reshape(1, -1)


@functools.partial(jax.jit, static_argnames=("use_bf16_matmul",))
def bn_block2d(x_nchw, params, *, use_bf16_matmul=True):
    """x_nchw: (N, Cin, H, W) float32. Returns (N, Cout, H, W) float32."""
    N, Cin, H, W = x_nchw.shape
    Cout = params["w1"].shape[-1]
    Cp = _round_up(max(Cin, Cout), LANES)   # lane-dense padded channel count
    cdt = jnp.bfloat16 if use_bf16_matmul else jnp.float32   # MXU operands
    ydt = jnp.bfloat16 if use_bf16_matmul else jnp.float32   # HBM intermediates

    # NCHW -> NHWC (channels on the 128-wide lane axis) + zero-pad channels.
    x = jnp.transpose(x_nchw, (0, 2, 3, 1))
    x = jnp.pad(x, ((0, 0), (0, 0), (0, 0), (0, Cp - Cin)))

    w1 = jnp.pad(params["w1"],
                 ((0, 0), (0, Cp - Cin), (0, Cp - Cout))).astype(cdt)
    w2 = jnp.pad(params["w2"],
                 ((0, 0), (0, Cp - Cout), (0, Cp - Cout))).astype(cdt)
    g1 = jnp.pad(params["g1"].reshape(-1), (0, Cp - Cout), constant_values=1.0)
    t1 = jnp.pad(params["bt1"].reshape(-1), (0, Cp - Cout))
    g2 = jnp.pad(params["g2"].reshape(-1), (0, Cp - Cout), constant_values=1.0)
    t2 = jnp.pad(params["bt2"].reshape(-1), (0, Cp - Cout))
    # NOTE: conv biases params["b1"] / params["b2"] are intentionally ignored:
    # a constant per-channel offset before train-mode BatchNorm is cancelled
    # exactly by the mean subtraction (variance is unchanged too).

    count = jnp.float32(N * H * W)
    one = jnp.ones((1, Cp), jnp.float32)
    zero = jnp.zeros((1, Cp), jnp.float32)

    # conv1 (+ partial BN1 stats)  ->  BN1 affine
    y1, st1 = _conv3x3_stats(x, one, zero, w1, apply_relu=False, out_dtype=ydt)
    s1, sh1 = _bn_affine(st1, g1, t1, count)

    # fused(BN1 + ReLU) at conv2 input -> conv2 (+ partial BN2 stats) -> BN2 affine
    y2, st2 = _conv3x3_stats(y1, s1, sh1, w2, apply_relu=True, out_dtype=ydt)
    s2, sh2 = _bn_affine(st2, g2, t2, count)

    # final BN2 + ReLU over flattened rows, with channel un-padding fused.
    out = _bn_relu(y2.reshape(N * H * W, Cp), s2, sh2, Cout)
    out = out.reshape(N, H, W, Cout)
    # TODO(synk): NHWC->NCHW transpose left to XLA; fusing it would need an
    # in-kernel (rows, Cout) transpose with Cout < 128.
    return jnp.transpose(out, (0, 3, 1, 2))


# ---------------- pure-JAX reference (silent correctness check) -------------
def bn_block2d_ref(x_nchw, p):
    x = jnp.transpose(x_nchw, (0, 2, 3, 1))

    def conv(y, w9, b):
        w = w9.reshape(3, 3, w9.shape[1], w9.shape[2])
        out = jax.lax.conv_general_dilated(
            y, w, (1, 1), "SAME",
            dimension_numbers=("NHWC", "HWIO", "NHWC"))
        return out + b.reshape(1, 1, 1, -1)

    def bn_relu(y, g, bt):
        m = y.mean(axis=(0, 1, 2), keepdims=True)
        v = ((y - m) ** 2).mean(axis=(0, 1, 2), keepdims=True)
        return jnp.maximum(
            (y - m) * jax.lax.rsqrt(v + EPS) * g.reshape(1, 1, 1, -1)
            + bt.reshape(1, 1, 1, -1), 0.0)

    y = bn_relu(conv(x, p["w1"], p["b1"]), p["g1"], p["bt1"])
    y = bn_relu(conv(y, p["w2"], p["b2"]), p["g2"], p["bt2"])
    return jnp.transpose(y, (0, 3, 1, 2))


def make_params(key, c_in, c_out):
    ks = jax.random.split(key, 4)
    # conv weights stored as (kh*kw, Cin, Cout); BN gamma/beta as (1, C)
    return {
        "w1": jax.random.normal(ks[0], (9, c_in, c_out), jnp.float32) * 0.1,
        "b1": jax.random.normal(ks[1], (1, c_out), jnp.float32) * 0.05,
        "g1": jnp.ones((1, c_out), jnp.float32),
        "bt1": jnp.zeros((1, c_out), jnp.float32),
        "w2": jax.random.normal(ks[2], (9, c_out, c_out), jnp.float32) * 0.1,
        "b2": jax.random.normal(ks[3], (1, c_out), jnp.float32) * 0.05,
        "g2": jnp.ones((1, c_out), jnp.float32),
        "bt2": jnp.zeros((1, c_out), jnp.float32),
    }


if __name__ == "__main__":
    key = jax.random.PRNGKey(0)
    k_x, k_p = jax.random.split(key)

    N, C_IN, C_OUT, H, W = 2, 4, 8, 16, 16
    x = jax.random.normal(k_x, (N, C_IN, H, W), jnp.float32)
    params = make_params(k_p, C_IN, C_OUT)

    y_ref = bn_block2d_ref(x, params)

    # f32 path: tight numerical check against the reference.
    y_f32 = bn_block2d(x, params, use_bf16_matmul=False)
    jax.block_until_ready(y_f32)
    assert y_f32.shape == (N, C_OUT, H, W)
    assert jnp.allclose(y_f32, y_ref, rtol=2e-3, atol=2e-3), "f32 mismatch"

    # default bf16-operand / bf16-intermediate path (v6e/v7x recommendation):
    # looser tolerance, f32 accumulation + f32 BN stats keep it close.
    y_bf16 = bn_block2d(x, params)
    jax.block_until_ready(y_bf16)
    assert y_bf16.shape == (N, C_OUT, H, W)
    assert jnp.allclose(y_bf16, y_ref, rtol=1e-1, atol=1e-1), "bf16 mismatch"

    print("KERNEL_OK")
</pallas_src>

<mosaic_0001>
module attributes {stable_mosaic.version = 11 : i64} {
  func.func @_conv3x3_stats_kernel(%arg0: i32, %arg1: i32, %arg2: memref<1x16x16x128xf32, #tpu.memory_space<vmem>>, %arg3: memref<1x128xf32, #tpu.memory_space<vmem>>, %arg4: memref<1x128xf32, #tpu.memory_space<vmem>>, %arg5: memref<9x128x128xf32, #tpu.memory_space<vmem>>, %arg6: memref<1x8x16x128xf32, #tpu.memory_space<vmem>>, %arg7: memref<1x1x2x128xf32, #tpu.memory_space<vmem>>, %arg8: memref<10x16x128xf32, #tpu.memory_space<vmem>>, %arg9: memref<10x16x128xf32, #tpu.memory_space<vmem>>, %arg10: memref<10x16x128xf32, #tpu.memory_space<vmem>>) attributes {dimension_semantics = [#tpu.dimension_semantics<parallel>, #tpu.dimension_semantics<arbitrary>], iteration_bounds = array<i64: 2, 2>, scalar_prefetch = 0 : i64, scratch_operands = 3 : i64, tpu.core_type = #tpu.core_type<tc>, window_params = [{transform_indices = @transform_0, window_bounds = array<i64: 1, 16, 16, 128>}, {pipeline_mode = #tpu.pipeline_mode<synchronous>, transform_indices = @transform_1, window_bounds = array<i64: 1, 128>}, {pipeline_mode = #tpu.pipeline_mode<synchronous>, transform_indices = @transform_2, window_bounds = array<i64: 1, 128>}, {pipeline_mode = #tpu.pipeline_mode<synchronous>, transform_indices = @transform_3, window_bounds = array<i64: 9, 128, 128>}, {transform_indices = @transform_4, window_bounds = array<i64: 1, 8, 16, 128>}, {transform_indices = @transform_5, window_bounds = array<i64: 1, 1, 2, 128>}]} {
    %c8_i32 = arith.constant 8 : i32
    %0 = arith.muli %arg1, %c8_i32 : i32
    %1 = tpu.assume_multiple %0, 8 : i32
    %c0 = arith.constant 0 : index
    %2 = arith.index_cast %1 : i32 to index
    %c0_0 = arith.constant 0 : index
    %c0_1 = arith.constant 0 : index
    %3 = vector.load %arg2[%c0, %2, %c0_0, %c0_1] : memref<1x16x16x128xf32, #tpu.memory_space<vmem>>, vector<1x8x16x128xf32>
    %4 = vector.shape_cast %3 : vector<1x8x16x128xf32> to vector<8x16x128xf32>
    %c0_2 = arith.constant 0 : index
    %c0_3 = arith.constant 0 : index
    %5 = vector.load %arg3[%c0_2, %c0_3] : memref<1x128xf32, #tpu.memory_space<vmem>>, vector<1x128xf32>
    %6 = vector.shape_cast %5 : vector<1x128xf32> to vector<128xf32>
    %7 = vector.shape_cast %6 : vector<128xf32> to vector<1x1x128xf32>
    %8 = vector.broadcast %7 : vector<1x1x128xf32> to vector<8x16x128xf32>
    %9 = arith.mulf %4, %8 : vector<8x16x128xf32>
    %c0_4 = arith.constant 0 : index
    %c0_5 = arith.constant 0 : index
    %10 = vector.load %arg4[%c0_4, %c0_5] : memref<1x128xf32, #tpu.memory_space<vmem>>, vector<1x128xf32>
    %11 = vector.shape_cast %10 : vector<1x128xf32> to vector<128xf32>
    %12 = vector.shape_cast %11 : vector<128xf32> to vector<1x1x128xf32>
    %13 = vector.broadcast %12 : vector<1x1x128xf32> to vector<8x16x128xf32>
    %14 = arith.addf %9, %13 : vector<8x16x128xf32>
    %c1_i32 = arith.constant 1 : i32
    %15 = arith.subi %1, %c1_i32 : i32
    %c0_i32 = arith.constant 0 : i32
    %16 = arith.maxsi %15, %c0_i32 : i32
    %c0_6 = arith.constant 0 : index
    %17 = arith.index_cast %16 : i32 to index
    %c0_7 = arith.constant 0 : index
    %c0_8 = arith.constant 0 : index
    %18 = vector.load %arg2[%c0_6, %17, %c0_7, %c0_8] : memref<1x16x16x128xf32, #tpu.memory_space<vmem>>, vector<1x1x16x128xf32>
    %19 = vector.shape_cast %18 : vector<1x1x16x128xf32> to vector<1x16x128xf32>
    %c0_9 = arith.constant 0 : index
    %c0_10 = arith.constant 0 : index
    %20 = vector.load %arg3[%c0_9, %c0_10] : memref<1x128xf32, #tpu.memory_space<vmem>>, vector<1x128xf32>
    %21 = vector.shape_cast %20 : vector<1x128xf32> to vector<128xf32>
    %22 = vector.shape_cast %21 : vector<128xf32> to vector<1x1x128xf32>
    %23 = vector.broadcast %22 : vector<1x1x128xf32> to vector<1x16x128xf32>
    %24 = arith.mulf %19, %23 : vector<1x16x128xf32>
    %c0_11 = arith.constant 0 : index
    %c0_12 = arith.constant 0 : index
    %25 = vector.load %arg4[%c0_11, %c0_12] : memref<1x128xf32, #tpu.memory_space<vmem>>, vector<1x128xf32>
    %26 = vector.shape_cast %25 : vector<1x128xf32> to vector<128xf32>
    %27 = vector.shape_cast %26 : vector<128xf32> to vector<1x1x128xf32>
    %28 = vector.broadcast %27 : vector<1x1x128xf32> to vector<1x16x128xf32>
    %29 = arith.addf %24, %28 : vector<1x16x128xf32>
    %c8_i32_13 = arith.constant 8 : i32
    %30 = arith.addi %1, %c8_i32_13 : i32
    %c15_i32 = arith.constant 15 : i32
    %31 = arith.minsi %30, %c15_i32 : i32
    %c0_14 = arith.constant 0 : index
    %32 = arith.index_cast %31 : i32 to index
    %c0_15 = arith.constant 0 : index
    %c0_16 = arith.constant 0 : index
    %33 = vector.load %arg2[%c0_14, %32, %c0_15, %c0_16] : memref<1x16x16x128xf32, #tpu.memory_space<vmem>>, vector<1x1x16x128xf32>
    %34 = vector.shape_cast %33 : vector<1x1x16x128xf32> to vector<1x16x128xf32>
    %c0_17 = arith.constant 0 : index
    %c0_18 = arith.constant 0 : index
    %35 = vector.load %arg3[%c0_17, %c0_18] : memref<1x128xf32, #tpu.memory_space<vmem>>, vector<1x128xf32>
    %36 = vector.shape_cast %35 : vector<1x128xf32> to vector<128xf32>
    %37 = vector.shape_cast %36 : vector<128xf32> to vector<1x1x128xf32>
    %38 = vector.broadcast %37 : vector<1x1x128xf32> to vector<1x16x128xf32>
    %39 = arith.mulf %34, %38 : vector<1x16x128xf32>
    %c0_19 = arith.constant 0 : index
    %c0_20 = arith.constant 0 : index
    %40 = vector.load %arg4[%c0_19, %c0_20] : memref<1x128xf32, #tpu.memory_space<vmem>>, vector<1x128xf32>
    %41 = vector.shape_cast %40 : vector<1x128xf32> to vector<128xf32>
    %42 = vector.shape_cast %41 : vector<128xf32> to vector<1x1x128xf32>
    %43 = vector.broadcast %42 : vector<1x1x128xf32> to vector<1x16x128xf32>
    %44 = arith.addf %39, %43 : vector<1x16x128xf32>
    %c0_i32_21 = arith.constant 0 : i32
    %45 = arith.cmpi eq, %arg1, %c0_i32_21 : i32
    %cst = arith.constant 0.000000e+00 : f32
    %cst_22 = arith.constant 1.000000e+00 : f32
    %46 = arith.select %45, %cst, %cst_22 : f32
    %47 = vector.broadcast %46 : f32 to vector<1x16x128xf32>
    %48 = arith.mulf %29, %47 : vector<1x16x128xf32>
    %c1_i32_23 = arith.constant 1 : i32
    %49 = arith.cmpi eq, %arg1, %c1_i32_23 : i32
    %cst_24 = arith.constant 0.000000e+00 : f32
    %cst_25 = arith.constant 1.000000e+00 : f32
    %50 = arith.select %49, %cst_24, %cst_25 : f32
    %51 = vector.broadcast %50 : f32 to vector<1x16x128xf32>
    %52 = arith.mulf %44, %51 : vector<1x16x128xf32>
    %53 = tpu.concatenate %48, %14, %52 in 0 : vector<1x16x128xf32>, vector<8x16x128xf32>, vector<1x16x128xf32> -> vector<10x16x128xf32>
    %cst_26 = arith.constant 0.000000e+00 : f32
    %54 = vector.broadcast %cst_26 : f32 to vector<10x1x128xf32>
    %c0_27 = arith.constant 0 : index
    %c0_28 = arith.constant 0 : index
    %c0_29 = arith.constant 0 : index
    %55 = vector.load %arg9[%c0_27, %c0_28, %c0_29] : memref<10x16x128xf32, #tpu.memory_space<vmem>>, vector<10x16x128xf32>
    tpu.vector_store %arg9[%c0_27, %c0_28, %c0_29], %53 {strides = array<i32>} : memref<10x16x128xf32, #tpu.memory_space<vmem>>, vector<10x16x128xf32>,
    %c0_30 = arith.constant 0 : index
    %c0_31 = arith.constant 0 : index
    %c0_32 = arith.constant 0 : index
    %56 = vector.load %arg9[%c0_30, %c0_31, %c0_32] : memref<10x16x128xf32, #tpu.memory_space<vmem>>, vector<10x15x128xf32>
    %c0_33 = arith.constant 0 : index
    %c1 = arith.constant 1 : index
    %c0_34 = arith.constant 0 : index
    %57 = vector.load %arg8[%c0_33, %c1, %c0_34] : memref<10x16x128xf32, #tpu.memory_space<vmem>>, vector<10x15x128xf32>
    tpu.vector_store %arg8[%c0_33, %c1, %c0_34], %56 {strides = array<i32>} : memref<10x16x128xf32, #tpu.memory_space<vmem>>, vector<10x15x128xf32>,
    %c0_35 = arith.constant 0 : index
    %c0_36 = arith.constant 0 : index
    %c0_37 = arith.constant 0 : index
    %58 = vector.load %arg8[%c0_35, %c0_36, %c0_37] : memref<10x16x128xf32, #tpu.memory_space<vmem>>, vector<10x1x128xf32>
    tpu.vector_store %arg8[%c0_35, %c0_36, %c0_37], %54 {strides = array<i32>} : memref<10x16x128xf32, #tpu.memory_space<vmem>>, vector<10x1x128xf32>,
    %c0_38 = arith.constant 0 : index
    %c1_39 = arith.constant 1 : index
    %c0_40 = arith.constant 0 : index
    %59 = vector.load %arg9[%c0_38, %c1_39, %c0_40] : memref<10x16x128xf32, #tpu.memory_space<vmem>>, vector<10x15x128xf32>
    %c0_41 = arith.constant 0 : index
    %c0_42 = arith.constant 0 : index
    %c0_43 = arith.constant 0 : index
    %60 = vector.load %arg10[%c0_41, %c0_42, %c0_43] : memref<10x16x128xf32, #tpu.memory_space<vmem>>, vector<10x15x128xf32>
    tpu.vector_store %arg10[%c0_41, %c0_42, %c0_43], %59 {strides = array<i32>} : memref<10x16x128xf32, #tpu.memory_space<vmem>>, vector<10x15x128xf32>,
    %c0_44 = arith.constant 0 : index
    %c15 = arith.constant 15 : index
    %c0_45 = arith.constant 0 : index
    %61 = vector.load %arg10[%c0_44, %c15, %c0_45] : memref<10x16x128xf32, #tpu.memory_space<vmem>>, vector<10x1x128xf32>
    tpu.vector_store %arg10[%c0_44, %c15, %c0_45], %54 {strides = array<i32>} : memref<10x16x128xf32, #tpu.memory_space<vmem>>, vector<10x1x128xf32>,
    %c0_46 = arith.constant 0 : index
    %c0_47 = arith.constant 0 : index
    %c0_48 = arith.constant 0 : index
    %62 = vector.load %arg8[%c0_46, %c0_47, %c0_48] : memref<10x16x128xf32, #tpu.memory_space<vmem>>, vector<8x16x128xf32>
    %63 = vector.shape_cast %62 : vector<8x16x128xf32> to vector<128x128xf32>
    %c0_49 = arith.constant 0 : index
    %c0_50 = arith.constant 0 : index
    %c0_51 = arith.constant 0 : index
    %64 = vector.load %arg5[%c0_49, %c0_50, %c0_51] : memref<9x128x128xf32, #tpu.memory_space<vmem>>, vector<1x128x128xf32>
    %65 = vector.shape_cast %64 : vector<1x128x128xf32> to vector<128x128xf32>
    %cst_52 = arith.constant dense<0.000000e+00> : vector<128x128xf32>
    %66 = tpu.matmul %63, %65, %cst_52 {dimension_numbers = #tpu.dot_dimension_numbers<[1], [0], [0], [1], [0, 0, 1, 1], [], []>} : vector<128x128xf32>, vector<128x128xf32>, vector<128x128xf32> -> vector<128x128xf32>
    %c0_53 = arith.constant 0 : index
    %c0_54 = arith.constant 0 : index
    %c0_55 = arith.constant 0 : index
    %67 = vector.load %arg9[%c0_53, %c0_54, %c0_55] : memref<10x16x128xf32, #tpu.memory_space<vmem>>, vector<8x16x128xf32>
    %68 = vector.shape_cast %67 : vector<8x16x128xf32> to vector<128x128xf32>
    %c1_56 = arith.constant 1 : index
    %c0_57 = arith.constant 0 : index
    %c0_58 = arith.constant 0 : index
    %69 = vector.load %arg5[%c1_56, %c0_57, %c0_58] : memref<9x128x128xf32, #tpu.memory_space<vmem>>, vector<1x128x128xf32>
    %70 = vector.shape_cast %69 : vector<1x128x128xf32> to vector<128x128xf32>
    %cst_59 = arith.constant dense<0.000000e+00> : vector<128x128xf32>
    %71 = tpu.matmul %68, %70, %cst_59 {dimension_numbers = #tpu.dot_dimension_numbers<[1], [0], [0], [1], [0, 0, 1, 1], [], []>} : vector<128x128xf32>, vector<128x128xf32>, vector<128x128xf32> -> vector<128x128xf32>
    %72 = arith.addf %66, %71 : vector<128x128xf32>
    %c0_60 = arith.constant 0 : index
    %c0_61 = arith.constant 0 : index
    %c0_62 = arith.constant 0 : index
    %73 = vector.load %arg10[%c0_60, %c0_61, %c0_62] : memref<10x16x128xf32, #tpu.memory_space<vmem>>, vector<8x16x128xf32>
    %74 = vector.shape_cast %73 : vector<8x16x128xf32> to vector<128x128xf32>
    %c2 = arith.constant 2 : index
    %c0_63 = arith.constant 0 : index
    %c0_64 = arith.constant 0 : index
    %75 = vector.load %arg5[%c2, %c0_63, %c0_64] : memref<9x128x128xf32, #tpu.memory_space<vmem>>, vector<1x128x128xf32>
    %76 = vector.shape_cast %75 : vector<1x128x128xf32> to vector<128x128xf32>
    %cst_65 = arith.constant dense<0.000000e+00> : vector<128x128xf32>
    %77 = tpu.matmul %74, %76, %cst_65 {dimension_numbers = #tpu.dot_dimension_numbers<[1], [0], [0], [1], [0, 0, 1, 1], [], []>} : vector<128x128xf32>, vector<128x128xf32>, vector<128x128xf32> -> vector<128x128xf32>
    %78 = arith.addf %72, %77 : vector<128x128xf32>
    %c1_66 = arith.constant 1 : index
    %c0_67 = arith.constant 0 : index
    %c0_68 = arith.constant 0 : index
    %79 = vector.load %arg8[%c1_66, %c0_67, %c0_68] : memref<10x16x128xf32, #tpu.memory_space<vmem>>, vector<8x16x128xf32>
    %80 = vector.shape_cast %79 : vector<8x16x128xf32> to vector<128x128xf32>
    %c3 = arith.constant 3 : index
    %c0_69 = arith.constant 0 : index
    %c0_70 = arith.constant 0 : index
    %81 = vector.load %arg5[%c3, %c0_69, %c0_70] : memref<9x128x128xf32, #tpu.memory_space<vmem>>, vector<1x128x128xf32>
    %82 = vector.shape_cast %81 : vector<1x128x128xf32> to vector<128x128xf32>
    %cst_71 = arith.constant dense<0.000000e+00> : vector<128x128xf32>
    %83 = tpu.matmul %80, %82, %cst_71 {dimension_numbers = #tpu.dot_dimension_numbers<[1], [0], [0], [1], [0, 0, 1, 1], [], []>} : vector<128x128xf32>, vector<128x128xf32>, vector<128x128xf32> -> vector<128x128xf32>
    %84 = arith.addf %78, %83 : vector<128x128xf32>
    %c1_72 = arith.constant 1 : index
    %c0_73 = arith.constant 0 : index
    %c0_74 = arith.constant 0 : index
    %85 = vector.load %arg9[%c1_72, %c0_73, %c0_74] : memref<10x16x128xf32, #tpu.memory_space<vmem>>, vector<8x16x128xf32>
    %86 = vector.shape_cast %85 : vector<8x16x128xf32> to vector<128x128xf32>
    %c4 = arith.constant 4 : index
    %c0_75 = arith.constant 0 : index
    %c0_76 = arith.constant 0 : index
    %87 = vector.load %arg5[%c4, %c0_75, %c0_76] : memref<9x128x128xf32, #tpu.memory_space<vmem>>, vector<1x128x128xf32>
    %88 = vector.shape_cast %87 : vector<1x128x128xf32> to vector<128x128xf32>
    %cst_77 = arith.constant dense<0.000000e+00> : vector<128x128xf32>
    %89 = tpu.matmul %86, %88, %cst_77 {dimension_numbers = #tpu.dot_dimension_numbers<[1], [0], [0], [1], [0, 0, 1, 1], [], []>} : vector<128x128xf32>, vector<128x128xf32>, vector<128x128xf32> -> vector<128x128xf32>
    %90 = arith.addf %84, %89 : vector<128x128xf32>
    %c1_78 = arith.constant 1 : index
    %c0_79 = arith.constant 0 : index
    %c0_80 = arith.constant 0 : index
    %91 = vector.load %arg10[%c1_78, %c0_79, %c0_80] : memref<10x16x128xf32, #tpu.memory_space<vmem>>, vector<8x16x128xf32>
    %92 = vector.shape_cast %91 : vector<8x16x128xf32> to vector<128x128xf32>
    %c5 = arith.constant 5 : index
    %c0_81 = arith.constant 0 : index
    %c0_82 = arith.constant 0 : index
    %93 = vector.load %arg5[%c5, %c0_81, %c0_82] : memref<9x128x128xf32, #tpu.memory_space<vmem>>, vector<1x128x128xf32>
    %94 = vector.shape_cast %93 : vector<1x128x128xf32> to vector<128x128xf32>
    %cst_83 = arith.constant dense<0.000000e+00> : vector<128x128xf32>
    %95 = tpu.matmul %92, %94, %cst_83 {dimension_numbers = #tpu.dot_dimension_numbers<[1], [0], [0], [1], [0, 0, 1, 1], [], []>} : vector<128x128xf32>, vector<128x128xf32>, vector<128x128xf32> -> vector<128x128xf32>
    %96 = arith.addf %90, %95 : vector<128x128xf32>
    %c2_84 = arith.constant 2 : index
    %c0_85 = arith.constant 0 : index
    %c0_86 = arith.constant 0 : index
    %97 = vector.load %arg8[%c2_84, %c0_85, %c0_86] : memref<10x16x128xf32, #tpu.memory_space<vmem>>, vector<8x16x128xf32>
    %98 = vector.shape_cast %97 : vector<8x16x128xf32> to vector<128x128xf32>
    %c6 = arith.constant 6 : index
    %c0_87 = arith.constant 0 : index
    %c0_88 = arith.constant 0 : index
    %99 = vector.load %arg5[%c6, %c0_87, %c0_88] : memref<9x128x128xf32, #tpu.memory_space<vmem>>, vector<1x128x128xf32>
    %100 = vector.shape_cast %99 : vector<1x128x128xf32> to vector<128x128xf32>
    %cst_89 = arith.constant dense<0.000000e+00> : vector<128x128xf32>
    %101 = tpu.matmul %98, %100, %cst_89 {dimension_numbers = #tpu.dot_dimension_numbers<[1], [0], [0], [1], [0, 0, 1, 1], [], []>} : vector<128x128xf32>, vector<128x128xf32>, vector<128x128xf32> -> vector<128x128xf32>
    %102 = arith.addf %96, %101 : vector<128x128xf32>
    %c2_90 = arith.constant 2 : index
    %c0_91 = arith.constant 0 : index
    %c0_92 = arith.constant 0 : index
    %103 = vector.load %arg9[%c2_90, %c0_91, %c0_92] : memref<10x16x128xf32, #tpu.memory_space<vmem>>, vector<8x16x128xf32>
    %104 = vector.shape_cast %103 : vector<8x16x128xf32> to vector<128x128xf32>
    %c7 = arith.constant 7 : index
    %c0_93 = arith.constant 0 : index
    %c0_94 = arith.constant 0 : index
    %105 = vector.load %arg5[%c7, %c0_93, %c0_94] : memref<9x128x128xf32, #tpu.memory_space<vmem>>, vector<1x128x128xf32>
    %106 = vector.shape_cast %105 : vector<1x128x128xf32> to vector<128x128xf32>
    %cst_95 = arith.constant dense<0.000000e+00> : vector<128x128xf32>
    %107 = tpu.matmul %104, %106, %cst_95 {dimension_numbers = #tpu.dot_dimension_numbers<[1], [0], [0], [1], [0, 0, 1, 1], [], []>} : vector<128x128xf32>, vector<128x128xf32>, vector<128x128xf32> -> vector<128x128xf32>
    %108 = arith.addf %102, %107 : vector<128x128xf32>
    %c2_96 = arith.constant 2 : index
    %c0_97 = arith.constant 0 : index
    %c0_98 = arith.constant 0 : index
    %109 = vector.load %arg10[%c2_96, %c0_97, %c0_98] : memref<10x16x128xf32, #tpu.memory_space<vmem>>, vector<8x16x128xf32>
    %110 = vector.shape_cast %109 : vector<8x16x128xf32> to vector<128x128xf32>
    %c8 = arith.constant 8 : index
    %c0_99 = arith.constant 0 : index
    %c0_100 = arith.constant 0 : index
    %111 = vector.load %arg5[%c8, %c0_99, %c0_100] : memref<9x128x128xf32, #tpu.memory_space<vmem>>, vector<1x128x128xf32>
    %112 = vector.shape_cast %111 : vector<1x128x128xf32> to vector<128x128xf32>
    %cst_101 = arith.constant dense<0.000000e+00> : vector<128x128xf32>
    %113 = tpu.matmul %110, %112, %cst_101 {dimension_numbers = #tpu.dot_dimension_numbers<[1], [0], [0], [1], [0, 0, 1, 1], [], []>} : vector<128x128xf32>, vector<128x128xf32>, vector<128x128xf32> -> vector<128x128xf32>
    %114 = arith.addf %108, %113 : vector<128x128xf32>
    %115 = vector.shape_cast %114 : vector<128x128xf32> to vector<8x16x128xf32>
    %c0_102 = arith.constant 0 : index
    %c0_103 = arith.constant 0 : index
    %c0_104 = arith.constant 0 : index
    %c0_105 = arith.constant 0 : index
    %116 = vector.load %arg6[%c0_102, %c0_103, %c0_104, %c0_105] : memref<1x8x16x128xf32, #tpu.memory_space<vmem>>, vector<1x8x16x128xf32>
    %117 = vector.shape_cast %116 : vector<1x8x16x128xf32> to vector<8x16x128xf32>
    %118 = vector.shape_cast %115 : vector<8x16x128xf32> to vector<1x8x16x128xf32>
    tpu.vector_store %arg6[%c0_102, %c0_103, %c0_104, %c0_105], %118 {strides = array<i32>} : memref<1x8x16x128xf32, #tpu.memory_space<vmem>>, vector<1x8x16x128xf32>,
    %cst_106 = arith.constant dense<0.000000e+00> : vector<128xf32>
    %119 = vector.multi_reduction <add>, %114, %cst_106 [0] : vector<128x128xf32> to vector<128xf32>
    %120 = vector.shape_cast %119 : vector<128xf32> to vector<1x128xf32>
    %121 = arith.mulf %114, %114 : vector<128x128xf32>
    %cst_107 = arith.constant dense<0.000000e+00> : vector<128xf32>
    %122 = vector.multi_reduction <add>, %121, %cst_107 [0] : vector<128x128xf32> to vector<128xf32>
    %123 = vector.shape_cast %122 : vector<128xf32> to vector<1x128xf32>
    %124 = tpu.concatenate %120, %123 in 0 : vector<1x128xf32>, vector<1x128xf32> -> vector<2x128xf32>
    %c0_108 = arith.constant 0 : index
    %c0_109 = arith.constant 0 : index
    %c0_110 = arith.constant 0 : index
    %c0_111 = arith.constant 0 : index
    %125 = vector.load %arg7[%c0_108, %c0_109, %c0_110, %c0_111] : memref<1x1x2x128xf32, #tpu.memory_space<vmem>>, vector<1x1x2x128xf32>
    %126 = vector.shape_cast %125 : vector<1x1x2x128xf32> to vector<2x128xf32>
    %127 = vector.shape_cast %124 : vector<2x128xf32> to vector<1x1x2x128xf32>
    tpu.vector_store %arg7[%c0_108, %c0_109, %c0_110, %c0_111], %127 {strides = array<i32>} : memref<1x1x2x128xf32, #tpu.memory_space<vmem>>, vector<1x1x2x128xf32>,
    return
  }
  func.func @transform_0(%arg0: i32, %arg1: i32) -> (i32, i32, i32, i32) {
    %c0_i32 = arith.constant 0 : i32
    %c0_i32_0 = arith.constant 0 : i32
    %c0_i32_1 = arith.constant 0 : i32
    %c0_i32_2 = arith.constant 0 : i32
    return %arg0, %c0_i32, %c0_i32_0, %c0_i32_1 : i32, i32, i32, i32
  }
  func.func @transform_1(%arg0: i32, %arg1: i32) -> (i32, i32) {
    %c0_i32 = arith.constant 0 : i32
    %c0_i32_0 = arith.constant 0 : i32
    %c0_i32_1 = arith.constant 0 : i32
    return %c0_i32, %c0_i32_0 : i32, i32
  }
  func.func @transform_2(%arg0: i32, %arg1: i32) -> (i32, i32) {
    %c0_i32 = arith.constant 0 : i32
    %c0_i32_0 = arith.constant 0 : i32
    %c0_i32_1 = arith.constant 0 : i32
    return %c0_i32, %c0_i32_0 : i32, i32
  }
  func.func @transform_3(%arg0: i32, %arg1: i32) -> (i32, i32, i32) {
    %c0_i32 = arith.constant 0 : i32
    %c0_i32_0 = arith.constant 0 : i32
    %c0_i32_1 = arith.constant 0 : i32
    %c0_i32_2 = arith.constant 0 : i32
    return %c0_i32, %c0_i32_0, %c0_i32_1 : i32, i32, i32
  }
  func.func @transform_4(%arg0: i32, %arg1: i32) -> (i32, i32, i32, i32) {
    %c0_i32 = arith.constant 0 : i32
    %c0_i32_0 = arith.constant 0 : i32
    %c0_i32_1 = arith.constant 0 : i32
    return %arg0, %arg1, %c0_i32, %c0_i32_0 : i32, i32, i32, i32
  }
  func.func @transform_5(%arg0: i32, %arg1: i32) -> (i32, i32, i32, i32) {
    %c0_i32 = arith.constant 0 : i32
    %c0_i32_0 = arith.constant 0 : i32
    %c0_i32_1 = arith.constant 0 : i32
    return %arg0, %arg1, %c0_i32, %c0_i32_0 : i32, i32, i32, i32
  }
}

module attributes {stable_mosaic.version = 11 : i64} {
  func.func @_bn_relu_kernel(%arg0: i32, %arg1: memref<512x128xf32, #tpu.memory_space<vmem>>, %arg2: memref<1x128xf32, #tpu.memory_space<vmem>>, %arg3: memref<1x128xf32, #tpu.memory_space<vmem>>, %arg4: memref<512x8xf32, #tpu.memory_space<vmem>>) attributes {dimension_semantics = [#tpu.dimension_semantics<parallel>], iteration_bounds = array<i64: 1>, scalar_prefetch = 0 : i64, scratch_operands = 0 : i64, tpu.core_type = #tpu.core_type<tc>, window_params = [{transform_indices = @transform_0, window_bounds = array<i64: 512, 128>}, {pipeline_mode = #tpu.pipeline_mode<synchronous>, transform_indices = @transform_1, window_bounds = array<i64: 1, 128>}, {pipeline_mode = #tpu.pipeline_mode<synchronous>, transform_indices = @transform_2, window_bounds = array<i64: 1, 128>}, {transform_indices = @transform_3, window_bounds = array<i64: 512, 8>}]} {
    %c0 = arith.constant 0 : index
    %c0_0 = arith.constant 0 : index
    %0 = vector.load %arg1[%c0, %c0_0] : memref<512x128xf32, #tpu.memory_space<vmem>>, vector<512x128xf32>
    %c0_1 = arith.constant 0 : index
    %c0_2 = arith.constant 0 : index
    %1 = vector.load %arg2[%c0_1, %c0_2] : memref<1x128xf32, #tpu.memory_space<vmem>>, vector<1x128xf32>
    %2 = vector.shape_cast %1 : vector<1x128xf32> to vector<128xf32>
    %3 = vector.shape_cast %2 : vector<128xf32> to vector<1x128xf32>
    %4 = vector.broadcast %3 : vector<1x128xf32> to vector<512x128xf32>
    %5 = arith.mulf %0, %4 : vector<512x128xf32>
    %c0_3 = arith.constant 0 : index
    %c0_4 = arith.constant 0 : index
    %6 = vector.load %arg3[%c0_3, %c0_4] : memref<1x128xf32, #tpu.memory_space<vmem>>, vector<1x128xf32>
    %7 = vector.shape_cast %6 : vector<1x128xf32> to vector<128xf32>
    %8 = vector.shape_cast %7 : vector<128xf32> to vector<1x128xf32>
    %9 = vector.broadcast %8 : vector<1x128xf32> to vector<512x128xf32>
    %10 = arith.addf %5, %9 : vector<512x128xf32>
    %cst = arith.constant 0.000000e+00 : f32
    %11 = vector.broadcast %cst : f32 to vector<512x128xf32>
    %12 = arith.maximumf %10, %11 : vector<512x128xf32>
    %13 = vector.extract_strided_slice %12 {offsets = [0, 0], sizes = [512, 8], strides = [1, 1]} : vector<512x128xf32> to vector<512x8xf32>
    %c0_5 = arith.constant 0 : index
    %c0_6 = arith.constant 0 : index
    %14 = vector.load %arg4[%c0_5, %c0_6] : memref<512x8xf32, #tpu.memory_space<vmem>>, vector<512x8xf32>
    tpu.vector_store %arg4[%c0_5, %c0_6], %13 {strides = array<i32>} : memref<512x8xf32, #tpu.memory_space<vmem>>, vector<512x8xf32>,
    return
  }
  func.func @transform_0(%arg0: i32) -> (i32, i32) {
    %c0_i32 = arith.constant 0 : i32
    %c0_i32_0 = arith.constant 0 : i32
    return %arg0, %c0_i32 : i32, i32
  }
  func.func @transform_1(%arg0: i32) -> (i32, i32) {
    %c0_i32 = arith.constant 0 : i32
    %c0_i32_0 = arith.constant 0 : i32
    %c0_i32_1 = arith.constant 0 : i32
    return %c0_i32, %c0_i32_0 : i32, i32
  }
  func.func @transform_2(%arg0: i32) -> (i32, i32) {
    %c0_i32 = arith.constant 0 : i32
    %c0_i32_0 = arith.constant 0 : i32
    %c0_i32_1 = arith.constant 0 : i32
    return %c0_i32, %c0_i32_0 : i32, i32
  }
  func.func @transform_3(%arg0: i32) -> (i32, i32) {
    %c0_i32 = arith.constant 0 : i32
    %c0_i32_0 = arith.constant 0 : i32
    return %arg0, %c0_i32 : i32, i32
  }
}

module attributes {stable_mosaic.version = 11 : i64} {
  func.func @_conv3x3_stats_kernel(%arg0: i32, %arg1: i32, %arg2: memref<1x16x16x128xf32, #tpu.memory_space<vmem>>, %arg3: memref<1x128xf32, #tpu.memory_space<vmem>>, %arg4: memref<1x128xf32, #tpu.memory_space<vmem>>, %arg5: memref<9x128x128xf32, #tpu.memory_space<vmem>>, %arg6: memref<1x8x16x128xf32, #tpu.memory_space<vmem>>, %arg7: memref<1x1x2x128xf32, #tpu.memory_space<vmem>>, %arg8: memref<10x16x128xf32, #tpu.memory_space<vmem>>, %arg9: memref<10x16x128xf32, #tpu.memory_space<vmem>>, %arg10: memref<10x16x128xf32, #tpu.memory_space<vmem>>) attributes {dimension_semantics = [#tpu.dimension_semantics<parallel>, #tpu.dimension_semantics<arbitrary>], iteration_bounds = array<i64: 2, 2>, scalar_prefetch = 0 : i64, scratch_operands = 3 : i64, tpu.core_type = #tpu.core_type<tc>, window_params = [{transform_indices = @transform_0, window_bounds = array<i64: 1, 16, 16, 128>}, {pipeline_mode = #tpu.pipeline_mode<synchronous>, transform_indices = @transform_1, window_bounds = array<i64: 1, 128>}, {pipeline_mode = #tpu.pipeline_mode<synchronous>, transform_indices = @transform_2, window_bounds = array<i64: 1, 128>}, {pipeline_mode = #tpu.pipeline_mode<synchronous>, transform_indices = @transform_3, window_bounds = array<i64: 9, 128, 128>}, {transform_indices = @transform_4, window_bounds = array<i64: 1, 8, 16, 128>}, {transform_indices = @transform_5, window_bounds = array<i64: 1, 1, 2, 128>}]} {
    %c8_i32 = arith.constant 8 : i32
    %0 = arith.muli %arg1, %c8_i32 : i32
    %1 = tpu.assume_multiple %0, 8 : i32
    %c0 = arith.constant 0 : index
    %2 = arith.index_cast %1 : i32 to index
    %c0_0 = arith.constant 0 : index
    %c0_1 = arith.constant 0 : index
    %3 = vector.load %arg2[%c0, %2, %c0_0, %c0_1] : memref<1x16x16x128xf32, #tpu.memory_space<vmem>>, vector<1x8x16x128xf32>
    %4 = vector.shape_cast %3 : vector<1x8x16x128xf32> to vector<8x16x128xf32>
    %c0_2 = arith.constant 0 : index
    %c0_3 = arith.constant 0 : index
    %5 = vector.load %arg3[%c0_2, %c0_3] : memref<1x128xf32, #tpu.memory_space<vmem>>, vector<1x128xf32>
    %6 = vector.shape_cast %5 : vector<1x128xf32> to vector<128xf32>
    %7 = vector.shape_cast %6 : vector<128xf32> to vector<1x1x128xf32>
    %8 = vector.broadcast %7 : vector<1x1x128xf32> to vector<8x16x128xf32>
    %9 = arith.mulf %4, %8 : vector<8x16x128xf32>
    %c0_4 = arith.constant 0 : index
    %c0_5 = arith.constant 0 : index
    %10 = vector.load %arg4[%c0_4, %c0_5] : memref<1x128xf32, #tpu.memory_space<vmem>>, vector<1x128xf32>
    %11 = vector.shape_cast %10 : vector<1x128xf32> to vector<128xf32>
    %12 = vector.shape_cast %11 : vector<128xf32> to vector<1x1x128xf32>
    %13 = vector.broadcast %12 : vector<1x1x128xf32> to vector<8x16x128xf32>
    %14 = arith.addf %9, %13 : vector<8x16x128xf32>
    %cst = arith.constant 0.000000e+00 : f32
    %15 = vector.broadcast %cst : f32 to vector<8x16x128xf32>
    %16 = arith.maximumf %14, %15 : vector<8x16x128xf32>
    %c1_i32 = arith.constant 1 : i32
    %17 = arith.subi %1, %c1_i32 : i32
    %c0_i32 = arith.constant 0 : i32
    %18 = arith.maxsi %17, %c0_i32 : i32
    %c0_6 = arith.constant 0 : index
    %19 = arith.index_cast %18 : i32 to index
    %c0_7 = arith.constant 0 : index
    %c0_8 = arith.constant 0 : index
    %20 = vector.load %arg2[%c0_6, %19, %c0_7, %c0_8] : memref<1x16x16x128xf32, #tpu.memory_space<vmem>>, vector<1x1x16x128xf32>
    %21 = vector.shape_cast %20 : vector<1x1x16x128xf32> to vector<1x16x128xf32>
    %c0_9 = arith.constant 0 : index
    %c0_10 = arith.constant 0 : index
    %22 = vector.load %arg3[%c0_9, %c0_10] : memref<1x128xf32, #tpu.memory_space<vmem>>, vector<1x128xf32>
    %23 = vector.shape_cast %22 : vector<1x128xf32> to vector<128xf32>
    %24 = vector.shape_cast %23 : vector<128xf32> to vector<1x1x128xf32>
    %25 = vector.broadcast %24 : vector<1x1x128xf32> to vector<1x16x128xf32>
    %26 = arith.mulf %21, %25 : vector<1x16x128xf32>
    %c0_11 = arith.constant 0 : index
    %c0_12 = arith.constant 0 : index
    %27 = vector.load %arg4[%c0_11, %c0_12] : memref<1x128xf32, #tpu.memory_space<vmem>>, vector<1x128xf32>
    %28 = vector.shape_cast %27 : vector<1x128xf32> to vector<128xf32>
    %29 = vector.shape_cast %28 : vector<128xf32> to vector<1x1x128xf32>
    %30 = vector.broadcast %29 : vector<1x1x128xf32> to vector<1x16x128xf32>
    %31 = arith.addf %26, %30 : vector<1x16x128xf32>
    %cst_13 = arith.constant 0.000000e+00 : f32
    %32 = vector.broadcast %cst_13 : f32 to vector<1x16x128xf32>
    %33 = arith.maximumf %31, %32 : vector<1x16x128xf32>
    %c8_i32_14 = arith.constant 8 : i32
    %34 = arith.addi %1, %c8_i32_14 : i32
    %c15_i32 = arith.constant 15 : i32
    %35 = arith.minsi %34, %c15_i32 : i32
    %c0_15 = arith.constant 0 : index
    %36 = arith.index_cast %35 : i32 to index
    %c0_16 = arith.constant 0 : index
    %c0_17 = arith.constant 0 : index
    %37 = vector.load %arg2[%c0_15, %36, %c0_16, %c0_17] : memref<1x16x16x128xf32, #tpu.memory_space<vmem>>, vector<1x1x16x128xf32>
    %38 = vector.shape_cast %37 : vector<1x1x16x128xf32> to vector<1x16x128xf32>
    %c0_18 = arith.constant 0 : index
    %c0_19 = arith.constant 0 : index
    %39 = vector.load %arg3[%c0_18, %c0_19] : memref<1x128xf32, #tpu.memory_space<vmem>>, vector<1x128xf32>
    %40 = vector.shape_cast %39 : vector<1x128xf32> to vector<128xf32>
    %41 = vector.shape_cast %40 : vector<128xf32> to vector<1x1x128xf32>
    %42 = vector.broadcast %41 : vector<1x1x128xf32> to vector<1x16x128xf32>
    %43 = arith.mulf %38, %42 : vector<1x16x128xf32>
    %c0_20 = arith.constant 0 : index
    %c0_21 = arith.constant 0 : index
    %44 = vector.load %arg4[%c0_20, %c0_21] : memref<1x128xf32, #tpu.memory_space<vmem>>, vector<1x128xf32>
    %45 = vector.shape_cast %44 : vector<1x128xf32> to vector<128xf32>
    %46 = vector.shape_cast %45 : vector<128xf32> to vector<1x1x128xf32>
    %47 = vector.broadcast %46 : vector<1x1x128xf32> to vector<1x16x128xf32>
    %48 = arith.addf %43, %47 : vector<1x16x128xf32>
    %cst_22 = arith.constant 0.000000e+00 : f32
    %49 = vector.broadcast %cst_22 : f32 to vector<1x16x128xf32>
    %50 = arith.maximumf %48, %49 : vector<1x16x128xf32>
    %c0_i32_23 = arith.constant 0 : i32
    %51 = arith.cmpi eq, %arg1, %c0_i32_23 : i32
    %cst_24 = arith.constant 0.000000e+00 : f32
    %cst_25 = arith.constant 1.000000e+00 : f32
    %52 = arith.select %51, %cst_24, %cst_25 : f32
    %53 = vector.broadcast %52 : f32 to vector<1x16x128xf32>
    %54 = arith.mulf %33, %53 : vector<1x16x128xf32>
    %c1_i32_26 = arith.constant 1 : i32
    %55 = arith.cmpi eq, %arg1, %c1_i32_26 : i32
    %cst_27 = arith.constant 0.000000e+00 : f32
    %cst_28 = arith.constant 1.000000e+00 : f32
    %56 = arith.select %55, %cst_27, %cst_28 : f32
    %57 = vector.broadcast %56 : f32 to vector<1x16x128xf32>
    %58 = arith.mulf %50, %57 : vector<1x16x128xf32>
    %59 = tpu.concatenate %54, %16, %58 in 0 : vector<1x16x128xf32>, vector<8x16x128xf32>, vector<1x16x128xf32> -> vector<10x16x128xf32>
    %cst_29 = arith.constant 0.000000e+00 : f32
    %60 = vector.broadcast %cst_29 : f32 to vector<10x1x128xf32>
    %c0_30 = arith.constant 0 : index
    %c0_31 = arith.constant 0 : index
    %c0_32 = arith.constant 0 : index
    %61 = vector.load %arg9[%c0_30, %c0_31, %c0_32] : memref<10x16x128xf32, #tpu.memory_space<vmem>>, vector<10x16x128xf32>
    tpu.vector_store %arg9[%c0_30, %c0_31, %c0_32], %59 {strides = array<i32>} : memref<10x16x128xf32, #tpu.memory_space<vmem>>, vector<10x16x128xf32>,
    %c0_33 = arith.constant 0 : index
    %c0_34 = arith.constant 0 : index
    %c0_35 = arith.constant 0 : index
    %62 = vector.load %arg9[%c0_33, %c0_34, %c0_35] : memref<10x16x128xf32, #tpu.memory_space<vmem>>, vector<10x15x128xf32>
    %c0_36 = arith.constant 0 : index
    %c1 = arith.constant 1 : index
    %c0_37 = arith.constant 0 : index
    %63 = vector.load %arg8[%c0_36, %c1, %c0_37] : memref<10x16x128xf32, #tpu.memory_space<vmem>>, vector<10x15x128xf32>
    tpu.vector_store %arg8[%c0_36, %c1, %c0_37], %62 {strides = array<i32>} : memref<10x16x128xf32, #tpu.memory_space<vmem>>, vector<10x15x128xf32>,
    %c0_38 = arith.constant 0 : index
    %c0_39 = arith.constant 0 : index
    %c0_40 = arith.constant 0 : index
    %64 = vector.load %arg8[%c0_38, %c0_39, %c0_40] : memref<10x16x128xf32, #tpu.memory_space<vmem>>, vector<10x1x128xf32>
    tpu.vector_store %arg8[%c0_38, %c0_39, %c0_40], %60 {strides = array<i32>} : memref<10x16x128xf32, #tpu.memory_space<vmem>>, vector<10x1x128xf32>,
    %c0_41 = arith.constant 0 : index
    %c1_42 = arith.constant 1 : index
    %c0_43 = arith.constant 0 : index
    %65 = vector.load %arg9[%c0_41, %c1_42, %c0_43] : memref<10x16x128xf32, #tpu.memory_space<vmem>>, vector<10x15x128xf32>
    %c0_44 = arith.constant 0 : index
    %c0_45 = arith.constant 0 : index
    %c0_46 = arith.constant 0 : index
    %66 = vector.load %arg10[%c0_44, %c0_45, %c0_46] : memref<10x16x128xf32, #tpu.memory_space<vmem>>, vector<10x15x128xf32>
    tpu.vector_store %arg10[%c0_44, %c0_45, %c0_46], %65 {strides = array<i32>} : memref<10x16x128xf32, #tpu.memory_space<vmem>>, vector<10x15x128xf32>,
    %c0_47 = arith.constant 0 : index
    %c15 = arith.constant 15 : index
    %c0_48 = arith.constant 0 : index
    %67 = vector.load %arg10[%c0_47, %c15, %c0_48] : memref<10x16x128xf32, #tpu.memory_space<vmem>>, vector<10x1x128xf32>
    tpu.vector_store %arg10[%c0_47, %c15, %c0_48], %60 {strides = array<i32>} : memref<10x16x128xf32, #tpu.memory_space<vmem>>, vector<10x1x128xf32>,
    %c0_49 = arith.constant 0 : index
    %c0_50 = arith.constant 0 : index
    %c0_51 = arith.constant 0 : index
    %68 = vector.load %arg8[%c0_49, %c0_50, %c0_51] : memref<10x16x128xf32, #tpu.memory_space<vmem>>, vector<8x16x128xf32>
    %69 = vector.shape_cast %68 : vector<8x16x128xf32> to vector<128x128xf32>
    %c0_52 = arith.constant 0 : index
    %c0_53 = arith.constant 0 : index
    %c0_54 = arith.constant 0 : index
    %70 = vector.load %arg5[%c0_52, %c0_53, %c0_54] : memref<9x128x128xf32, #tpu.memory_space<vmem>>, vector<1x128x128xf32>
    %71 = vector.shape_cast %70 : vector<1x128x128xf32> to vector<128x128xf32>
    %cst_55 = arith.constant dense<0.000000e+00> : vector<128x128xf32>
    %72 = tpu.matmul %69, %71, %cst_55 {dimension_numbers = #tpu.dot_dimension_numbers<[1], [0], [0], [1], [0, 0, 1, 1], [], []>} : vector<128x128xf32>, vector<128x128xf32>, vector<128x128xf32> -> vector<128x128xf32>
    %c0_56 = arith.constant 0 : index
    %c0_57 = arith.constant 0 : index
    %c0_58 = arith.constant 0 : index
    %73 = vector.load %arg9[%c0_56, %c0_57, %c0_58] : memref<10x16x128xf32, #tpu.memory_space<vmem>>, vector<8x16x128xf32>
    %74 = vector.shape_cast %73 : vector<8x16x128xf32> to vector<128x128xf32>
    %c1_59 = arith.constant 1 : index
    %c0_60 = arith.constant 0 : index
    %c0_61 = arith.constant 0 : index
    %75 = vector.load %arg5[%c1_59, %c0_60, %c0_61] : memref<9x128x128xf32, #tpu.memory_space<vmem>>, vector<1x128x128xf32>
    %76 = vector.shape_cast %75 : vector<1x128x128xf32> to vector<128x128xf32>
    %cst_62 = arith.constant dense<0.000000e+00> : vector<128x128xf32>
    %77 = tpu.matmul %74, %76, %cst_62 {dimension_numbers = #tpu.dot_dimension_numbers<[1], [0], [0], [1], [0, 0, 1, 1], [], []>} : vector<128x128xf32>, vector<128x128xf32>, vector<128x128xf32> -> vector<128x128xf32>
    %78 = arith.addf %72, %77 : vector<128x128xf32>
    %c0_63 = arith.constant 0 : index
    %c0_64 = arith.constant 0 : index
    %c0_65 = arith.constant 0 : index
    %79 = vector.load %arg10[%c0_63, %c0_64, %c0_65] : memref<10x16x128xf32, #tpu.memory_space<vmem>>, vector<8x16x128xf32>
    %80 = vector.shape_cast %79 : vector<8x16x128xf32> to vector<128x128xf32>
    %c2 = arith.constant 2 : index
    %c0_66 = arith.constant 0 : index
    %c0_67 = arith.constant 0 : index
    %81 = vector.load %arg5[%c2, %c0_66, %c0_67] : memref<9x128x128xf32, #tpu.memory_space<vmem>>, vector<1x128x128xf32>
    %82 = vector.shape_cast %81 : vector<1x128x128xf32> to vector<128x128xf32>
    %cst_68 = arith.constant dense<0.000000e+00> : vector<128x128xf32>
    %83 = tpu.matmul %80, %82, %cst_68 {dimension_numbers = #tpu.dot_dimension_numbers<[1], [0], [0], [1], [0, 0, 1, 1], [], []>} : vector<128x128xf32>, vector<128x128xf32>, vector<128x128xf32> -> vector<128x128xf32>
    %84 = arith.addf %78, %83 : vector<128x128xf32>
    %c1_69 = arith.constant 1 : index
    %c0_70 = arith.constant 0 : index
    %c0_71 = arith.constant 0 : index
    %85 = vector.load %arg8[%c1_69, %c0_70, %c0_71] : memref<10x16x128xf32, #tpu.memory_space<vmem>>, vector<8x16x128xf32>
    %86 = vector.shape_cast %85 : vector<8x16x128xf32> to vector<128x128xf32>
    %c3 = arith.constant 3 : index
    %c0_72 = arith.constant 0 : index
    %c0_73 = arith.constant 0 : index
    %87 = vector.load %arg5[%c3, %c0_72, %c0_73] : memref<9x128x128xf32, #tpu.memory_space<vmem>>, vector<1x128x128xf32>
    %88 = vector.shape_cast %87 : vector<1x128x128xf32> to vector<128x128xf32>
    %cst_74 = arith.constant dense<0.000000e+00> : vector<128x128xf32>
    %89 = tpu.matmul %86, %88, %cst_74 {dimension_numbers = #tpu.dot_dimension_numbers<[1], [0], [0], [1], [0, 0, 1, 1], [], []>} : vector<128x128xf32>, vector<128x128xf32>, vector<128x128xf32> -> vector<128x128xf32>
    %90 = arith.addf %84, %89 : vector<128x128xf32>
    %c1_75 = arith.constant 1 : index
    %c0_76 = arith.constant 0 : index
    %c0_77 = arith.constant 0 : index
    %91 = vector.load %arg9[%c1_75, %c0_76, %c0_77] : memref<10x16x128xf32, #tpu.memory_space<vmem>>, vector<8x16x128xf32>
    %92 = vector.shape_cast %91 : vector<8x16x128xf32> to vector<128x128xf32>
    %c4 = arith.constant 4 : index
    %c0_78 = arith.constant 0 : index
    %c0_79 = arith.constant 0 : index
    %93 = vector.load %arg5[%c4, %c0_78, %c0_79] : memref<9x128x128xf32, #tpu.memory_space<vmem>>, vector<1x128x128xf32>
    %94 = vector.shape_cast %93 : vector<1x128x128xf32> to vector<128x128xf32>
    %cst_80 = arith.constant dense<0.000000e+00> : vector<128x128xf32>
    %95 = tpu.matmul %92, %94, %cst_80 {dimension_numbers = #tpu.dot_dimension_numbers<[1], [0], [0], [1], [0, 0, 1, 1], [], []>} : vector<128x128xf32>, vector<128x128xf32>, vector<128x128xf32> -> vector<128x128xf32>
    %96 = arith.addf %90, %95 : vector<128x128xf32>
    %c1_81 = arith.constant 1 : index
    %c0_82 = arith.constant 0 : index
    %c0_83 = arith.constant 0 : index
    %97 = vector.load %arg10[%c1_81, %c0_82, %c0_83] : memref<10x16x128xf32, #tpu.memory_space<vmem>>, vector<8x16x128xf32>
    %98 = vector.shape_cast %97 : vector<8x16x128xf32> to vector<128x128xf32>
    %c5 = arith.constant 5 : index
    %c0_84 = arith.constant 0 : index
    %c0_85 = arith.constant 0 : index
    %99 = vector.load %arg5[%c5, %c0_84, %c0_85] : memref<9x128x128xf32, #tpu.memory_space<vmem>>, vector<1x128x128xf32>
    %100 = vector.shape_cast %99 : vector<1x128x128xf32> to vector<128x128xf32>
    %cst_86 = arith.constant dense<0.000000e+00> : vector<128x128xf32>
    %101 = tpu.matmul %98, %100, %cst_86 {dimension_numbers = #tpu.dot_dimension_numbers<[1], [0], [0], [1], [0, 0, 1, 1], [], []>} : vector<128x128xf32>, vector<128x128xf32>, vector<128x128xf32> -> vector<128x128xf32>
    %102 = arith.addf %96, %101 : vector<128x128xf32>
    %c2_87 = arith.constant 2 : index
    %c0_88 = arith.constant 0 : index
    %c0_89 = arith.constant 0 : index
    %103 = vector.load %arg8[%c2_87, %c0_88, %c0_89] : memref<10x16x128xf32, #tpu.memory_space<vmem>>, vector<8x16x128xf32>
    %104 = vector.shape_cast %103 : vector<8x16x128xf32> to vector<128x128xf32>
    %c6 = arith.constant 6 : index
    %c0_90 = arith.constant 0 : index
    %c0_91 = arith.constant 0 : index
    %105 = vector.load %arg5[%c6, %c0_90, %c0_91] : memref<9x128x128xf32, #tpu.memory_space<vmem>>, vector<1x128x128xf32>
    %106 = vector.shape_cast %105 : vector<1x128x128xf32> to vector<128x128xf32>
    %cst_92 = arith.constant dense<0.000000e+00> : vector<128x128xf32>
    %107 = tpu.matmul %104, %106, %cst_92 {dimension_numbers = #tpu.dot_dimension_numbers<[1], [0], [0], [1], [0, 0, 1, 1], [], []>} : vector<128x128xf32>, vector<128x128xf32>, vector<128x128xf32> -> vector<128x128xf32>
    %108 = arith.addf %102, %107 : vector<128x128xf32>
    %c2_93 = arith.constant 2 : index
    %c0_94 = arith.constant 0 : index
    %c0_95 = arith.constant 0 : index
    %109 = vector.load %arg9[%c2_93, %c0_94, %c0_95] : memref<10x16x128xf32, #tpu.memory_space<vmem>>, vector<8x16x128xf32>
    %110 = vector.shape_cast %109 : vector<8x16x128xf32> to vector<128x128xf32>
    %c7 = arith.constant 7 : index
    %c0_96 = arith.constant 0 : index
    %c0_97 = arith.constant 0 : index
    %111 = vector.load %arg5[%c7, %c0_96, %c0_97] : memref<9x128x128xf32, #tpu.memory_space<vmem>>, vector<1x128x128xf32>
    %112 = vector.shape_cast %111 : vector<1x128x128xf32> to vector<128x128xf32>
    %cst_98 = arith.constant dense<0.000000e+00> : vector<128x128xf32>
    %113 = tpu.matmul %110, %112, %cst_98 {dimension_numbers = #tpu.dot_dimension_numbers<[1], [0], [0], [1], [0, 0, 1, 1], [], []>} : vector<128x128xf32>, vector<128x128xf32>, vector<128x128xf32> -> vector<128x128xf32>
    %114 = arith.addf %108, %113 : vector<128x128xf32>
    %c2_99 = arith.constant 2 : index
    %c0_100 = arith.constant 0 : index
    %c0_101 = arith.constant 0 : index
    %115 = vector.load %arg10[%c2_99, %c0_100, %c0_101] : memref<10x16x128xf32, #tpu.memory_space<vmem>>, vector<8x16x128xf32>
    %116 = vector.shape_cast %115 : vector<8x16x128xf32> to vector<128x128xf32>
    %c8 = arith.constant 8 : index
    %c0_102 = arith.constant 0 : index
    %c0_103 = arith.constant 0 : index
    %117 = vector.load %arg5[%c8, %c0_102, %c0_103] : memref<9x128x128xf32, #tpu.memory_space<vmem>>, vector<1x128x128xf32>
    %118 = vector.shape_cast %117 : vector<1x128x128xf32> to vector<128x128xf32>
    %cst_104 = arith.constant dense<0.000000e+00> : vector<128x128xf32>
    %119 = tpu.matmul %116, %118, %cst_104 {dimension_numbers = #tpu.dot_dimension_numbers<[1], [0], [0], [1], [0, 0, 1, 1], [], []>} : vector<128x128xf32>, vector<128x128xf32>, vector<128x128xf32> -> vector<128x128xf32>
    %120 = arith.addf %114, %119 : vector<128x128xf32>
    %121 = vector.shape_cast %120 : vector<128x128xf32> to vector<8x16x128xf32>
    %c0_105 = arith.constant 0 : index
    %c0_106 = arith.constant 0 : index
    %c0_107 = arith.constant 0 : index
    %c0_108 = arith.constant 0 : index
    %122 = vector.load %arg6[%c0_105, %c0_106, %c0_107, %c0_108] : memref<1x8x16x128xf32, #tpu.memory_space<vmem>>, vector<1x8x16x128xf32>
    %123 = vector.shape_cast %122 : vector<1x8x16x128xf32> to vector<8x16x128xf32>
    %124 = vector.shape_cast %121 : vector<8x16x128xf32> to vector<1x8x16x128xf32>
    tpu.vector_store %arg6[%c0_105, %c0_106, %c0_107, %c0_108], %124 {strides = array<i32>} : memref<1x8x16x128xf32, #tpu.memory_space<vmem>>, vector<1x8x16x128xf32>,
    %cst_109 = arith.constant dense<0.000000e+00> : vector<128xf32>
    %125 = vector.multi_reduction <add>, %120, %cst_109 [0] : vector<128x128xf32> to vector<128xf32>
    %126 = vector.shape_cast %125 : vector<128xf32> to vector<1x128xf32>
    %127 = arith.mulf %120, %120 : vector<128x128xf32>
    %cst_110 = arith.constant dense<0.000000e+00> : vector<128xf32>
    %128 = vector.multi_reduction <add>, %127, %cst_110 [0] : vector<128x128xf32> to vector<128xf32>
    %129 = vector.shape_cast %128 : vector<128xf32> to vector<1x128xf32>
    %130 = tpu.concatenate %126, %129 in 0 : vector<1x128xf32>, vector<1x128xf32> -> vector<2x128xf32>
    %c0_111 = arith.constant 0 : index
    %c0_112 = arith.constant 0 : index
    %c0_113 = arith.constant 0 : index
    %c0_114 = arith.constant 0 : index
    %131 = vector.load %arg7[%c0_111, %c0_112, %c0_113, %c0_114] : memref<1x1x2x128xf32, #tpu.memory_space<vmem>>, vector<1x1x2x128xf32>
    %132 = vector.shape_cast %131 : vector<1x1x2x128xf32> to vector<2x128xf32>
    %133 = vector.shape_cast %130 : vector<2x128xf32> to vector<1x1x2x128xf32>
    tpu.vector_store %arg7[%c0_111, %c0_112, %c0_113, %c0_114], %133 {strides = array<i32>} : memref<1x1x2x128xf32, #tpu.memory_space<vmem>>, vector<1x1x2x128xf32>,
    return
  }
  func.func @transform_0(%arg0: i32, %arg1: i32) -> (i32, i32, i32, i32) {
    %c0_i32 = arith.constant 0 : i32
    %c0_i32_0 = arith.constant 0 : i32
    %c0_i32_1 = arith.constant 0 : i32
    %c0_i32_2 = arith.constant 0 : i32
    return %arg0, %c0_i32, %c0_i32_0, %c0_i32_1 : i32, i32, i32, i32
  }
  func.func @transform_1(%arg0: i32, %arg1: i32) -> (i32, i32) {
    %c0_i32 = arith.constant 0 : i32
    %c0_i32_0 = arith.constant 0 : i32
    %c0_i32_1 = arith.constant 0 : i32
    return %c0_i32, %c0_i32_0 : i32, i32
  }
  func.func @transform_2(%arg0: i32, %arg1: i32) -> (i32, i32) {
    %c0_i32 = arith.constant 0 : i32
    %c0_i32_0 = arith.constant 0 : i32
    %c0_i32_1 = arith.constant 0 : i32
    return %c0_i32, %c0_i32_0 : i32, i32
  }
  func.func @transform_3(%arg0: i32, %arg1: i32) -> (i32, i32, i32) {
    %c0_i32 = arith.constant 0 : i32
    %c0_i32_0 = arith.constant 0 : i32
    %c0_i32_1 = arith.constant 0 : i32
    %c0_i32_2 = arith.constant 0 : i32
    return %c0_i32, %c0_i32_0, %c0_i32_1 : i32, i32, i32
  }
  func.func @transform_4(%arg0: i32, %arg1: i32) -> (i32, i32, i32, i32) {
    %c0_i32 = arith.constant 0 : i32
    %c0_i32_0 = arith.constant 0 : i32
    %c0_i32_1 = arith.constant 0 : i32
    return %arg0, %arg1, %c0_i32, %c0_i32_0 : i32, i32, i32, i32
  }
  func.func @transform_5(%arg0: i32, %arg1: i32) -> (i32, i32, i32, i32) {
    %c0_i32 = arith.constant 0 : i32
    %c0_i32_0 = arith.constant 0 : i32
    %c0_i32_1 = arith.constant 0 : i32
    return %arg0, %arg1, %c0_i32, %c0_i32_0 : i32, i32, i32, i32
  }
}

</mosaic_0001>

<bundles_post_ra>
// kernel: bn_block2d.5
= control target key start
LH: loop header
LB: loop body
LE: loop exit
PB: predicated region body
PF: predicated region fallthrough
CT: control target
= control target key end

     0   :  { %vm278_vm0 = vcmask 64512   ;;  %s958_s0 = inlined_call_operand.vmem [shape: f32[512,128], index: 0, kind: input, shape index: {}]   ;;  %s959_s1 = inlined_call_operand.vmem [shape: f32[1,128], index: 1, kind: input, shape index: {}]   ;;  %s960_s2 = inlined_call_operand.vmem [shape: f32[1,128], index: 2, kind: input, shape index: {}]   ;;  %s961_s3 = inlined_call_operand.vmem [shape: f32[512,8], index: 3, kind: output, shape index: {}]  }
   0x1   :  { %v14_v0 = vld [vmem:[%s958_s0] sm:$0xff]  ;;  %v15_v3 = vld [vmem:[%s958_s0 + $0x8] sm:$0xff]  ;;  %v16_v6 = vld [vmem:[%s958_s0 + $0x10] sm:$0xff] }
   0x2   :  { %v375_v1 = vld [vmem:[%s959_s1] ss:$0 sm:$0xff]  ;;  %v17_v7 = vld [vmem:[%s958_s0 + $0x18] sm:$0xff]  ;;  %v19_v12 = vld [vmem:[%s958_s0 + $0x28] sm:$0xff] }
   0x3   :  { %v380_v2 = vld [vmem:[%s960_s2] ss:$0 sm:$0xff]  ;;  %v82_v4 = vmul.f32 %v375_v1, %v14_v0  ;;  %v83_v5 = vmul.f32 %v375_v1, %v15_v3  ;;  %v84_v9 = vmul.f32 %v375_v1, %v16_v6  ;;  %v85_v10 = vmul.f32 %v375_v1, %v17_v7  ;;  %v20_v13 = vld [vmem:[%s958_s0 + $0x30] sm:$0xff]  ;;  %v21_v14 = vld [vmem:[%s958_s0 + $0x38] sm:$0xff] }
   0x4   :  { %v18_v8 = vld [vmem:[%s958_s0 + $0x20] sm:$0xff]  ;;  %v87_v17 = vmul.f32 %v375_v1, %v19_v12  ;;  %v88_v18 = vmul.f32 %v375_v1, %v20_v13  ;;  %v89_v22 = vmul.f32 %v375_v1, %v21_v14  ;;  %v23_v24 = vld [vmem:[%s958_s0 + $0x48] sm:$0xff]  ;;  %v24_v29 = vld [vmem:[%s958_s0 + $0x50] sm:$0xff] }
   0x5   :  { %v86_v11 = vmul.f32 %v375_v1, %v18_v8  ;;  %v150_v15 = vadd.f32 %v380_v2, %v82_v4  ;;  %v151_v16 = vadd.f32 %v380_v2, %v83_v5  ;;  %v152_v19 = vadd.f32 %v380_v2, %v84_v9  ;;  %v22_v23 = vld [vmem:[%s958_s0 + $0x40] sm:$0xff]  ;;  %v25_v30 = vld [vmem:[%s958_s0 + $0x58] sm:$0xff]  ;;  %v27_v35 = vld [vmem:[%s958_s0 + $0x68] sm:$0xff] }
   0x6   :  { %v153_v20 = vadd.f32 %v380_v2, %v85_v10  ;;  %v155_v27 = vadd.f32 %v380_v2, %v87_v17  ;;  %v156_v28 = vadd.f32 %v380_v2, %v88_v18  ;;  %v26_v31 = vld [vmem:[%s958_s0 + $0x60] sm:$0xff]  ;;  %v157_v34 = vadd.f32 %v380_v2, %v89_v22  ;;  %v28_v36 = vld [vmem:[%s958_s0 + $0x70] sm:$0xff]  ;;  %v29_v41 = vld [vmem:[%s958_s0 + $0x78] sm:$0xff] }
   0x7   :  { %v154_v21 = vadd.f32 %v380_v2, %v86_v11  ;;  %v214_v25 = vmax.f32 %v150_v15, 0.0  ;;  %v215_v26 = vmax.f32 %v151_v16, 0.0  ;;  %v216_v32 = vmax.f32 %v152_v19, 0.0  ;;  %v30_v54 = vld [vmem:[%s958_s0 + $0x80] sm:$0xff]  ;;  %v31_v55 = vld [vmem:[%s958_s0 + $0x88] sm:$0xff]  ;;  %v32_v58 = vld [vmem:[%s958_s0 + $0x90] sm:$0xff] }
   0x8   :  { %v217_v33 = vmax.f32 %v153_v20, 0.0  ;;  %v219_v38 = vmax.f32 %v155_v27, 0.0  ;;  %v90_v39 = vmul.f32 %v375_v1, %v22_v23  ;;  %v91_v40 = vmul.f32 %v375_v1, %v23_v24  ;;  %v33_v59 = vld [vmem:[%s958_s0 + $0x98] sm:$0xff]  ;;  %v34_v62 = vld [vmem:[%s958_s0 + $0xa0] sm:$0xff]  ;;  %v35_v5 = vld [vmem:[%s958_s0 + $0xa8] sm:$0xff] }
   0x9   :  { %279 = vst.msk [vmem:[%s961_s3] sm:$0xff] %vm278_vm0, %v214_v25  ;;  %v218_v37 = vmax.f32 %v154_v21, 0.0  ;;  %v220_v42 = vmax.f32 %v156_v28, 0.0  ;;  %v92_v43 = vmul.f32 %v375_v1, %v24_v29  ;;  %v93_v44 = vmul.f32 %v375_v1, %v25_v30  ;;  %v36_v10 = vld [vmem:[%s958_s0 + $0xb0] sm:$0xff]  ;;  %v37_v14 = vld [vmem:[%s958_s0 + $0xb8] sm:$0xff]  ;;  %v38_v18 = vld [vmem:[%s958_s0 + $0xc0] sm:$0xff] }
   0xa   :  { %280 = vst.msk [vmem:[%s961_s3 + $0x8] sm:$0xff] %vm278_vm0, %v215_v26  ;;  %v94_v45 = vmul.f32 %v375_v1, %v26_v31  ;;  %v158_v46 = vadd.f32 %v380_v2, %v90_v39  ;;  %v159_v47 = vadd.f32 %v380_v2, %v91_v40  ;;  %v95_v48 = vmul.f32 %v375_v1, %v27_v35  ;;  %v39_v22 = vld [vmem:[%s958_s0 + $0xc8] sm:$0xff]  ;;  %v40_v26 = vld [vmem:[%s958_s0 + $0xd0] sm:$0xff]  ;;  %v41_v30 = vld [vmem:[%s958_s0 + $0xd8] sm:$0xff] }
   0xb   :  { %281 = vst.msk [vmem:[%s961_s3 + $0x10] sm:$0xff] %vm278_vm0, %v216_v32  ;;  %v96_v49 = vmul.f32 %v375_v1, %v28_v36  ;;  %v221_v50 = vmax.f32 %v157_v34, 0.0  ;;  %v160_v51 = vadd.f32 %v380_v2, %v92_v43  ;;  %v161_v52 = vadd.f32 %v380_v2, %v93_v44  ;;  %v42_v34 = vld [vmem:[%s958_s0 + $0xe0] sm:$0xff] }
   0xc   :  { %282 = vst.msk [vmem:[%s961_s3 + $0x18] sm:$0xff] %vm278_vm0, %v217_v33  ;;  %v97_v53 = vmul.f32 %v375_v1, %v29_v41  ;;  %v222_v56 = vmax.f32 %v158_v46, 0.0  ;;  %v162_v57 = vadd.f32 %v380_v2, %v94_v45  ;;  %v223_v60 = vmax.f32 %v159_v47, 0.0  ;;  %v45_v46 = vld [vmem:[%s958_s0 + $0xf8] sm:$0xff] }
   0xd   :  { %283 = vst.msk [vmem:[%s961_s3 + $0x20] sm:$0xff] %vm278_vm0, %v218_v37  ;;  %v163_v61 = vadd.f32 %v380_v2, %v95_v48  ;;  %v224_v63 = vmax.f32 %v160_v51, 0.0  ;;  %v164_v0 = vadd.f32 %v380_v2, %v96_v49  ;;  %v98_v3 = vmul.f32 %v375_v1, %v30_v54  ;;  %v47_v54 = vld [vmem:[%s958_s0 + $0x108] sm:$0xff] }
   0xe   :  { %284 = vst.msk [vmem:[%s961_s3 + $0x28] sm:$0xff] %vm278_vm0, %v219_v38  ;;  %v99_v4 = vmul.f32 %v375_v1, %v31_v55  ;;  %v225_v6 = vmax.f32 %v161_v52, 0.0  ;;  %v165_v7 = vadd.f32 %v380_v2, %v97_v53  ;;  %v100_v8 = vmul.f32 %v375_v1, %v32_v58  ;;  %v43_v38 = vld [vmem:[%s958_s0 + $0xe8] sm:$0xff]  ;;  %v48_v58 = vld [vmem:[%s958_s0 + $0x110] sm:$0xff] }
   0xf   :  { %285 = vst.msk [vmem:[%s961_s3 + $0x30] sm:$0xff] %vm278_vm0, %v220_v42  ;;  %v101_v9 = vmul.f32 %v375_v1, %v33_v59  ;;  %v226_v11 = vmax.f32 %v162_v57, 0.0  ;;  %v166_v12 = vadd.f32 %v380_v2, %v98_v3  ;;  %v102_v13 = vmul.f32 %v375_v1, %v34_v62  ;;  %v44_v42 = vld [vmem:[%s958_s0 + $0xf0] sm:$0xff]  ;;  %v49_v62 = vld [vmem:[%s958_s0 + $0x118] sm:$0xff] }
  0x10   :  { %286 = vst.msk [vmem:[%s961_s3 + $0x38] sm:$0xff] %vm278_vm0, %v221_v50  ;;  %v227_v15 = vmax.f32 %v163_v61, 0.0  ;;  %v167_v16 = vadd.f32 %v380_v2, %v99_v4  ;;  %v103_v17 = vmul.f32 %v375_v1, %v35_v5  ;;  %v228_v19 = vmax.f32 %v164_v0, 0.0  ;;  %v46_v50 = vld [vmem:[%s958_s0 + $0x100] sm:$0xff] }
  0x11   :  { %287 = vst.msk [vmem:[%s961_s3 + $0x40] sm:$0xff] %vm278_vm0, %v222_v56  ;;  %v168_v20 = vadd.f32 %v380_v2, %v100_v8  ;;  %v104_v21 = vmul.f32 %v375_v1, %v36_v10  ;;  %v229_v23 = vmax.f32 %v165_v7, 0.0  ;;  %v169_v24 = vadd.f32 %v380_v2, %v101_v9  ;;  %v50_v4 = vld [vmem:[%s958_s0 + $0x120] sm:$0xff]  ;;  %v51_v8 = vld [vmem:[%s958_s0 + $0x128] sm:$0xff] }
  0x12   :  { %288 = vst.msk [vmem:[%s961_s3 + $0x48] sm:$0xff] %vm278_vm0, %v223_v60  ;;  %v105_v25 = vmul.f32 %v375_v1, %v37_v14  ;;  %v230_v27 = vmax.f32 %v166_v12, 0.0  ;;  %v170_v28 = vadd.f32 %v380_v2, %v102_v13  ;;  %v106_v29 = vmul.f32 %v375_v1, %v38_v18  ;;  %v52_v12 = vld [vmem:[%s958_s0 + $0x130] sm:$0xff] }
  0x13   :  { %289 = vst.msk [vmem:[%s961_s3 + $0x50] sm:$0xff] %vm278_vm0, %v224_v63  ;;  %v231_v31 = vmax.f32 %v167_v16, 0.0  ;;  %v171_v32 = vadd.f32 %v380_v2, %v103_v17  ;;  %v107_v33 = vmul.f32 %v375_v1, %v39_v22  ;;  %v232_v35 = vmax.f32 %v168_v20, 0.0  ;;  %v53_v16 = vld [vmem:[%s958_s0 + $0x138] sm:$0xff]  ;;  %v54_v20 = vld [vmem:[%s958_s0 + $0x140] sm:$0xff] }
  0x14   :  { %290 = vst.msk [vmem:[%s961_s3 + $0x58] sm:$0xff] %vm278_vm0, %v225_v6  ;;  %v172_v36 = vadd.f32 %v380_v2, %v104_v21  ;;  %v108_v37 = vmul.f32 %v375_v1, %v40_v26  ;;  %v233_v39 = vmax.f32 %v169_v24, 0.0  ;;  %v173_v40 = vadd.f32 %v380_v2, %v105_v25  ;;  %v55_v24 = vld [vmem:[%s958_s0 + $0x148] sm:$0xff] }
  0x15   :  { %291 = vst.msk [vmem:[%s961_s3 + $0x60] sm:$0xff] %vm278_vm0, %v226_v11  ;;  %v109_v41 = vmul.f32 %v375_v1, %v41_v30  ;;  %v234_v43 = vmax.f32 %v170_v28, 0.0  ;;  %v174_v44 = vadd.f32 %v380_v2, %v106_v29  ;;  %v110_v45 = vmul.f32 %v375_v1, %v42_v34  ;;  %v56_v28 = vld [vmem:[%s958_s0 + $0x150] sm:$0xff] }
  0x16   :  { %292 = vst.msk [vmem:[%s961_s3 + $0x68] sm:$0xff] %vm278_vm0, %v227_v15  ;;  %v235_v47 = vmax.f32 %v171_v32, 0.0  ;;  %v175_v48 = vadd.f32 %v380_v2, %v107_v33  ;;  %v111_v49 = vmul.f32 %v375_v1, %v43_v38  ;;  %v236_v51 = vmax.f32 %v172_v36, 0.0  ;;  %v57_v32 = vld [vmem:[%s958_s0 + $0x158] sm:$0xff]  ;;  %v58_v36 = vld [vmem:[%s958_s0 + $0x160] sm:$0xff] }
  0x17   :  { %293 = vst.msk [vmem:[%s961_s3 + $0x70] sm:$0xff] %vm278_vm0, %v228_v19  ;;  %v176_v52 = vadd.f32 %v380_v2, %v108_v37  ;;  %v112_v53 = vmul.f32 %v375_v1, %v44_v42  ;;  %v237_v55 = vmax.f32 %v173_v40, 0.0  ;;  %v177_v56 = vadd.f32 %v380_v2, %v109_v41  ;;  %v59_v40 = vld [vmem:[%s958_s0 + $0x168] sm:$0xff] }
  0x18   :  { %294 = vst.msk [vmem:[%s961_s3 + $0x78] sm:$0xff] %vm278_vm0, %v229_v23  ;;  %v113_v57 = vmul.f32 %v375_v1, %v45_v46  ;;  %v238_v59 = vmax.f32 %v174_v44, 0.0  ;;  %v178_v60 = vadd.f32 %v380_v2, %v110_v45  ;;  %v114_v61 = vmul.f32 %v375_v1, %v46_v50  ;;  %v60_v44 = vld [vmem:[%s958_s0 + $0x170] sm:$0xff] }
  0x19   :  { %295 = vst.msk [vmem:[%s961_s3 + $0x80] sm:$0xff] %vm278_vm0, %v230_v27  ;;  %v239_v63 = vmax.f32 %v175_v48, 0.0  ;;  %v179_v0 = vadd.f32 %v380_v2, %v111_v49  ;;  %v115_v3 = vmul.f32 %v375_v1, %v47_v54  ;;  %v240_v5 = vmax.f32 %v176_v52, 0.0  ;;  %v61_v48 = vld [vmem:[%s958_s0 + $0x178] sm:$0xff]  ;;  %v62_v52 = vld [vmem:[%s958_s0 + $0x180] sm:$0xff] }
  0x1a   :  { %296 = vst.msk [vmem:[%s961_s3 + $0x88] sm:$0xff] %vm278_vm0, %v231_v31  ;;  %v180_v6 = vadd.f32 %v380_v2, %v112_v53  ;;  %v116_v7 = vmul.f32 %v375_v1, %v48_v58  ;;  %v241_v9 = vmax.f32 %v177_v56, 0.0  ;;  %v181_v10 = vadd.f32 %v380_v2, %v113_v57  ;;  %v63_v56 = vld [vmem:[%s958_s0 + $0x188] sm:$0xff] }
  0x1b   :  { %297 = vst.msk [vmem:[%s961_s3 + $0x90] sm:$0xff] %vm278_vm0, %v232_v35  ;;  %v117_v11 = vmul.f32 %v375_v1, %v49_v62  ;;  %v242_v13 = vmax.f32 %v178_v60, 0.0  ;;  %v182_v14 = vadd.f32 %v380_v2, %v114_v61  ;;  %v118_v15 = vmul.f32 %v375_v1, %v50_v4  ;;  %v64_v60 = vld [vmem:[%s958_s0 + $0x190] sm:$0xff] }
  0x1c   :  { %298 = vst.msk [vmem:[%s961_s3 + $0x98] sm:$0xff] %vm278_vm0, %v233_v39  ;;  %v243_v17 = vmax.f32 %v179_v0, 0.0  ;;  %v183_v18 = vadd.f32 %v380_v2, %v115_v3  ;;  %v119_v19 = vmul.f32 %v375_v1, %v51_v8  ;;  %v244_v21 = vmax.f32 %v180_v6, 0.0  ;;  %v65_v0 = vld [vmem:[%s958_s0 + $0x198] sm:$0xff] }
  0x1d   :  { %299 = vst.msk [vmem:[%s961_s3 + $0xa0] sm:$0xff] %vm278_vm0, %v234_v43  ;;  %v184_v22 = vadd.f32 %v380_v2, %v116_v7  ;;  %v120_v23 = vmul.f32 %v375_v1, %v52_v12  ;;  %v245_v25 = vmax.f32 %v181_v10, 0.0  ;;  %v185_v26 = vadd.f32 %v380_v2, %v117_v11  ;;  %v77_v3 = vld [vmem:[%s958_s0 + $0x1f8] sm:$0xff]  ;;  %v66_v7 = vld [vmem:[%s958_s0 + $0x1a0] sm:$0xff]  ;;  %v67_v11 = vld [vmem:[%s958_s0 + $0x1a8] sm:$0xff] }
  0x1e   :  { %300 = vst.msk [vmem:[%s961_s3 + $0xa8] sm:$0xff] %vm278_vm0, %v235_v47  ;;  %v121_v27 = vmul.f32 %v375_v1, %v53_v16  ;;  %v246_v29 = vmax.f32 %v182_v14, 0.0  ;;  %v186_v30 = vadd.f32 %v380_v2, %v118_v15  ;;  %v122_v31 = vmul.f32 %v375_v1, %v54_v20  ;;  %v68_v15 = vld [vmem:[%s958_s0 + $0x1b0] sm:$0xff]  ;;  %v69_v20 = vld [vmem:[%s958_s0 + $0x1b8] sm:$0xff] }
  0x1f   :  { %301 = vst.msk [vmem:[%s961_s3 + $0xb0] sm:$0xff] %vm278_vm0, %v236_v51  ;;  %v247_v33 = vmax.f32 %v183_v18, 0.0  ;;  %v187_v34 = vadd.f32 %v380_v2, %v119_v19  ;;  %v123_v35 = vmul.f32 %v375_v1, %v55_v24  ;;  %v248_v37 = vmax.f32 %v184_v22, 0.0  ;;  %v70_v24 = vld [vmem:[%s958_s0 + $0x1c0] sm:$0xff] }
  0x20   :  { %302 = vst.msk [vmem:[%s961_s3 + $0xb8] sm:$0xff] %vm278_vm0, %v237_v55  ;;  %v188_v38 = vadd.f32 %v380_v2, %v120_v23  ;;  %v124_v39 = vmul.f32 %v375_v1, %v56_v28  ;;  %v249_v41 = vmax.f32 %v185_v26, 0.0  ;;  %v189_v42 = vadd.f32 %v380_v2, %v121_v27 }
  0x21   :  { %303 = vst.msk [vmem:[%s961_s3 + $0xc0] sm:$0xff] %vm278_vm0, %v238_v59  ;;  %v125_v43 = vmul.f32 %v375_v1, %v57_v32  ;;  %v250_v45 = vmax.f32 %v186_v30, 0.0  ;;  %v190_v46 = vadd.f32 %v380_v2, %v122_v31  ;;  %v126_v47 = vmul.f32 %v375_v1, %v58_v36 }
  0x22   :  { %304 = vst.msk [vmem:[%s961_s3 + $0xc8] sm:$0xff] %vm278_vm0, %v239_v63  ;;  %v251_v49 = vmax.f32 %v187_v34, 0.0  ;;  %v191_v50 = vadd.f32 %v380_v2, %v123_v35  ;;  %v127_v51 = vmul.f32 %v375_v1, %v59_v40  ;;  %v252_v53 = vmax.f32 %v188_v38, 0.0 }
  0x23   :  { %305 = vst.msk [vmem:[%s961_s3 + $0xd0] sm:$0xff] %vm278_vm0, %v240_v5  ;;  %v192_v54 = vadd.f32 %v380_v2, %v124_v39  ;;  %v128_v55 = vmul.f32 %v375_v1, %v60_v44  ;;  %v253_v57 = vmax.f32 %v189_v42, 0.0  ;;  %v193_v58 = vadd.f32 %v380_v2, %v125_v43 }
  0x24   :  { %306 = vst.msk [vmem:[%s961_s3 + $0xd8] sm:$0xff] %vm278_vm0, %v241_v9  ;;  %v129_v59 = vmul.f32 %v375_v1, %v61_v48  ;;  %v254_v61 = vmax.f32 %v190_v46, 0.0  ;;  %v194_v62 = vadd.f32 %v380_v2, %v126_v47  ;;  %v130_v63 = vmul.f32 %v375_v1, %v62_v52 }
  0x25   :  { %307 = vst.msk [vmem:[%s961_s3 + $0xe0] sm:$0xff] %vm278_vm0, %v242_v13  ;;  %v255_v4 = vmax.f32 %v191_v50, 0.0  ;;  %v195_v5 = vadd.f32 %v380_v2, %v127_v51  ;;  %v131_v6 = vmul.f32 %v375_v1, %v63_v56  ;;  %v256_v8 = vmax.f32 %v192_v54, 0.0 }
  0x26   :  { %308 = vst.msk [vmem:[%s961_s3 + $0xe8] sm:$0xff] %vm278_vm0, %v243_v17  ;;  %v196_v9 = vadd.f32 %v380_v2, %v128_v55  ;;  %v132_v10 = vmul.f32 %v375_v1, %v64_v60  ;;  %v257_v12 = vmax.f32 %v193_v58, 0.0  ;;  %v197_v13 = vadd.f32 %v380_v2, %v129_v59 }
  0x27   :  { %309 = vst.msk [vmem:[%s961_s3 + $0xf0] sm:$0xff] %vm278_vm0, %v244_v21  ;;  %v133_v14 = vmul.f32 %v375_v1, %v65_v0  ;;  %v145_v16 = vmul.f32 %v375_v1, %v77_v3  ;;  %v258_v17 = vmax.f32 %v194_v62, 0.0  ;;  %v198_v18 = vadd.f32 %v380_v2, %v130_v63 }
  0x28   :  { %310 = vst.msk [vmem:[%s961_s3 + $0xf8] sm:$0xff] %vm278_vm0, %v245_v25  ;;  %v134_v19 = vmul.f32 %v375_v1, %v66_v7  ;;  %v259_v21 = vmax.f32 %v195_v5, 0.0  ;;  %v199_v22 = vadd.f32 %v380_v2, %v131_v6  ;;  %v135_v23 = vmul.f32 %v375_v1, %v67_v11 }
  0x29   :  { %311 = vst.msk [vmem:[%s961_s3 + $0x100] sm:$0xff] %vm278_vm0, %v246_v29  ;;  %v827_v25 = vadd.f32 %v380_v2, %v145_v16  ;;  %v260_v26 = vmax.f32 %v196_v9, 0.0  ;;  %v200_v27 = vadd.f32 %v380_v2, %v132_v10  ;;  %v136_v28 = vmul.f32 %v375_v1, %v68_v15  ;;  %v71_v29 = vld [vmem:[%s958_s0 + $0x1c8] sm:$0xff] }
  0x2a   :  { %312 = vst.msk [vmem:[%s961_s3 + $0x108] sm:$0xff] %vm278_vm0, %v247_v33  ;;  %v261_v30 = vmax.f32 %v197_v13, 0.0  ;;  %v201_v31 = vadd.f32 %v380_v2, %v133_v14  ;;  %v137_v32 = vmul.f32 %v375_v1, %v69_v20  ;;  %v72_v33 = vld [vmem:[%s958_s0 + $0x1d0] sm:$0xff]  ;;  %v262_v34 = vmax.f32 %v198_v18, 0.0 }
  0x2b   :  { %313 = vst.msk [vmem:[%s961_s3 + $0x110] sm:$0xff] %vm278_vm0, %v248_v37  ;;  %v202_v35 = vadd.f32 %v380_v2, %v134_v19  ;;  %v138_v36 = vmul.f32 %v375_v1, %v70_v24  ;;  %v73_v37 = vld [vmem:[%s958_s0 + $0x1d8] sm:$0xff]  ;;  %v263_v38 = vmax.f32 %v199_v22, 0.0  ;;  %v203_v39 = vadd.f32 %v380_v2, %v135_v23 }
  0x2c   :  { %314 = vst.msk [vmem:[%s961_s3 + $0x118] sm:$0xff] %vm278_vm0, %v249_v41  ;;  %v139_v40 = vmul.f32 %v375_v1, %v71_v29  ;;  %v74_v41 = vld [vmem:[%s958_s0 + $0x1e0] sm:$0xff]  ;;  %v264_v42 = vmax.f32 %v200_v27, 0.0  ;;  %v204_v43 = vadd.f32 %v380_v2, %v136_v28  ;;  %v140_v44 = vmul.f32 %v375_v1, %v72_v33 }
  0x2d   :  { %315 = vst.msk [vmem:[%s961_s3 + $0x120] sm:$0xff] %vm278_vm0, %v250_v45  ;;  %v75_v45 = vld [vmem:[%s958_s0 + $0x1e8] sm:$0xff]  ;;  %v265_v46 = vmax.f32 %v201_v31, 0.0  ;;  %v205_v47 = vadd.f32 %v380_v2, %v137_v32  ;;  %v141_v48 = vmul.f32 %v375_v1, %v73_v37  ;;  %v266_v50 = vmax.f32 %v202_v35, 0.0 }
  0x2e   :  { %316 = vst.msk [vmem:[%s961_s3 + $0x128] sm:$0xff] %vm278_vm0, %v251_v49  ;;  %v76_v49 = vld [vmem:[%s958_s0 + $0x1f0] sm:$0xff]  ;;  %v206_v51 = vadd.f32 %v380_v2, %v138_v36  ;;  %v142_v52 = vmul.f32 %v375_v1, %v74_v41  ;;  %v207_v54 = vadd.f32 %v380_v2, %v139_v40  ;;  %v143_v55 = vmul.f32 %v375_v1, %v75_v45 }
  0x2f   :  { %317 = vst.msk [vmem:[%s961_s3 + $0x130] sm:$0xff] %vm278_vm0, %v252_v53  ;;  %v267_v53 = vmax.f32 %v203_v39, 0.0  ;;  %v268_v56 = vmax.f32 %v204_v43, 0.0  ;;  %v144_v58 = vmul.f32 %v375_v1, %v76_v49  ;;  %v269_v59 = vmax.f32 %v205_v47, 0.0 }
  0x30   :  { %318 = vst.msk [vmem:[%s961_s3 + $0x138] sm:$0xff] %vm278_vm0, %v253_v57  ;;  %v208_v57 = vadd.f32 %v380_v2, %v140_v44  ;;  %v209_v60 = vadd.f32 %v380_v2, %v141_v48  ;;  %v210_v62 = vadd.f32 %v380_v2, %v142_v52  ;;  %v271_v1 = vmax.f32 %v207_v54, 0.0 }
  0x31   :  { %319 = vst.msk [vmem:[%s961_s3 + $0x140] sm:$0xff] %vm278_vm0, %v254_v61  ;;  %v270_v61 = vmax.f32 %v206_v51, 0.0  ;;  %v211_v63 = vadd.f32 %v380_v2, %v143_v55  ;;  %v212_v3 = vadd.f32 %v380_v2, %v144_v58  ;;  %v277_v7 = vmax.f32 %v827_v25, 0.0 }
  0x32   :  { %320 = vst.msk [vmem:[%s961_s3 + $0x148] sm:$0xff] %vm278_vm0, %v255_v4  ;;  %v272_v0 = vmax.f32 %v208_v57, 0.0  ;;  %v273_v4 = vmax.f32 %v209_v60, 0.0  ;;  %v274_v5 = vmax.f32 %v210_v62, 0.0 }
  0x33   :  { %321 = vst.msk [vmem:[%s961_s3 + $0x150] sm:$0xff] %vm278_vm0, %v256_v8  ;;  %v275_v6 = vmax.f32 %v211_v63, 0.0  ;;  %v276_v2 = vmax.f32 %v212_v3, 0.0 }
  0x34   :  { %322 = vst.msk [vmem:[%s961_s3 + $0x158] sm:$0xff] %vm278_vm0, %v257_v12 }
  0x35   :  { %323 = vst.msk [vmem:[%s961_s3 + $0x160] sm:$0xff] %vm278_vm0, %v258_v17 }
  0x36   :  { %324 = vst.msk [vmem:[%s961_s3 + $0x168] sm:$0xff] %vm278_vm0, %v259_v21 }
  0x37   :  { %325 = vst.msk [vmem:[%s961_s3 + $0x170] sm:$0xff] %vm278_vm0, %v260_v26 }
  0x38   :  { %326 = vst.msk [vmem:[%s961_s3 + $0x178] sm:$0xff] %vm278_vm0, %v261_v30 }
  0x39   :  { %327 = vst.msk [vmem:[%s961_s3 + $0x180] sm:$0xff] %vm278_vm0, %v262_v34 }
  0x3a   :  { %328 = vst.msk [vmem:[%s961_s3 + $0x188] sm:$0xff] %vm278_vm0, %v263_v38 }
  0x3b   :  { %329 = vst.msk [vmem:[%s961_s3 + $0x190] sm:$0xff] %vm278_vm0, %v264_v42 }
  0x3c   :  { %330 = vst.msk [vmem:[%s961_s3 + $0x198] sm:$0xff] %vm278_vm0, %v265_v46 }
  0x3d   :  { %331 = vst.msk [vmem:[%s961_s3 + $0x1a0] sm:$0xff] %vm278_vm0, %v266_v50 }
  0x3e   :  { %332 = vst.msk [vmem:[%s961_s3 + $0x1a8] sm:$0xff] %vm278_vm0, %v267_v53 }
  0x3f   :  { %333 = vst.msk [vmem:[%s961_s3 + $0x1b0] sm:$0xff] %vm278_vm0, %v268_v56 }
  0x40   :  { %334 = vst.msk [vmem:[%s961_s3 + $0x1b8] sm:$0xff] %vm278_vm0, %v269_v59 }
  0x41   :  { %335 = vst.msk [vmem:[%s961_s3 + $0x1c0] sm:$0xff] %vm278_vm0, %v270_v61 }
  0x42   :  { %336 = vst.msk [vmem:[%s961_s3 + $0x1c8] sm:$0xff] %vm278_vm0, %v271_v1 }
  0x43   :  { %337 = vst.msk [vmem:[%s961_s3 + $0x1d0] sm:$0xff] %vm278_vm0, %v272_v0 }
  0x44   :  { %338 = vst.msk [vmem:[%s961_s3 + $0x1d8] sm:$0xff] %vm278_vm0, %v273_v4 }
  0x45   :  { %339 = vst.msk [vmem:[%s961_s3 + $0x1e0] sm:$0xff] %vm278_vm0, %v274_v5 }
  0x46   :  { %340 = vst.msk [vmem:[%s961_s3 + $0x1e8] sm:$0xff] %vm278_vm0, %v275_v6 }
  0x47   :  { %341 = vst.msk [vmem:[%s961_s3 + $0x1f0] sm:$0xff] %vm278_vm0, %v276_v2 }
  0x48   :  { %342 = vst.msk [vmem:[%s961_s3 + $0x1f8] sm:$0xff] %vm278_vm0, %v277_v7 }

// kernel: bn_block2d.3
= control target key start
LH: loop header
LB: loop body
LE: loop exit
PB: predicated region body
PF: predicated region fallthrough
CT: control target
= control target key end

     0   :  { %s2017_s18 = smov 0   ;;  %s2019_s19 = smov 0   ;;  %s3018_s0 = inlined_call_operand.vmem [shape: f32[2,16,16,128], index: 0, kind: input, shape index: {}]   ;;  %s3019_s1 = inlined_call_operand.vmem [shape: f32[1,128], index: 1, kind: input, shape index: {}]   ;;  %s3020_s2 = inlined_call_operand.vmem [shape: f32[1,128], index: 2, kind: input, shape index: {}]   ;;  %s3021_s3 = inlined_call_operand.vmem [shape: f32[9,128,128], index: 3, kind: input, shape index: {}]   ;;  %s3022_s4 = inlined_call_operand.vmem [shape: f32[2,16,16,128], index: 4, kind: output, shape index: {0}]   ;;  %s3023_s5 = inlined_call_operand.vmem [shape: f32[2,2,2,128], index: 5, kind: output, shape index: {1}]  }
   0x1   :  { %s2021_s20 = smov 0   ;;  %s2023_s21 = smov 0  }
   0x2   :  { %s2025_s22 = smov 0  }
   0x3 LB: > { %s25_s23 = sadd.s32 1, %s1976_s20  ;;  %s28_s24 = sadd.s32 1, %s1980_s21  ;;  %s1984_s22 = sphi %s2025_s22, %s16_s22   ;;  %s1980_s21 = sphi %s2023_s21, %s3028_s21   ;;  %s1976_s20 = sphi %s2021_s20, %s3027_s20   ;;  %s1972_s19 = sphi %s2019_s19, %s3026_s19   ;;  %s1968_s18 = sphi %s2017_s18, %s3025_s18  }
   0x4   : > { %p26_p0 = scmp.ge.s32.totalorder %s25_s23, 2  ;;  %p1705_p1 = scmp.ge.s32.totalorder %s1984_s22, 1 }
   0x5   : > { %p206_p2 = scmp.lt.s32.totalorder %s1984_s22, 5 }
   0x6   : > { %s3030_s23 = smov (%p26_p0, %s25_s23), 0  ;;  %s3032_s24 = smov (!%p26_p0, %s28_s24), %s1980_s21 }
   0x7   : > { %p207_p3 = pnand %p1705_p1, %p206_p2  ;;  %p30_p4 = scmp.ge.s32.totalorder %s3032_s24, 2 }
   0x8   : > { %p247_p5 = scmp.lt.s32.totalorder (!%p207_p3), %s1972_s19, 1  ;;  %s2056_s29 = sshll.u32 (!%p207_p3), %s1968_s18, 3 }
   0x9   : > { %s3034_s24 = smov (%p30_p4, %s3032_s24), 0  ;;  %210 = sbr.rel (%p207_p3) target bundleno = 488 (0x1e8), region = 36 }
   0xa   : > { %s1850_s7 = sshll.u32 (!%p207_p3), %s1968_s18, 7  ;;  %s1716_s8 = sadd.s32 (!%p207_p3), 4294967295, %s2056_s29 }
   0xb   : > { %p2069_p6 = scmp.gt.s32.totalorder (!%p207_p3), %s1716_s8, 0  ;;  %p352_p7 = scmp.eq.s32.totalorder (!%p207_p3), %s1968_s18, 0 }
   0xc   : > { %s341_s28 = sadd.s32 (!%p207_p3), 8, %s2056_s29  ;;  %p357_p9 = scmp.eq.s32.totalorder (!%p207_p3), %s1968_s18, 1 }
   0xd   : > { %p342_p8 = scmp.lt.s32.totalorder (!%p207_p3), %s341_s28, 15  ;;  %p255_p10 = scmp.lt.s32.totalorder (!%p207_p3), %s2056_s29, 15 }
   0xe   : > { %v1734_v0 = vld [vmem:[%s3021_s3 + $0xf8] sm:$0xff]  ;;  %v1733_v1 = vld [vmem:[%s3021_s3 + $0xf0] sm:$0xff]  ;;  %v1732_v2 = vld [vmem:[%s3021_s3 + $0xe8] sm:$0xff]  ;;  %s3036_s19 = smov (!%p247_p5, %s1972_s19), 1  ;;  %s3038_s8 = smov (!%p2069_p6, %s1716_s8), 0  ;;  %vm1555_vm0 = vcmask 1040384  }
   0xf   : > { %1851 = vmatpush.msra.mxu1 %v1734_v0  ;;  %1852 = vmatpush.msra.mxu2 %v1734_v0  ;;  %v1731_v3 = vld [vmem:[%s3021_s3 + $0xe0] sm:$0xff]  ;;  %s1849_s11 = sshll.u32 %s3036_s19, 8  ;;  %v1730_v5 = vld [vmem:[%s3021_s3 + $0xd8] sm:$0xff]  ;;  %v1729_v9 = vld [vmem:[%s3021_s3 + $0xd0] sm:$0xff]  ;;  %s1717_s9 = sshll.u32 %s3038_s8, 4 }
  0x10   : > { %1853 = vmatpush.msra.mxu3 %v1734_v0  ;;  %547 = vmatpush.msra.mxu0 %v1734_v0  ;;  %s2076_s15 = scalar_lea.vmem %s3018_s0, %s1849_s11  ;;  %v2081_v4 = vld [vmem:[%s3019_s1] ss:$0 sm:$0xff]  ;;  %v1728_v14 = vld [vmem:[%s3021_s3 + $0xc8] sm:$0xff]  ;;  %v1726_v25 = vld [vmem:[%s3021_s3 + $0xb8] sm:$0xff]  ;;  %s3040_s28 = smov (!%p342_p8, %s341_s28), 15 }
  0x11   : > { %1854 = vmatpush.msra.mxu1 %v1733_v1  ;;  %1855 = vmatpush.msra.mxu2 %v1733_v1  ;;  %s2087_s27 = scalar_lea.vmem %s2076_s15, %s1850_s7  ;;  %v2092_v6 = vld [vmem:[%s3020_s2] ss:$0 sm:$0xff]  ;;  %s2113_s12 = scalar_lea.vmem %s2076_s15, %s1717_s9  ;;  %v1725_v31 = vld [vmem:[%s3021_s3 + $0xb0] sm:$0xff]  ;;  %v1724_v35 = vld [vmem:[%s3021_s3 + $0xa8] sm:$0xff] }
  0x12   : > { %1856 = vmatpush.msra.mxu3 %v1733_v1  ;;  %548 = vmatpush.msra.mxu0 %v1733_v1  ;;  %v276_v7 = vld [vmem:[%s2087_s27 + $0x10] sm:$0xff]  ;;  %v277_v17 = vld [vmem:[%s2087_s27 + $0x18] sm:$0xff]  ;;  %s2122_s8 = scalar_select %p352_p7, 0.0, 1.0  ;;  %v1727_v19 = vld [vmem:[%s3021_s3 + $0xc0] sm:$0xff] }
  0x13   : > { %1857 = vmatpush.msra.mxu1 %v1732_v2  ;;  %1858 = vmatpush.msra.mxu2 %v1732_v2  ;;  %v280_v8 = vld [vmem:[%s2087_s27 + $0x30] sm:$0xff]  ;;  %v296_v10 = vmul.f32 %v2081_v4, %v276_v7  ;;  %v281_v18 = vld [vmem:[%s2087_s27 + $0x38] sm:$0xff]  ;;  %v297_v21 = vmul.f32 %v2081_v4, %v277_v17  ;;  %v335_v23 = vld [vmem:[%s2113_s12] sm:$0xff]  ;;  %s1718_s30 = sshll.u32 %s3040_s28, 4  ;;  %s3042_s29 = smov (!%p255_p10, %s2056_s29), 15 }
  0x14   : > { %1859 = vmatpush.msra.mxu3 %v1732_v2  ;;  %549 = vmatpush.msra.mxu0 %v1732_v2  ;;  %v300_v11 = vmul.f32 %v2081_v4, %v280_v8  ;;  %v284_v12 = vld [vmem:[%s2087_s27 + $0x50] sm:$0xff]  ;;  %v301_v22 = vmul.f32 %v2081_v4, %v281_v18  ;;  %v285_v24 = vld [vmem:[%s2087_s27 + $0x58] sm:$0xff]  ;;  %v337_v27 = vmul.f32 %v2081_v4, %v335_v23  ;;  %v354_v29 = vstv %s2122_s8  ;;  %v278_v34 = vld [vmem:[%s2087_s27 + $0x20] sm:$0xff]  ;;  %s345_s6 = scalar_lea.vmem %s2076_s15, %s1718_s30  ;;  %s1709_s15 = sshll.u32 %s3042_s29, 1 }
  0x15   : > { %1860 = vmatpush.msra.mxu1 %v1731_v3  ;;  %1861 = vmatpush.msra.mxu2 %v1731_v3  ;;  %v304_v13 = vmul.f32 %v2081_v4, %v284_v12  ;;  %v2110_v15 = vadd.f32 %v2092_v6, %v296_v10  ;;  %v2141_v26 = vadd.f32 %v2092_v6, %v297_v21  ;;  %v282_v38 = vld [vmem:[%s2087_s27 + $0x40] sm:$0xff]  ;;  %v336_v40 = vld [vmem:[%s2113_s12 + $0x8] sm:$0xff]  ;;  %v1722_v47 = vld [vmem:[%s3021_s3 + $0x98] sm:$0xff]  ;;  %s358_s7 = scalar_select %p357_p9, 0.0, 1.0 }
  0x16   : > { %1862 = vmatpush.msra.mxu3 %v1731_v3  ;;  %550 = vmatpush.msra.mxu0 %v1731_v3  ;;  %v2116_v16 = vadd.f32 %v2092_v6, %v300_v11  ;;  %v2145_v28 = vadd.f32 %v2092_v6, %v301_v22  ;;  %v305_v30 = vmul.f32 %v2081_v4, %v285_v24  ;;  %v1723_v41 = vld [vmem:[%s3021_s3 + $0xa0] sm:$0xff]  ;;  %v279_v50 = vld [vmem:[%s2087_s27 + $0x28] sm:$0xff]  ;;  %v1721_v51 = vld [vmem:[%s3021_s3 + $0x90] sm:$0xff]  ;;  %v1986_v3 = vmov 0.0   ;;  %s1710_s9 = sshll.u32 %s3036_s19, 5  ;;  %p265_p11 = scmp.lt.s32.totalorder %s1968_s18, 1 }
  0x17   : > { %1863 = vmatpush.msra.mxu1 %v1730_v5  ;;  %1864 = vmatpush.msra.mxu2 %v1730_v5  ;;  %366 = vst [vmem:[#allocation3 + $0x20] sm:$0xff] %v2110_v15  ;;  %v2129_v20 = vadd.f32 %v2092_v6, %v304_v13  ;;  %v339_v32 = vadd.f32 %v2092_v6, %v337_v27  ;;  %v286_v44 = vld [vmem:[%s2087_s27 + $0x60] sm:$0xff]  ;;  %v283_v54 = vld [vmem:[%s2087_s27 + $0x48] sm:$0xff]  ;;  %v1750_v1 = vld [vmem:[%s3021_s3 + $0x178] sm:$0xff]  ;;  %s259_s10 = sadd.s32 %s1710_s9, %s1709_s15  ;;  %s1712_s8 = sshll.u32 %s3036_s19, 1 }
  0x18   : > { %1865 = vmatpush.msra.mxu3 %v1730_v5  ;;  %551 = vmatpush.msra.mxu0 %v1730_v5  ;;  %370 = vst [vmem:[#allocation3 + $0x40] sm:$0xff] %v2116_v16  ;;  %v2157_v33 = vadd.f32 %v2092_v6, %v305_v30  ;;  %v298_v37 = vmul.f32 %v2081_v4, %v278_v34  ;;  %v1720_v56 = vld [vmem:[%s3021_s3 + $0x88] sm:$0xff]  ;;  %v274_v58 = vld [vmem:[%s2087_s27] sm:$0xff]  ;;  %v513_v5 = vld [vmem:[%s3021_s3 + $0x78] sm:$0xff]  ;;  %s3044_s18 = smov (!%p265_p11, %s1968_s18), 1 }
  0x19   : > { %1866 = vmatpush.msra.mxu1 %v1729_v9  ;;  %1867 = vmatpush.msra.mxu2 %v1729_v9  ;;  %374 = vst [vmem:[#allocation3 + $0x60] sm:$0xff] %v2129_v20  ;;  %v2163_v36 = vmul.f32 %v354_v29, %v339_v32  ;;  %v302_v39 = vmul.f32 %v2081_v4, %v282_v38  ;;  %v287_v61 = vld [vmem:[%s2087_s27 + $0x68] sm:$0xff]  ;;  %v1719_v62 = vld [vmem:[%s3021_s3 + $0x80] sm:$0xff]  ;;  %v1749_v7 = vld [vmem:[%s3021_s3 + $0x170] sm:$0xff]  ;;  %s268_s13 = sadd.s32 %s1712_s8, %s3044_s18 }
  0x1a   : > { %1868 = vmatpush.msra.mxu3 %v1729_v9  ;;  %552 = vmatpush.msra.mxu0 %v1729_v9  ;;  %406 = vst [vmem:[#allocation2 + $0x21] sm:$0xff] %v2110_v15  ;;  %v2176_v42 = vadd.f32 %v2092_v6, %v298_v37  ;;  %v338_v43 = vmul.f32 %v2081_v4, %v336_v40  ;;  %v1766_v8 = vld [vmem:[%s3021_s3 + $0x1f8] sm:$0xff]  ;;  %v512_v9 = vld [vmem:[%s3021_s3 + $0x70] sm:$0xff]  ;;  %v1748_v10 = vld [vmem:[%s3021_s3 + $0x168] sm:$0xff]  ;;  %s1713_s14 = sshll.u32 %s268_s13, 1 }
  0x1b   : > { %1869 = vmatpush.msra.mxu1 %v1728_v14  ;;  %1870 = vmatpush.msra.mxu2 %v1728_v14  ;;  %367 = vst [vmem:[#allocation3 + $0x28] sm:$0xff] %v2141_v26  ;;  %v2181_v45 = vadd.f32 %v2092_v6, %v302_v39  ;;  %v306_v46 = vmul.f32 %v2081_v4, %v286_v44  ;;  %v1765_v11 = vld [vmem:[%s3021_s3 + $0x1f0] sm:$0xff]  ;;  %v511_v12 = vld [vmem:[%s3021_s3 + $0x68] sm:$0xff]  ;;  %v1747_v13 = vld [vmem:[%s3021_s3 + $0x160] sm:$0xff]  ;;  %s270_s25 = scalar_lea.vmem %s3023_s5, %s1713_s14 }
  0x1c   : > { %1871 = vmatpush.msra.mxu3 %v1728_v14  ;;  %553 = vmatpush.msra.mxu0 %v1728_v14  ;;  %371 = vst [vmem:[#allocation3 + $0x48] sm:$0xff] %v2145_v28  ;;  %v340_v48 = vadd.f32 %v2092_v6, %v338_v43  ;;  %v299_v53 = vmul.f32 %v2081_v4, %v279_v50  ;;  %v1764_v14 = vld [vmem:[%s3021_s3 + $0x1e8] sm:$0xff]  ;;  %v510_v17 = vld [vmem:[%s3021_s3 + $0x60] sm:$0xff]  ;;  %v1746_v18 = vld [vmem:[%s3021_s3 + $0x158] sm:$0xff] }
  0x1d   : > { %1872 = vmatpush.msra.mxu1 %v1727_v19  ;;  %1873 = vmatpush.msra.mxu2 %v1727_v19  ;;  %410 = vst [vmem:[#allocation2 + $0x41] sm:$0xff] %v2116_v16  ;;  %v2192_v49 = vadd.f32 %v2092_v6, %v306_v46  ;;  %v303_v55 = vmul.f32 %v2081_v4, %v283_v54  ;;  %v509_v21 = vld [vmem:[%s3021_s3 + $0x58] sm:$0xff]  ;;  %v1745_v22 = vld [vmem:[%s3021_s3 + $0x150] sm:$0xff]  ;;  %v1744_v27 = vld [vmem:[%s3021_s3 + $0x148] sm:$0xff] }
  0x1e   : > { %1874 = vmatpush.msra.mxu3 %v1727_v19  ;;  %554 = vmatpush.msra.mxu0 %v1727_v19  ;;  %375 = vst [vmem:[#allocation3 + $0x68] sm:$0xff] %v2157_v33  ;;  %v2198_v52 = vmul.f32 %v354_v29, %v340_v48  ;;  %v2210_v57 = vadd.f32 %v2092_v6, %v299_v53  ;;  %v1763_v19 = vld [vmem:[%s3021_s3 + $0x1e0] sm:$0xff]  ;;  %v1762_v23 = vld [vmem:[%s3021_s3 + $0x1d8] sm:$0xff]  ;;  %v275_v29 = vld [vmem:[%s2087_s27 + $0x8] sm:$0xff] }
  0x1f   : > { %1875 = vmatpush.msra.mxu1 %v1726_v25  ;;  %1876 = vmatpush.msra.mxu2 %v1726_v25  ;;  %362 = vst [vmem:[#allocation3] sm:$0xff] %v2163_v36  ;;  %v2214_v59 = vadd.f32 %v2092_v6, %v303_v55  ;;  %v294_v60 = vmul.f32 %v2081_v4, %v274_v58  ;;  %v1782_v24 = vld [vmem:[%s3021_s3 + $0x278] sm:$0xff]  ;;  %v1761_v30 = vld [vmem:[%s3021_s3 + $0x1d0] sm:$0xff]  ;;  %v507_v32 = vld [vmem:[%s3021_s3 + $0x48] sm:$0xff] }
  0x20   : > { %1877 = vmatpush.msra.mxu3 %v1726_v25  ;;  %555 = vmatpush.msra.mxu0 %v1726_v25  ;;  %402 = vst [vmem:[#allocation2 + $0x1] sm:$0xff] %v2163_v36  ;;  %v307_v63 = vmul.f32 %v2081_v4, %v287_v61  ;;  %v508_v25 = vld [vmem:[%s3021_s3 + $0x50] sm:$0xff]  ;;  %v1743_v34 = vld [vmem:[%s3021_s3 + $0x140] sm:$0xff]  ;;  %v295_v37 = vmul.f32 %v2081_v4, %v275_v29  ;;  %v1742_v39 = vld [vmem:[%s3021_s3 + $0x138] sm:$0xff] }
  0x21   : > { %1878 = vmatpush.msra.mxu1 %v1725_v31  ;;  %1879 = vmatpush.msra.mxu2 %v1725_v31  ;;  %368 = vst [vmem:[#allocation3 + $0x30] sm:$0xff] %v2176_v42  ;;  %v2226_v0 = vadd.f32 %v2092_v6, %v294_v60  ;;  %v506_v38 = vld [vmem:[%s3021_s3 + $0x40] sm:$0xff]  ;;  %v1741_v44 = vld [vmem:[%s3021_s3 + $0x130] sm:$0xff]  ;;  %v1758_v46 = vld [vmem:[%s3021_s3 + $0x1b8] sm:$0xff] }
  0x22   : > { %1880 = vmatpush.msra.mxu3 %v1725_v31  ;;  %556 = vmatpush.msra.mxu0 %v1725_v31  ;;  %372 = vst [vmem:[#allocation3 + $0x50] sm:$0xff] %v2181_v45  ;;  %v2232_v2 = vadd.f32 %v2092_v6, %v307_v63  ;;  %v1781_v31 = vld [vmem:[%s3021_s3 + $0x270] sm:$0xff]  ;;  %v1759_v4 = vld [vmem:[%s3021_s3 + $0x1c0] sm:$0xff]  ;;  %v2352_v43 = vadd.f32 %v2092_v6, %v295_v37  ;;  %v1778_v6 = vld [vmem:[%s3021_s3 + $0x258] sm:$0xff] }
  0x23   : > { %1881 = vmatpush.msra.mxu1 %v1724_v35  ;;  %1882 = vmatpush.msra.mxu2 %v1724_v35  ;;  %408 = vst [vmem:[#allocation2 + $0x31] sm:$0xff] %v2176_v42  ;;  %v1779_v40 = vld [vmem:[%s3021_s3 + $0x260] sm:$0xff]  ;;  %v504_v48 = vld [vmem:[%s3021_s3 + $0x30] sm:$0xff]  ;;  %v1740_v50 = vld [vmem:[%s3021_s3 + $0x128] sm:$0xff] }
  0x24   : > { %1883 = vmatpush.msra.mxu3 %v1724_v35  ;;  %557 = vmatpush.msra.mxu0 %v1724_v35  ;;  %376 = vst [vmem:[#allocation3 + $0x70] sm:$0xff] %v2192_v49  ;;  %v1760_v35 = vld [vmem:[%s3021_s3 + $0x1c8] sm:$0xff]  ;;  %v1757_v53 = vld [vmem:[%s3021_s3 + $0x1b0] sm:$0xff]  ;;  %v1738_v63 = vld [vmem:[%s3021_s3 + $0x118] sm:$0xff] }
  0x25   : > { %1884 = vmatpush.msra.mxu1 %v1723_v41  ;;  %1885 = vmatpush.msra.mxu2 %v1723_v41  ;;  %363 = vst [vmem:[#allocation3 + $0x8] sm:$0xff] %v2198_v52  ;;  %v503_v55 = vld [vmem:[%s3021_s3 + $0x28] sm:$0xff]  ;;  %v1814_v29 = vld [vmem:[%s3021_s3 + $0x378] sm:$0xff]  ;;  %v1813_v37 = vld [vmem:[%s3021_s3 + $0x370] sm:$0xff] }
  0x26   : > { %1886 = vmatpush.msra.mxu3 %v1723_v41  ;;  %558 = vmatpush.msra.mxu0 %v1723_v41  ;;  %412 = vst [vmem:[#allocation2 + $0x51] sm:$0xff] %v2181_v45  ;;  %v505_v41 = vld [vmem:[%s3021_s3 + $0x38] sm:$0xff]  ;;  %v1756_v58 = vld [vmem:[%s3021_s3 + $0x1a8] sm:$0xff] }
  0x27   : > { %1887 = vmatpush.msra.mxu1 %v1722_v47  ;;  %1888 = vmatpush.msra.mxu2 %v1722_v47  ;;  %369 = vst [vmem:[#allocation3 + $0x38] sm:$0xff] %v2210_v57  ;;  %v1776_v60 = vld [vmem:[%s3021_s3 + $0x248] sm:$0xff] }
  0x28   : > { %1889 = vmatpush.msra.mxu3 %v1722_v47  ;;  %559 = vmatpush.msra.mxu0 %v1722_v47  ;;  %373 = vst [vmem:[#allocation3 + $0x58] sm:$0xff] %v2214_v59  ;;  %v387_v61 = vld [vmem:[#allocation3 + $0x28] sm:$0x7f] }
  0x29   : > { %1890 = vmatpush.msra.mxu1 %v1721_v51  ;;  %1891 = vmatpush.msra.mxu2 %v1721_v51  ;;  %422 = vst [vmem:[#allocation2] sm:$0x1] %v1986_v3 }
  0x2a   : > { %1892 = vmatpush.msra.mxu3 %v1721_v51  ;;  %560 = vmatpush.msra.mxu0 %v1721_v51  ;;  %364 = vst [vmem:[#allocation3 + $0x10] sm:$0xff] %v2226_v0 }
  0x2b   : > { %1893 = vmatpush.msra.mxu1 %v1720_v56  ;;  %1894 = vmatpush.msra.mxu2 %v1720_v56  ;;  %377 = vst [vmem:[#allocation3 + $0x78] sm:$0xff] %v2232_v2 }
  0x2c   : > { %1895 = vmatpush.msra.mxu3 %v1720_v56  ;;  %561 = vmatpush.msra.mxu0 %v1720_v56  ;;  %423 = vst [vmem:[#allocation2 + $0x10] sm:$0x1] %v1986_v3  ;;  %v2366_v47 = vld [vmem:[#allocation3 + $0x1] sm:$0xff]  ;;  %v433_v54 = vld [vmem:[#allocation3 + $0x9] sm:$0x7f] }
  0x2d   : > { %1896 = vmatpush.msra.mxu1 %v1719_v62  ;;  %1897 = vmatpush.msra.mxu2 %v1719_v62  ;;  %424 = vst [vmem:[#allocation2 + $0x20] sm:$0x1] %v1986_v3  ;;  %v383_v51 = vld [vmem:[#allocation3 + $0x8] sm:$0x7f]  ;;  %v1739_v56 = vld [vmem:[%s3021_s3 + $0x120] sm:$0xff] }
  0x2e   : > { %575 = vmatmul.f32.vlgmr.msra.gmra.mxu1 %v2110_v15  ;;  %587 = vmatmul.f32.vlgmr.msra.gmra.mxu2 %v2116_v16  ;;  %425 = vst [vmem:[#allocation2 + $0x30] sm:$0x1] %v1986_v3 }
  0x2f   : > { %710 = vmatpush.msrb.mxu2 %v1750_v1  ;;  %1898 = vmatpush.msra.mxu3 %v1719_v62  ;;  %426 = vst [vmem:[#allocation2 + $0x40] sm:$0x1] %v1986_v3  ;;  %v1755_v1 = vld [vmem:[%s3021_s3 + $0x1a0] sm:$0xff] }
  0x30   : > { %612 = vmatpush.msrb.mxu1 %v513_v5  ;;  %599 = vmatmul.f32.vlgmr.msra.gmra.mxu3 %v2129_v20  ;;  %427 = vst [vmem:[#allocation2 + $0x50] sm:$0x1] %v1986_v3  ;;  %v501_v5 = vld [vmem:[%s3021_s3 + $0x18] sm:$0xff] }
  0x31   : > { %711 = vmatpush.msrb.mxu2 %v1749_v7  ;;  %825 = vmatpush.msrb.mxu3 %v1766_v8  ;;  %428 = vst [vmem:[#allocation2 + $0x60] sm:$0x1] %v1986_v3  ;;  %v1737_v7 = vld [vmem:[%s3021_s3 + $0x110] sm:$0xff] }
  0x32   : > { %613 = vmatpush.msrb.mxu1 %v512_v9  ;;  %562 = vmatpush.msra.mxu0 %v1719_v62  ;;  %429 = vst [vmem:[#allocation2 + $0x70] sm:$0x1] %v1986_v3  ;;  %v502_v62 = vld [vmem:[%s3021_s3 + $0x20] sm:$0xff] }
  0x33   : > { %712 = vmatpush.msrb.mxu2 %v1748_v10  ;;  %826 = vmatpush.msrb.mxu3 %v1765_v11  ;;  %430 = vst [vmem:[#allocation2 + $0x80] sm:$0x1] %v1986_v3  ;;  %v1774_v10 = vld [vmem:[%s3021_s3 + $0x238] sm:$0xff] }
  0x34   : > { %614 = vmatpush.msrb.mxu1 %v511_v12  ;;  %563 = vmatmul.f32.vlgmr.msra.gmra.mxu0 %v2163_v36  ;;  %431 = vst [vmem:[#allocation2 + $0x90] sm:$0x1] %v1986_v3  ;;  %v1780_v36 = vld [vmem:[%s3021_s3 + $0x268] sm:$0xff]  ;;  %v500_v12 = vld [vmem:[%s3021_s3 + $0x10] sm:$0xff] }
  0x35   : > { %713 = vmatpush.msrb.mxu2 %v1747_v13  ;;  %827 = vmatpush.msrb.mxu3 %v1764_v14  ;;  %472 = vst [vmem:[#allocation4 + $0xf] sm:$0x1] %v1986_v3  ;;  %v1736_v13 = vld [vmem:[%s3021_s3 + $0x108] sm:$0xff]  ;;  %v1753_v14 = vld [vmem:[%s3021_s3 + $0x190] sm:$0xff] }
  0x36   : > { %615 = vmatpush.msrb.mxu1 %v510_v17  ;;  %590 = vmatmul.f32.gmra.mxu2 %v2145_v28  ;;  %473 = vst [vmem:[#allocation4 + $0x1f] sm:$0x1] %v1986_v3  ;;  %v1773_v17 = vld [vmem:[%s3021_s3 + $0x230] sm:$0xff] }
  0x37   : > { %578 = vmatmul.f32.gmra.mxu1 %v2141_v26  ;;  %714 = vmatpush.msrb.mxu2 %v1746_v18  ;;  %474 = vst [vmem:[#allocation4 + $0x2f] sm:$0x1] %v1986_v3  ;;  %v499_v18 = vld [vmem:[%s3021_s3 + $0x8] sm:$0xff] }
  0x38   : > { %828 = vmatpush.msrb.mxu3 %v1763_v19  ;;  %616 = vmatpush.msrb.mxu1 %v509_v21  ;;  %475 = vst [vmem:[#allocation4 + $0x3f] sm:$0x1] %v1986_v3  ;;  %v1735_v19 = vld [vmem:[%s3021_s3 + $0x100] sm:$0xff]  ;;  %v1752_v21 = vld [vmem:[%s3021_s3 + $0x188] sm:$0xff] }
  0x39   : > { %602 = vmatmul.f32.gmra.mxu3 %v2157_v33  ;;  %715 = vmatpush.msrb.mxu2 %v1745_v22  ;;  %476 = vst [vmem:[#allocation4 + $0x4f] sm:$0x1] %v1986_v3  ;;  %v1772_v22 = vld [vmem:[%s3021_s3 + $0x228] sm:$0xff] }
  0x3a   : > { %829 = vmatpush.msrb.mxu3 %v1762_v23  ;;  %940 = vmatpush.msrb.mxu0 %v1782_v24  ;;  %477 = vst [vmem:[#allocation4 + $0x5f] sm:$0x1] %v1986_v3  ;;  %v498_v23 = vld [vmem:[%s3021_s3] sm:$0xff] }
  0x3b   : > { %617 = vmatpush.msrb.mxu1 %v508_v25  ;;  %716 = vmatpush.msrb.mxu2 %v1744_v27  ;;  %478 = vst [vmem:[#allocation4 + $0x6f] sm:$0x1] %v1986_v3  ;;  %v482_v24 = vld [vmem:[#allocation2] sm:$0xff] }
  0x3c   : > { %830 = vmatpush.msrb.mxu3 %v1761_v30  ;;  %941 = vmatpush.msrb.mxu0 %v1781_v31  ;;  %479 = vst [vmem:[#allocation4 + $0x7f] sm:$0x1] %v1986_v3  ;;  %v1751_v25 = vld [vmem:[%s3021_s3 + $0x180] sm:$0xff] }
  0x3d   : > { %618 = vmatpush.msrb.mxu1 %v507_v32  ;;  %717 = vmatpush.msrb.mxu2 %v1743_v34  ;;  %480 = vst [vmem:[#allocation4 + $0x8f] sm:$0x1] %v1986_v3  ;;  %v1771_v27 = vld [vmem:[%s3021_s3 + $0x220] sm:$0xff]  ;;  %v437_v32 = vld [vmem:[#allocation3 + $0x29] sm:$0x7f]  ;;  %v1770_v34 = vld [vmem:[%s3021_s3 + $0x218] sm:$0xff] }
  0x3e   : > { %831 = vmatpush.msrb.mxu3 %v1760_v35  ;;  %942 = vmatpush.msrb.mxu0 %v1780_v36  ;;  %481 = vst [vmem:[#allocation4 + $0x9f] sm:$0x1] %v1986_v3  ;;  %v1775_v3 = vld [vmem:[%s3021_s3 + $0x240] sm:$0xff]  ;;  %v1830_v35 = vld [vmem:[%s3021_s3 + $0x3f8] sm:$0xff] }
  0x3f   : > { %619 = vmatpush.msrb.mxu1 %v506_v38  ;;  %593 = vmatmul.f32.gmra.mxu2 %v2181_v45  ;;  %365 = vst [vmem:[#allocation3 + $0x18] sm:$0xff] %v2352_v43  ;;  %v2467_v31 = vld [vmem:[#allocation3 + $0x21] sm:$0xff]  ;;  %v1798_v36 = vld [vmem:[%s3021_s3 + $0x2f8] sm:$0xff] }
  0x40   : > { %581 = vmatmul.f32.gmra.mxu1 %v2176_v42  ;;  %718 = vmatpush.msrb.mxu2 %v1742_v39  ;;  %404 = vst [vmem:[#allocation2 + $0x11] sm:$0xff] %v2226_v0  ;;  %v389_v38 = vld [vmem:[#allocation3 + $0x38] sm:$0x7f]  ;;  %v1769_v39 = vld [vmem:[%s3021_s3 + $0x210] sm:$0xff] }
  0x41   : > { %832 = vmatpush.msrb.mxu3 %v1759_v4  ;;  %943 = vmatpush.msrb.mxu0 %v1779_v40  ;;  %403 = vst [vmem:[#allocation2 + $0x9] sm:$0x7f] %v383_v51  ;;  %v1829_v4 = vld [vmem:[%s3021_s3 + $0x3f0] sm:$0xff] }
  0x42   : > { %620 = vmatpush.msrb.mxu1 %v505_v41  ;;  %566 = vmatmul.f32.gmra.mxu0 %v2198_v52  ;;  %v1777_v52 = vld [vmem:[%s3021_s3 + $0x250] sm:$0xff]  ;;  %453 = vst [vmem:[#allocation4 + $0x8] sm:$0x7f] %v433_v54  ;;  %v1812_v41 = vld [vmem:[%s3021_s3 + $0x368] sm:$0xff]  ;;  %v1827_v54 = vld [vmem:[%s3021_s3 + $0x3e0] sm:$0xff] }
  0x43   : > { %605 = vmatmul.f32.gmra.mxu3 %v2192_v49  ;;  %719 = vmatpush.msrb.mxu2 %v1741_v44  ;;  %407 = vst [vmem:[#allocation2 + $0x29] sm:$0x7f] %v387_v61  ;;  %v1797_v40 = vld [vmem:[%s3021_s3 + $0x2f0] sm:$0xff]  ;;  %v1768_v44 = vld [vmem:[%s3021_s3 + $0x208] sm:$0xff]  ;;  %v1794_v61 = vld [vmem:[%s3021_s3 + $0x2d8] sm:$0xff] }
  0x44   : > { %833 = vmatpush.msrb.mxu3 %v1758_v46  ;;  %944 = vmatpush.msrb.mxu0 %v1778_v6  ;;  %414 = vst [vmem:[#allocation2 + $0x61] sm:$0xff] %v2129_v20  ;;  %v1754_v20 = vld [vmem:[%s3021_s3 + $0x198] sm:$0xff] }
  0x45   : > { %621 = vmatpush.msrb.mxu1 %v504_v48  ;;  %720 = vmatpush.msrb.mxu2 %v1740_v50  ;;  %416 = vst [vmem:[#allocation2 + $0x71] sm:$0xff] %v2192_v49  ;;  %v1767_v48 = vld [vmem:[%s3021_s3 + $0x200] sm:$0xff]  ;;  %v1796_v50 = vld [vmem:[%s3021_s3 + $0x2e8] sm:$0xff] }
  0x46   : > { %834 = vmatpush.msrb.mxu3 %v1757_v53  ;;  %945 = vmatpush.msrb.mxu0 %v1777_v52  ;;  %v385_v8 = vld [vmem:[#allocation3 + $0x18] sm:$0x7f]  ;;  %457 = vst [vmem:[#allocation4 + $0x28] sm:$0x7f] %v437_v32  ;;  %v1811_v52 = vld [vmem:[%s3021_s3 + $0x360] sm:$0xff] }
  0x47   : > { %622 = vmatpush.msrb.mxu1 %v503_v55  ;;  %721 = vmatpush.msrb.mxu2 %v1739_v56  ;;  %v435_v9 = vld [vmem:[#allocation3 + $0x19] sm:$0x7f]  ;;  %405 = vst [vmem:[#allocation2 + $0x19] sm:$0x7f] %v385_v8  ;;  %v2424_v11 = vld [vmem:[#allocation3 + $0x11] sm:$0xff]  ;;  %v1795_v55 = vld [vmem:[%s3021_s3 + $0x2e0] sm:$0xff] }
  0x48   : > { %835 = vmatpush.msrb.mxu3 %v1756_v58  ;;  %946 = vmatpush.msrb.mxu0 %v1776_v60  ;;  %455 = vst [vmem:[#allocation4 + $0x18] sm:$0x7f] %v435_v9  ;;  %v2465_v30 = vld [vmem:[#allocation2 + $0x10] sm:$0xff]  ;;  %v483_v6 = vld [vmem:[#allocation2 + $0x8] sm:$0xff]  ;;  %v1846_v53 = vld [vmem:[%s3021_s3 + $0x478] sm:$0xff] }
  0x49   : > { %623 = vmatpush.msrb.mxu1 %v502_v62  ;;  %596 = vmatmul.f32.gmra.mxu2 %v2214_v59  ;;  %409 = vst [vmem:[#allocation2 + $0x39] sm:$0x7f] %v389_v38  ;;  %v678_v46 = vld [vmem:[#allocation4 + $0x8] sm:$0xff]  ;;  %v1845_v56 = vld [vmem:[%s3021_s3 + $0x470] sm:$0xff]  ;;  %v1810_v58 = vld [vmem:[%s3021_s3 + $0x358] sm:$0xff] }
  0x4a   : > { %584 = vmatmul.f32.gmra.mxu1 %v2210_v57  ;;  %722 = vmatpush.msrb.mxu2 %v1738_v63  ;;  %v1826_v60 = vld [vmem:[%s3021_s3 + $0x3d8] sm:$0xff]  ;;  %v1809_v62 = vld [vmem:[%s3021_s3 + $0x350] sm:$0xff]  ;;  %v1843_v63 = vld [vmem:[%s3021_s3 + $0x460] sm:$0xff] }
  0x4b   : > { %836 = vmatpush.msrb.mxu3 %v1755_v1  ;;  %947 = vmatpush.msrb.mxu0 %v1775_v3  ;;  %v1825_v1 = vld [vmem:[%s3021_s3 + $0x3d0] sm:$0xff]  ;;  %v2545_v3 = vld [vmem:[#allocation2 + $0x20] sm:$0xff]  ;;  %v1842_v8 = vld [vmem:[%s3021_s3 + $0x458] sm:$0xff] }
  0x4c   : > { %624 = vmatpush.msrb.mxu1 %v501_v5  ;;  %569 = vmatmul.f32.gmra.mxu0 %v2226_v0  ;;  %v2547_v5 = vld [vmem:[#allocation3 + $0x31] sm:$0xff] }
  0x4d   : > { %608 = vmatmul.f32.gmra.mxu3 %v2232_v2  ;;  %723 = vmatpush.msrb.mxu2 %v1737_v7  ;;  %v439_v7 = vld [vmem:[#allocation3 + $0x39] sm:$0x7f]  ;;  %v1793_v9 = vld [vmem:[%s3021_s3 + $0x2d0] sm:$0xff] }
  0x4e   : > { %837 = vmatpush.msrb.mxu3 %v1754_v20  ;;  %948 = vmatpush.msrb.mxu0 %v1774_v10  ;;  %v793_v51 = vld [vmem:[#allocation2 + $0x18] sm:$0xff]  ;;  %v1808_v20 = vld [vmem:[%s3021_s3 + $0x348] sm:$0xff]  ;;  %459 = vst [vmem:[#allocation4 + $0x38] sm:$0x7f] %v439_v7  ;;  %v1789_v38 = vld [vmem:[%s3021_s3 + $0x2b0] sm:$0xff] }
  0x4f   : > { %625 = vmatpush.msrb.mxu1 %v500_v12  ;;  %724 = vmatpush.msrb.mxu2 %v1736_v13  ;;  %v391_v10 = vld [vmem:[#allocation3 + $0x48] sm:$0x7f]  ;;  %v1841_v13 = vld [vmem:[%s3021_s3 + $0x450] sm:$0xff]  ;;  %v1790_v32 = vld [vmem:[%s3021_s3 + $0x2b8] sm:$0xff] }
  0x50   : > { %838 = vmatpush.msrb.mxu3 %v1753_v14  ;;  %949 = vmatpush.msrb.mxu0 %v1773_v17  ;;  %v1824_v12 = vld [vmem:[%s3021_s3 + $0x3c8] sm:$0xff]  ;;  %411 = vst [vmem:[#allocation2 + $0x49] sm:$0x7f] %v391_v10  ;;  %v2570_v17 = vld [vmem:[#allocation4 + $0x18] sm:$0xff] }
  0x51   : > { %626 = vmatpush.msrb.mxu1 %v499_v18  ;;  %725 = vmatpush.msrb.mxu2 %v1735_v19  ;;  %v1792_v14 = vld [vmem:[%s3021_s3 + $0x2c8] sm:$0xff]  ;;  %v1807_v18 = vld [vmem:[%s3021_s3 + $0x340] sm:$0xff] }
  0x52   : > { %839 = vmatpush.msrb.mxu3 %v1752_v21  ;;  %950 = vmatpush.msrb.mxu0 %v1772_v22  ;;  %v1823_v19 = vld [vmem:[%s3021_s3 + $0x3c0] sm:$0xff]  ;;  %v1840_v21 = vld [vmem:[%s3021_s3 + $0x448] sm:$0xff] }
  0x53   : > { %627 = vmatpush.msrb.mxu1 %v498_v23  ;;  %726 = vmatmul.f32.vlgmr.msrb.gmra.mxu2 %v2366_v47  ;;  %v1828_v47 = vld [vmem:[%s3021_s3 + $0x3e8] sm:$0xff]  ;;  %v1791_v22 = vld [vmem:[%s3021_s3 + $0x2c0] sm:$0xff]  ;;  %v2590_v23 = vld [vmem:[#allocation2 + $0x30] sm:$0xff] }
  0x54   : > { %628 = vmatmul.f32.vlgmr.msrb.gmra.mxu1 %v482_v24  ;;  %840 = vmatpush.msrb.mxu3 %v1751_v25  ;;  %v441_v24 = vld [vmem:[#allocation3 + $0x49] sm:$0x7f]  ;;  %v1806_v25 = vld [vmem:[%s3021_s3 + $0x338] sm:$0xff] }
  0x55   : > { %951 = vmatpush.msrb.mxu0 %v1771_v27  ;;  %1170 = vmatpush.msra.mxu2 %v1814_v29  ;;  %461 = vst [vmem:[#allocation4 + $0x48] sm:$0x7f] %v441_v24  ;;  %v393_v27 = vld [vmem:[#allocation3 + $0x58] sm:$0x7f]  ;;  %v1816_v24 = vld [vmem:[%s3021_s3 + $0x388] sm:$0xff] }
  0x56   : > { %572 = vmatmul.f32.gmra.mxu0 %v2352_v43  ;;  %841 = vmatmul.f32.vlgmr.msrb.gmra.mxu3 %v2465_v30  ;;  %v1822_v29 = vld [vmem:[%s3021_s3 + $0x3b8] sm:$0xff]  ;;  %413 = vst [vmem:[#allocation2 + $0x59] sm:$0x7f] %v393_v27  ;;  %v1784_v27 = vld [vmem:[%s3021_s3 + $0x288] sm:$0xff] }
  0x57   : > { %952 = vmatpush.msrb.mxu0 %v1770_v34  ;;  %1285 = vmatpush.msra.mxu3 %v1830_v35  ;;  %v2609_v34 = vld [vmem:[#allocation4 + $0x28] sm:$0xff]  ;;  %v1805_v35 = vld [vmem:[%s3021_s3 + $0x330] sm:$0xff] }
  0x58   : > { %1055 = vmatpush.msra.mxu1 %v1798_v36  ;;  %1171 = vmatpush.msra.mxu2 %v1813_v37  ;;  %v1821_v36 = vld [vmem:[%s3021_s3 + $0x3b0] sm:$0xff]  ;;  %v1838_v37 = vld [vmem:[%s3021_s3 + $0x438] sm:$0xff] }
  0x59   : > { %953 = vmatpush.msrb.mxu0 %v1769_v39  ;;  %1286 = vmatpush.msra.mxu3 %v1829_v4  ;;  %v2630_v39 = vld [vmem:[#allocation2 + $0x40] sm:$0xff]  ;;  %v443_v4 = vld [vmem:[#allocation3 + $0x59] sm:$0x7f] }
  0x5a   : > { %1056 = vmatpush.msra.mxu1 %v1797_v40  ;;  %1172 = vmatpush.msra.mxu2 %v1812_v41  ;;  %v1804_v40 = vld [vmem:[%s3021_s3 + $0x328] sm:$0xff]  ;;  %463 = vst [vmem:[#allocation4 + $0x58] sm:$0x7f] %v443_v4  ;;  %v1783_v4 = vld [vmem:[%s3021_s3 + $0x280] sm:$0xff] }
  0x5b   : > { %954 = vmatpush.msrb.mxu0 %v1768_v44  ;;  %729 = vmatmul.f32.gmra.mxu2 %v678_v46  ;;  %v395_v41 = vld [vmem:[#allocation3 + $0x68] sm:$0x7f]  ;;  %v1837_v46 = vld [vmem:[%s3021_s3 + $0x430] sm:$0xff] }
  0x5c   : > { %631 = vmatmul.f32.gmra.mxu1 %v483_v6  ;;  %1287 = vmatpush.msra.mxu3 %v1828_v47  ;;  %v1820_v44 = vld [vmem:[%s3021_s3 + $0x3a8] sm:$0xff]  ;;  %415 = vst [vmem:[#allocation2 + $0x69] sm:$0x7f] %v395_v41  ;;  %v2649_v47 = vld [vmem:[#allocation4 + $0x38] sm:$0xff]  ;;  %v2776_v41 = vld [vmem:[#allocation2 + $0x70] sm:$0xff] }
  0x5d   : > { %955 = vmatpush.msrb.mxu0 %v1767_v48  ;;  %1057 = vmatpush.msra.mxu1 %v1796_v50  ;;  %v1788_v6 = vld [vmem:[%s3021_s3 + $0x2a8] sm:$0xff]  ;;  %v1803_v48 = vld [vmem:[%s3021_s3 + $0x320] sm:$0xff] }
  0x5e   : > { %844 = vmatmul.f32.gmra.mxu3 %v793_v51  ;;  %956 = vmatmul.f32.vlgmr.msrb.gmra.mxu0 %v2226_v0  ;;  %v1844_v0 = vld [vmem:[%s3021_s3 + $0x468] sm:$0xff]  ;;  %v1819_v50 = vld [vmem:[%s3021_s3 + $0x3a0] sm:$0xff] }
  0x5f   : > { %1400 = vmatpush.msra.mxu0 %v1846_v53  ;;  %1173 = vmatpush.msra.mxu2 %v1811_v52  ;;  %v1787_v53 = vld [vmem:[%s3021_s3 + $0x2a0] sm:$0xff]  ;;  %v2670_v52 = vld [vmem:[#allocation2 + $0x50] sm:$0xff] }
  0x60   : > { %1288 = vmatpush.msra.mxu3 %v1827_v54  ;;  %1058 = vmatpush.msra.mxu1 %v1795_v55  ;;  %v445_v54 = vld [vmem:[#allocation3 + $0x69] sm:$0x7f]  ;;  %v1802_v55 = vld [vmem:[%s3021_s3 + $0x318] sm:$0xff] }
  0x61   : > { %1401 = vmatpush.msra.mxu0 %v1845_v56  ;;  %1174 = vmatpush.msra.mxu2 %v1810_v58  ;;  %465 = vst [vmem:[#allocation4 + $0x68] sm:$0x7f] %v445_v54  ;;  %v397_v56 = vld [vmem:[#allocation3 + $0x78] sm:$0x7f] }
  0x62   : > { %1289 = vmatpush.msra.mxu3 %v1826_v60  ;;  %1059 = vmatpush.msra.mxu1 %v1794_v61  ;;  %v1818_v58 = vld [vmem:[%s3021_s3 + $0x398] sm:$0xff]  ;;  %v1835_v60 = vld [vmem:[%s3021_s3 + $0x420] sm:$0xff]  ;;  %417 = vst [vmem:[#allocation2 + $0x79] sm:$0x7f] %v397_v56 }
  0x63   : > { %732 = vmatmul.f32.gmra.mxu2 %v2424_v11  ;;  %1402 = vmatpush.msra.mxu0 %v1844_v0  ;;  %v1786_v61 = vld [vmem:[%s3021_s3 + $0x298] sm:$0xff]  ;;  %v2689_v0 = vld [vmem:[#allocation4 + $0x48] sm:$0xff] }
  0x64   : > { %634 = vmatmul.f32.gmra.mxu1 %v2465_v30  ;;  %1175 = vmatpush.msra.mxu2 %v1809_v62  ;;  %v1839_v30 = vld [vmem:[%s3021_s3 + $0x440] sm:$0xff]  ;;  %v288_v62 = vld [vmem:[%s2087_s27 + $0x70] sm:$0xff] }
  0x65   : > { %1403 = vmatpush.msra.mxu0 %v1843_v63  ;;  %1290 = vmatpush.msra.mxu3 %v1825_v1  ;;  %v2696_v63 = vld [vmem:[%s3019_s1] ss:$0 sm:$0xff] }
  0x66   : > { %847 = vmatmul.f32.gmra.mxu3 %v2545_v3  ;;  %959 = vmatmul.f32.gmra.mxu0 %v2352_v43  ;;  %v2573_v43 = vld [vmem:[#allocation2 + $0x28] sm:$0xff]  ;;  %v308_v1 = vmul.f32 %v2696_v63, %v288_v62 }
  0x67   : > { %1404 = vmatpush.msra.mxu0 %v1842_v8  ;;  %1060 = vmatpush.msra.mxu1 %v1793_v9  ;;  %v2701_v8 = vld [vmem:[#allocation2 + $0x58] sm:$0xff]  ;;  %v1801_v9 = vld [vmem:[%s3021_s3 + $0x310] sm:$0xff] }
  0x68   : > { %1176 = vmatpush.msra.mxu2 %v1808_v20  ;;  %1291 = vmatpush.msra.mxu3 %v1824_v12  ;;  %v2710_v20 = vld [vmem:[%s3020_s2] ss:$0 sm:$0xff] }
  0x69   : > { %1405 = vmatpush.msra.mxu0 %v1841_v13  ;;  %1061 = vmatpush.msra.mxu1 %v1792_v14  ;;  %v2713_v10 = vadd.f32 %v2710_v20, %v308_v1  ;;  %v1817_v13 = vld [vmem:[%s3021_s3 + $0x390] sm:$0xff]  ;;  %v1834_v14 = vld [vmem:[%s3021_s3 + $0x418] sm:$0xff] }
  0x6a   : > { %1177 = vmatpush.msra.mxu2 %v1807_v18  ;;  %1292 = vmatpush.msra.mxu3 %v1823_v19  ;;  %v1785_v18 = vld [vmem:[%s3021_s3 + $0x290] sm:$0xff] }
  0x6b   : > { %735 = vmatmul.f32.gmra.mxu2 %v2570_v17  ;;  %1406 = vmatpush.msra.mxu0 %v1840_v21  ;;  %378 = vst [vmem:[#allocation3 + $0x80] sm:$0xff] %v2713_v10  ;;  %v2735_v19 = vld [vmem:[#allocation3 + $0x71] sm:$0xff]  ;;  %v447_v21 = vld [vmem:[#allocation3 + $0x79] sm:$0x7f] }
  0x6c   : > { %637 = vmatmul.f32.gmra.mxu1 %v793_v51  ;;  %1178 = vmatpush.msra.mxu2 %v1806_v25  ;;  %v1836_v51 = vld [vmem:[%s3021_s3 + $0x428] sm:$0xff]  ;;  %418 = vst [vmem:[#allocation2 + $0x81] sm:$0xff] %v2713_v10  ;;  %v1833_v25 = vld [vmem:[%s3021_s3 + $0x410] sm:$0xff] }
  0x6d   : > { %1062 = vmatpush.msra.mxu1 %v1791_v22  ;;  %1293 = vmatpush.msra.mxu3 %v1822_v29  ;;  %v1800_v22 = vld [vmem:[%s3021_s3 + $0x308] sm:$0xff]  ;;  %467 = vst [vmem:[#allocation4 + $0x78] sm:$0x7f] %v447_v21 }
  0x6e   : > { %850 = vmatmul.f32.gmra.mxu3 %v2573_v43  ;;  %962 = vmatmul.f32.gmra.mxu0 %v2110_v15  ;;  %v2592_v15 = vld [vmem:[#allocation3 + $0x41] sm:$0xff] }
  0x6f   : > { %1407 = vmatpush.msra.mxu0 %v1839_v30  ;;  %1063 = vmatpush.msra.mxu1 %v1790_v32  ;;  %v2752_v30 = vld [vmem:[#allocation4 + $0x58] sm:$0xff] }
  0x70   : > { %1179 = vmatpush.msra.mxu2 %v1805_v35  ;;  %1294 = vmatpush.msra.mxu3 %v1821_v36  ;;  %v1799_v35 = vld [vmem:[%s3021_s3 + $0x300] sm:$0xff] }
  0x71   : > { %1408 = vmatpush.msra.mxu0 %v1838_v37  ;;  %1064 = vmatpush.msra.mxu1 %v1789_v38  ;;  %v1944_v36 = vld [vmem:[#allocation3 + $0x60] sm:$0xff]  ;;  %v1832_v38 = vld [vmem:[%s3021_s3 + $0x408] sm:$0xff] }
  0x72   : > { %1180 = vmatpush.msra.mxu2 %v1804_v40  ;;  %1295 = vmatpush.msra.mxu3 %v1820_v44  ;;  %v1815_v37 = vld [vmem:[%s3021_s3 + $0x380] sm:$0xff] }
  0x73   : > { %738 = vmatmul.f32.gmra.mxu2 %v2467_v31  ;;  %1409 = vmatpush.msra.mxu0 %v1837_v46 }
  0x74   : > { %640 = vmatmul.f32.gmra.mxu1 %v2545_v3  ;;  %1181 = vmatpush.msra.mxu2 %v1803_v48  ;;  %v1831_v48 = vld [vmem:[%s3021_s3 + $0x400] sm:$0xff]  ;;  %v2814_v62 = vld [vmem:[#allocation4 + $0x78] sm:$0xff] }
  0x75   : > { %1065 = vmatpush.msra.mxu1 %v1788_v6  ;;  %1296 = vmatpush.msra.mxu3 %v1819_v50  ;;  %v2788_v50 = vld [vmem:[#allocation4 + $0x68] sm:$0xff] }
  0x76   : > { %853 = vmatmul.f32.gmra.mxu3 %v2590_v23  ;;  %965 = vmatmul.f32.gmra.mxu0 %v2141_v26  ;;  %v2612_v26 = vld [vmem:[#allocation2 + $0x38] sm:$0xff] }
  0x77   : > { %1410 = vmatpush.msra.mxu0 %v1836_v51  ;;  %1066 = vmatpush.msra.mxu1 %v1787_v53  ;;  %v2793_v53 = vld [vmem:[#allocation2 + $0x78] sm:$0xff] }
  0x78   : > { %1182 = vmatpush.msra.mxu2 %v1802_v55  ;;  %1297 = vmatpush.msra.mxu3 %v1818_v58  ;;  %v2805_v58 = vld [vmem:[#allocation2 + $0x80] sm:$0xff] }
  0x79   : > { %1411 = vmatpush.msra.mxu0 %v1835_v60  ;;  %1067 = vmatpush.msra.mxu1 %v1786_v61 }
  0x7a   : > { %1183 = vmatpush.msra.mxu2 %v1801_v9  ;;  %1298 = vmatpush.msra.mxu3 %v1817_v13  ;;  %v1252_v13 = vld [vmem:[#allocation3 + $0x20] sm:$0xff] }
  0x7b   : > { %741 = vmatmul.f32.gmra.mxu2 %v2609_v34  ;;  %1412 = vmatpush.msra.mxu0 %v1834_v14 }
  0x7c   : > { %643 = vmatmul.f32.gmra.mxu1 %v2573_v43  ;;  %1184 = vmatpush.msra.mxu2 %v1800_v22 }
  0x7d   : > { %1068 = vmatpush.msra.mxu1 %v1785_v18  ;;  %1299 = vmatpush.msra.mxu3 %v1816_v24 }
  0x7e   : > { %856 = vmatmul.f32.gmra.mxu3 %v2612_v26  ;;  %968 = vmatmul.f32.gmra.mxu0 %v2176_v42  ;;  %v2632_v42 = vld [vmem:[#allocation3 + $0x51] sm:$0xff] }
  0x7f   : > { %1413 = vmatpush.msra.mxu0 %v1833_v25  ;;  %1069 = vmatpush.msra.mxu1 %v1784_v27 }
  0x80   : > { %1185 = vmatpush.msra.mxu2 %v1799_v35  ;;  %1300 = vmatpush.msra.mxu3 %v1815_v37 }
  0x81   : > { %1414 = vmatpush.msra.mxu0 %v1832_v38  ;;  %1070 = vmatpush.msra.mxu1 %v1783_v4 }
  0x83   : > { %744 = vmatmul.f32.gmra.mxu2 %v2547_v5  ;;  %1415 = vmatpush.msra.mxu0 %v1831_v48 }
  0x84   : > { %646 = vmatmul.f32.gmra.mxu1 %v2590_v23 }
  0x86   : > { %859 = vmatmul.f32.gmra.mxu3 %v2630_v39  ;;  %971 = vmatmul.f32.gmra.mxu0 %v2210_v57  ;;  %v2652_v57 = vld [vmem:[#allocation2 + $0x48] sm:$0xff] }
  0x8b   : > { %747 = vmatmul.f32.gmra.mxu2 %v2649_v47 }
  0x8c   : > { %649 = vmatmul.f32.gmra.mxu1 %v2612_v26 }
  0x8e   : > { %862 = vmatmul.f32.gmra.mxu3 %v2652_v57  ;;  %974 = vmatmul.f32.gmra.mxu0 %v2116_v16  ;;  %v2672_v16 = vld [vmem:[#allocation3 + $0x61] sm:$0xff] }
  0x93   : > { %750 = vmatmul.f32.gmra.mxu2 %v2592_v15 }
  0x94   : > { %652 = vmatmul.f32.gmra.mxu1 %v2630_v39 }
  0x96   : > { %865 = vmatmul.f32.gmra.mxu3 %v2670_v52  ;;  %977 = vmatmul.f32.gmra.mxu0 %v2145_v28  ;;  %v289_v28 = vld [vmem:[%s2087_s27 + $0x78] sm:$0xff]  ;;  %s1711_s27 = sshll.u32 %s259_s10, 3 }
  0x97   : > { %v309_v7 = vmul.f32 %v2696_v63, %v289_v28  ;;  %s2959_s12 = scalar_lea.vmem %s3022_s4, %s1711_s27 }
  0x99   : > { %v2716_v12 = vadd.f32 %v2710_v20, %v309_v7 }
  0x9b   : > { %753 = vmatmul.f32.gmra.mxu2 %v2689_v0  ;;  %379 = vst [vmem:[#allocation3 + $0x88] sm:$0xff] %v2716_v12 }
  0x9c   : > { %655 = vmatmul.f32.gmra.mxu1 %v2652_v57 }
  0x9e   : > { %868 = vmatmul.f32.gmra.mxu3 %v2701_v8  ;;  %980 = vmatmul.f32.gmra.mxu0 %v2181_v45  ;;  %v2733_v45 = vld [vmem:[#allocation2 + $0x60] sm:$0xff] }
  0xa2   : > { %v399_v29 = vld [vmem:[#allocation3 + $0x88] sm:$0x7f] }
  0xa3   : > { %756 = vmatmul.f32.gmra.mxu2 %v2632_v42  ;;  %419 = vst [vmem:[#allocation2 + $0x89] sm:$0x7f] %v399_v29  ;;  %v1253_v29 = vld [vmem:[#allocation3 + $0x28] sm:$0xff] }
  0xa4   : > { %658 = vmatmul.f32.gmra.mxu1 %v2670_v52 }
  0xa6   : > { %871 = vmatmul.f32.gmra.mxu3 %v2733_v45  ;;  %983 = vmatmul.f32.gmra.mxu0 %v2214_v59  ;;  %v2755_v59 = vld [vmem:[#allocation2 + $0x68] sm:$0xff] }
  0xaa   : > { %v2817_v28 = vld [vmem:[#allocation2 + $0x88] sm:$0xff] }
  0xab   : > { %759 = vmatmul.f32.gmra.mxu2 %v2752_v30  ;;  %v2757_v32 = vpop.f32.mrf.mxu1 }
  0xac   : > { %661 = vmatmul.f32.gmra.mxu1 %v2701_v8 }
  0xae   : > { %874 = vmatmul.f32.gmra.mxu3 %v2755_v59  ;;  %986 = vmatmul.f32.gmra.mxu0 %v1944_v36 }
  0xb1   : > { %v2773_v40 = vpop.f32.mrf.mxu2  ;;  %v564_v6 = vpop.f32.mrf.mxu0 }
  0xb3   : > { %762 = vmatmul.f32.gmra.mxu2 %v2672_v16  ;;  %v2778_v44 = vpop.f32.mrf.mxu3 }
  0xb4   : > { %664 = vmatmul.f32.gmra.mxu1 %v2733_v45  ;;  %v2781_v46 = vpop.f32.mrf.mxu1 }
  0xb6   : > { %877 = vmatmul.f32.gmra.mxu3 %v2776_v41  ;;  %989 = vmatmul.f32.gmra.mxu0 %v2157_v33 }
  0xb9   : > { %v2790_v51 = vpop.f32.mrf.mxu2 }
  0xbb   : > { %765 = vmatmul.f32.gmra.mxu2 %v2788_v50 }
  0xbc   : > { %667 = vmatmul.f32.gmra.mxu1 %v2755_v59  ;;  %v2796_v54 = vpop.f32.mrf.mxu3 }
  0xbd   : > { %v2798_v55 = vpop.f32.mrf.mxu1 }
  0xbe   : > { %880 = vmatmul.f32.gmra.mxu3 %v2793_v53  ;;  %992 = vmatmul.f32.gmra.mxu0 %v2192_v49 }
  0xbf   : > { %v567_v33 = vpop.f32.mrf.mxu0 }
  0xc2   : > { %v2802_v56 = vpop.f32.mrf.mxu2 }
  0xc3   : > { %768 = vmatmul.f32.gmra.mxu2 %v2735_v19 }
  0xc4   : > { %670 = vmatmul.f32.gmra.mxu1 %v2776_v41 }
  0xc6   : > { %883 = vmatmul.f32.gmra.mxu3 %v2805_v58  ;;  %995 = vmatmul.f32.gmra.mxu0 %v2232_v2  ;;  %v2810_v60 = vpop.f32.mrf.mxu3 }
  0xc7   : > { %v2812_v61 = vpop.f32.mrf.mxu1 }
  0xc9   : > { %v570_v49 = vpop.f32.mrf.mxu0 }
  0xcb   : > { %771 = vmatmul.f32.gmra.mxu2 %v2814_v62 }
  0xcc   : > { %673 = vmatmul.f32.gmra.mxu1 %v2793_v53  ;;  %v2820_v1 = vpop.f32.mrf.mxu2 }
  0xce   : > { %886 = vmatmul.f32.gmra.mxu3 %v2817_v28  ;;  %998 = vmatmul.f32.gmra.mxu0 %v2713_v10 }
  0xd0   : > { %v2824_v2 = vpop.f32.mrf.mxu3 }
  0xd1   : > { %v629_v7 = vpop.f32.mrf.mxu1 }
  0xd2   : > { %v630_v14 = vadd.f32 %v629_v7, %v564_v6  ;;  %v1254_v6 = vld [vmem:[#allocation3 + $0x30] sm:$0xff] }
  0xd3   : > { %v573_v9 = vpop.f32.mrf.mxu0  ;;  %1186 = vmatmul.f32.vlgmr.msra.gmra.mxu2 %v2545_v3 }
  0xd4   : > { %1071 = vmatmul.f32.vlgmr.msra.gmra.mxu1 %v2424_v11 }
  0xd6   : > { %1001 = vmatmul.f32.gmra.mxu0 %v2716_v12  ;;  %1301 = vmatmul.f32.vlgmr.msra.gmra.mxu3 %v1252_v13  ;;  %v727_v18 = vpop.f32.mrf.mxu2 }
  0xd7   : > { %v775_v21 = vadd.f32 %v727_v18, %v630_v14  ;;  %v1945_v18 = vld [vmem:[#allocation3 + $0x38] sm:$0xff] }
  0xd9   : > { %v632_v22 = vpop.f32.mrf.mxu1  ;;  %v842_v24 = vpop.f32.mrf.mxu3 }
  0xda   : > { %v2829_v25 = vadd.f32 %v842_v24, %v775_v21  ;;  %v633_v3 = vadd.f32 %v632_v22, %v567_v33 }
  0xdb   : > { %v2831_v27 = vpop.f32.mrf.mxu0  ;;  %1189 = vmatmul.f32.gmra.mxu2 %v2573_v43 }
  0xdc   : > { %1074 = vmatmul.f32.gmra.mxu1 %v2570_v17 }
  0xde   : > { %1304 = vmatmul.f32.gmra.mxu3 %v1253_v29  ;;  %1416 = vmatmul.f32.vlgmr.msra.gmra.mxu0 %v2467_v31  ;;  %v730_v11 = vpop.f32.mrf.mxu2 }
  0xdf   : > { %v776_v35 = vadd.f32 %v730_v11, %v633_v3  ;;  %v1256_v3 = vld [vmem:[#allocation3 + $0x40] sm:$0xff] }
  0xe1   : > { %v635_v36 = vpop.f32.mrf.mxu1  ;;  %v845_v37 = vpop.f32.mrf.mxu3 }
  0xe2   : > { %v2836_v38 = vadd.f32 %v845_v37, %v776_v35  ;;  %v636_v43 = vadd.f32 %v635_v36, %v570_v49 }
  0xe3   : > { %v2838_v4 = vpop.f32.mrf.mxu0  ;;  %1192 = vmatmul.f32.gmra.mxu2 %v2590_v23 }
  0xe4   : > { %1077 = vmatmul.f32.gmra.mxu1 %v2467_v31 }
  0xe6   : > { %1307 = vmatmul.f32.gmra.mxu3 %v1254_v6  ;;  %1419 = vmatmul.f32.gmra.mxu0 %v2609_v34  ;;  %v733_v17 = vpop.f32.mrf.mxu2 }
  0xe7   : > { %v777_v48 = vadd.f32 %v733_v17, %v636_v43 }
  0xe9   : > { %v638_v33 = vpop.f32.mrf.mxu1  ;;  %v848_v7 = vpop.f32.mrf.mxu3 }
  0xea   : > { %v2843_v13 = vadd.f32 %v848_v7, %v777_v48  ;;  %v639_v23 = vadd.f32 %v638_v33, %v573_v9  ;;  %v1258_v7 = vld [vmem:[#allocation3 + $0x50] sm:$0xff] }
  0xeb   : > { %v2845_v14 = vpop.f32.mrf.mxu0  ;;  %1195 = vmatmul.f32.gmra.mxu2 %v2612_v26 }
  0xec   : > { %1080 = vmatmul.f32.gmra.mxu1 %v2609_v34 }
  0xee   : > { %1310 = vmatmul.f32.gmra.mxu3 %v1945_v18  ;;  %1422 = vmatmul.f32.gmra.mxu0 %v2547_v5  ;;  %v736_v31 = vpop.f32.mrf.mxu2 }
  0xef   : > { %v778_v49 = vadd.f32 %v736_v31, %v639_v23 }
  0xf1   : > { %v641_v21 = vpop.f32.mrf.mxu1  ;;  %v851_v22 = vpop.f32.mrf.mxu3 }
  0xf2   : > { %v2850_v24 = vadd.f32 %v851_v22, %v778_v49  ;;  %v642_v34 = vadd.f32 %v641_v21, %v2757_v32 }
  0xf3   : > { %v2852_v29 = vpop.f32.mrf.mxu0  ;;  %1198 = vmatmul.f32.gmra.mxu2 %v2630_v39  ;;  %v1257_v39 = vld [vmem:[#allocation3 + $0x48] sm:$0xff] }
  0xf4   : > { %1083 = vmatmul.f32.gmra.mxu1 %v2547_v5 }
  0xf6   : > { %1313 = vmatmul.f32.gmra.mxu3 %v1256_v3  ;;  %1425 = vmatmul.f32.gmra.mxu0 %v2649_v47  ;;  %v739_v26 = vpop.f32.mrf.mxu2 }
  0xf7   : > { %v779_v9 = vadd.f32 %v739_v26, %v642_v34 }
  0xf9   : > { %v644_v11 = vpop.f32.mrf.mxu1  ;;  %v854_v35 = vpop.f32.mrf.mxu3 }
  0xfa   : > { %v2858_v36 = vadd.f32 %v854_v35, %v779_v9  ;;  %v645_v5 = vadd.f32 %v644_v11, %v2781_v46  ;;  %v347_v9 = vld [vmem:[%s345_s6 + $0x8] sm:$0xff] }
  0xfb   : > { %v2860_v37 = vpop.f32.mrf.mxu0  ;;  %1201 = vmatmul.f32.gmra.mxu2 %v2652_v57 }
  0xfc   : > { %1086 = vmatmul.f32.gmra.mxu1 %v2649_v47 }
  0xfe   : > { %1316 = vmatmul.f32.gmra.mxu3 %v1257_v39  ;;  %1428 = vmatmul.f32.gmra.mxu0 %v2592_v15  ;;  %v742_v32 = vpop.f32.mrf.mxu2  ;;  %v349_v39 = vmul.f32 %v2696_v63, %v347_v9 }
  0xff   : > { %v780_v6 = vadd.f32 %v742_v32, %v645_v5 }
 0x101   : > { %v647_v43 = vpop.f32.mrf.mxu1  ;;  %v857_v17 = vpop.f32.mrf.mxu3 }
 0x102   : > { %v2866_v48 = vadd.f32 %v857_v17, %v780_v6  ;;  %v648_v47 = vadd.f32 %v647_v43, %v2798_v55  ;;  %v359_v43 = vstv %s358_s7 }
 0x103   : > { %v2868_v33 = vpop.f32.mrf.mxu0  ;;  %1204 = vmatmul.f32.gmra.mxu2 %v2670_v52 }
 0x104   : > { %1089 = vmatmul.f32.gmra.mxu1 %v2592_v15  ;;  %v1259_v15 = vld [vmem:[#allocation3 + $0x58] sm:$0xff] }
 0x106   : > { %1319 = vmatmul.f32.gmra.mxu3 %v1258_v7  ;;  %1431 = vmatmul.f32.gmra.mxu0 %v2689_v0  ;;  %v745_v57 = vpop.f32.mrf.mxu2 }
 0x107   : > { %v781_v46 = vadd.f32 %v745_v57, %v648_v47  ;;  %v1261_v47 = vld [vmem:[#allocation3 + $0x68] sm:$0xff] }
 0x109   : > { %v650_v23 = vpop.f32.mrf.mxu1  ;;  %v860_v18 = vpop.f32.mrf.mxu3 }
 0x10a   : > { %v2875_v31 = vadd.f32 %v860_v18, %v781_v46  ;;  %v651_v52 = vadd.f32 %v650_v23, %v2812_v61  ;;  %v346_v61 = vld [vmem:[%s345_s6] sm:$0xff]  ;;  %v449_v23 = vld [vmem:[#allocation3 + $0x89] sm:$0x7f] }
 0x10b   : > { %v2877_v49 = vpop.f32.mrf.mxu0  ;;  %1207 = vmatmul.f32.gmra.mxu2 %v2701_v8  ;;  %v1260_v8 = vld [vmem:[#allocation3 + $0x60] sm:$0xff]  ;;  %v348_v35 = vmul.f32 %v2696_v63, %v346_v61  ;;  %469 = vst [vmem:[#allocation4 + $0x88] sm:$0x7f] %v449_v23 }
 0x10c   : > { %1092 = vmatmul.f32.gmra.mxu1 %v2689_v0  ;;  %v2907_v46 = vld [vmem:[#allocation3 + $0x81] sm:$0xff] }
 0x10d   : > { %v350_v32 = vadd.f32 %v2710_v20, %v348_v35 }
 0x10e   : > { %1322 = vmatmul.f32.gmra.mxu3 %v1259_v15  ;;  %1434 = vmatmul.f32.gmra.mxu0 %v2632_v42  ;;  %v748_v55 = vpop.f32.mrf.mxu2 }
 0x10f   : > { %v782_v21 = vadd.f32 %v748_v55, %v651_v52  ;;  %v2897_v17 = vmul.f32 %v359_v43, %v350_v32 }
 0x111   : > { %v653_v22 = vpop.f32.mrf.mxu1  ;;  %v863_v3 = vpop.f32.mrf.mxu3  ;;  %380 = vst [vmem:[#allocation3 + $0x90] sm:$0xff] %v2897_v17 }
 0x112   : > { %v2884_v34 = vadd.f32 %v863_v3, %v782_v21  ;;  %v654_v0 = vadd.f32 %v653_v22, %v2773_v40  ;;  %420 = vst [vmem:[#allocation2 + $0x91] sm:$0xff] %v2897_v17 }
 0x113   : > { %v2887_v26 = vpop.f32.mrf.mxu0  ;;  %1210 = vmatmul.f32.gmra.mxu2 %v2733_v45  ;;  %v351_v45 = vadd.f32 %v2710_v20, %v349_v39 }
 0x114   : > { %1095 = vmatmul.f32.gmra.mxu1 %v2632_v42 }
 0x115   : > { %v2904_v63 = vmul.f32 %v359_v43, %v351_v45 }
 0x116   : > { %1325 = vmatmul.f32.gmra.mxu3 %v1260_v8  ;;  %1437 = vmatmul.f32.gmra.mxu0 %v2752_v30  ;;  %v751_v11 = vpop.f32.mrf.mxu2 }
 0x117   : > { %v783_v5 = vadd.f32 %v751_v11, %v654_v0  ;;  %381 = vst [vmem:[#allocation3 + $0x98] sm:$0xff] %v2904_v63 }
 0x119   : > { %v656_v6 = vpop.f32.mrf.mxu1  ;;  %v866_v42 = vpop.f32.mrf.mxu3 }
 0x11a   : > { %v898_v40 = vadd.f32 %v866_v42, %v783_v5  ;;  %v657_v20 = vadd.f32 %v656_v6, %v2790_v51  ;;  %v1262_v51 = vld [vmem:[#allocation3 + $0x70] sm:$0xff] }
 0x11b   : > { %v981_v7 = vpop.f32.mrf.mxu0  ;;  %1213 = vmatmul.f32.gmra.mxu2 %v2755_v59 }
 0x11c   : > { %v2900_v57 = vadd.f32 %v981_v7, %v898_v40  ;;  %1098 = vmatmul.f32.gmra.mxu1 %v2752_v30 }
 0x11e   : > { %1328 = vmatmul.f32.gmra.mxu3 %v1261_v47  ;;  %1440 = vmatmul.f32.gmra.mxu0 %v2672_v16  ;;  %v754_v59 = vpop.f32.mrf.mxu2  ;;  %v401_v0 = vld [vmem:[#allocation3 + $0x98] sm:$0x7f] }
 0x11f   : > { %v784_v18 = vadd.f32 %v754_v59, %v657_v20  ;;  %421 = vst [vmem:[#allocation2 + $0x99] sm:$0x7f] %v401_v0  ;;  %v451_v5 = vld [vmem:[#allocation3 + $0x99] sm:$0x7f] }
 0x120   : > { %471 = vst [vmem:[#allocation4 + $0x98] sm:$0x7f] %v451_v5 }
 0x121   : > { %v659_v30 = vpop.f32.mrf.mxu1  ;;  %v869_v15 = vpop.f32.mrf.mxu3 }
 0x122   : > { %v899_v52 = vadd.f32 %v869_v15, %v784_v18  ;;  %v660_v22 = vadd.f32 %v659_v30, %v2802_v56  ;;  %v450_v56 = vld [vmem:[#allocation3 + $0x91] sm:$0xff] }
 0x123   : > { %v984_v55 = vpop.f32.mrf.mxu0  ;;  %1216 = vmatmul.f32.gmra.mxu2 %v2776_v41  ;;  %v1263_v41 = vld [vmem:[#allocation3 + $0x78] sm:$0xff] }
 0x124   : > { %v2913_v21 = vadd.f32 %v984_v55, %v899_v52  ;;  %1101 = vmatmul.f32.gmra.mxu1 %v2672_v16 }
 0x126   : > { %1331 = vmatmul.f32.gmra.mxu3 %v1262_v51  ;;  %1443 = vmatmul.f32.gmra.mxu0 %v2788_v50  ;;  %v757_v3 = vpop.f32.mrf.mxu2 }
 0x127   : > { %v785_v8 = vadd.f32 %v757_v3, %v660_v22  ;;  %v1152_v22 = vld [vmem:[#allocation2 + $0x98] sm:$0xff] }
 0x129   : > { %v662_v61 = vpop.f32.mrf.mxu1  ;;  %v872_v9 = vpop.f32.mrf.mxu3 }
 0x12a   : > { %v900_v11 = vadd.f32 %v872_v9, %v785_v8  ;;  %v663_v16 = vadd.f32 %v662_v61, %v2820_v1 }
 0x12b   : > { %v987_v35 = vpop.f32.mrf.mxu0  ;;  %1219 = vmatmul.f32.gmra.mxu2 %v2793_v53 }
 0x12c   : > { %v2919_v39 = vadd.f32 %v987_v35, %v900_v11  ;;  %1104 = vmatmul.f32.gmra.mxu1 %v2788_v50 }
 0x12e   : > { %1334 = vmatmul.f32.gmra.mxu3 %v1263_v41  ;;  %1446 = vmatmul.f32.gmra.mxu0 %v2735_v19  ;;  %v760_v32 = vpop.f32.mrf.mxu2 }
 0x12f   : > { %v786_v45 = vadd.f32 %v760_v32, %v663_v16  ;;  %v1005_v16 = vadd.f32 %v2831_v27, %v2829_v25  ;;  %v1382_v32 = vld [vmem:[#allocation4 + $0x98] sm:$0xff] }
 0x131   : > { %v665_v6 = vpop.f32.mrf.mxu1  ;;  %v875_v42 = vpop.f32.mrf.mxu3 }
 0x132   : > { %v901_v43 = vadd.f32 %v875_v42, %v786_v45  ;;  %v666_v50 = vadd.f32 %v665_v6, %v2778_v44 }
 0x133   : > { %v990_v40 = vpop.f32.mrf.mxu0  ;;  %1222 = vmatmul.f32.gmra.mxu2 %v2805_v58  ;;  %v1151_v58 = vld [vmem:[#allocation2 + $0x90] sm:$0xff] }
 0x134   : > { %v2925_v53 = vadd.f32 %v990_v40, %v901_v43  ;;  %1107 = vmatmul.f32.gmra.mxu1 %v2735_v19  ;;  %v1006_v40 = vadd.f32 %v2838_v4, %v2836_v38 }
 0x136   : > { %1337 = vmatmul.f32.gmra.mxu3 %v2713_v10  ;;  %1449 = vmatmul.f32.gmra.mxu0 %v2814_v62  ;;  %v763_v1 = vpop.f32.mrf.mxu2 }
 0x137   : > { %v787_v7 = vadd.f32 %v763_v1, %v666_v50 }
 0x139   : > { %v668_v47 = vpop.f32.mrf.mxu1  ;;  %v878_v20 = vpop.f32.mrf.mxu3 }
 0x13a   : > { %v902_v23 = vadd.f32 %v878_v20, %v787_v7  ;;  %v669_v19 = vadd.f32 %v668_v47, %v2796_v54 }
 0x13b   : > { %v993_v59 = vpop.f32.mrf.mxu0  ;;  %1225 = vmatmul.f32.gmra.mxu2 %v2817_v28  ;;  %v1380_v28 = vld [vmem:[#allocation4 + $0x88] sm:$0xff] }
 0x13c   : > { %v2932_v18 = vadd.f32 %v993_v59, %v902_v23  ;;  %1110 = vmatmul.f32.gmra.mxu1 %v2814_v62  ;;  %v1007_v59 = vadd.f32 %v2845_v14, %v2843_v13 }
 0x13e   : > { %1340 = vmatmul.f32.gmra.mxu3 %v2716_v12  ;;  %1452 = vmatmul.f32.gmra.mxu0 %v2907_v46  ;;  %v766_v10 = vpop.f32.mrf.mxu2 }
 0x13f   : > { %v788_v44 = vadd.f32 %v766_v10, %v669_v19 }
 0x141   : > { %v671_v30 = vpop.f32.mrf.mxu1  ;;  %v881_v15 = vpop.f32.mrf.mxu3 }
 0x142   : > { %v903_v52 = vadd.f32 %v881_v15, %v788_v44  ;;  %v672_v54 = vadd.f32 %v671_v30, %v2810_v60 }
 0x143   : > { %v996_v55 = vpop.f32.mrf.mxu0  ;;  %1228 = vmatmul.f32.gmra.mxu2 %v1151_v58 }
 0x144   : > { %v2938_v51 = vadd.f32 %v996_v55, %v903_v52  ;;  %1113 = vmatmul.f32.gmra.mxu1 %v2907_v46 }
 0x146   : > { %1343 = vmatmul.f32.gmra.mxu3 %v2897_v17  ;;  %1455 = vmatmul.f32.gmra.mxu0 %v1380_v28  ;;  %v769_v12 = vpop.f32.mrf.mxu2 }
 0x147   : > { %v789_v62 = vadd.f32 %v769_v12, %v672_v54  ;;  %v1008_v12 = vadd.f32 %v2852_v29, %v2850_v24 }
 0x149   : > { %v674_v3 = vpop.f32.mrf.mxu1  ;;  %v884_v8 = vpop.f32.mrf.mxu3 }
 0x14a   : > { %v904_v0 = vadd.f32 %v884_v8, %v789_v62  ;;  %v675_v46 = vadd.f32 %v674_v3, %v2824_v2 }
 0x14b   : > { %v999_v61 = vpop.f32.mrf.mxu0  ;;  %1231 = vmatmul.f32.gmra.mxu2 %v1152_v22 }
 0x14c   : > { %v2944_v9 = vadd.f32 %v999_v61, %v904_v0  ;;  %1116 = vmatmul.f32.gmra.mxu1 %v1380_v28 }
 0x14e   : > { %1346 = vmatmul.f32.gmra.mxu3 %v2904_v63  ;;  %1458 = vmatmul.f32.gmra.mxu0 %v450_v56  ;;  %v772_v60 = vpop.f32.mrf.mxu2 }
 0x14f   : > { %v790_v17 = vadd.f32 %v772_v60, %v675_v46 }
 0x151   : > { %v887_v11 = vpop.f32.mrf.mxu3  ;;  %v1072_v35 = vpop.f32.mrf.mxu1 }
 0x152   : > { %v905_v41 = vadd.f32 %v887_v11, %v790_v17  ;;  %v1120_v6 = vadd.f32 %v1072_v35, %v1005_v16  ;;  %v1009_v11 = vadd.f32 %v2860_v37, %v2858_v36 }
 0x153   : > { %v1002_v5 = vpop.f32.mrf.mxu0 }
 0x154   : > { %v2952_v45 = vadd.f32 %v1002_v5, %v905_v41 }
 0x156   : > { %1461 = vmatmul.f32.gmra.mxu0 %v1382_v32  ;;  %v1187_v2 = vpop.f32.mrf.mxu2 }
 0x157   : > { %v1235_v63 = vadd.f32 %v1187_v2, %v1120_v6 }
 0x159   : > { %v1075_v56 = vpop.f32.mrf.mxu1  ;;  %v1302_v42 = vpop.f32.mrf.mxu3 }
 0x15a   : > { %v1350_v43 = vadd.f32 %v1302_v42, %v1235_v63  ;;  %v1121_v50 = vadd.f32 %v1075_v56, %v1006_v40  ;;  %v1010_v42 = vadd.f32 %v2868_v33, %v2866_v48 }
 0x15b   : > { %v1417_v25 = vpop.f32.mrf.mxu0 }
 0x15c   : > { %v1465_v27 = vadd.f32 %v1417_v25, %v1350_v43 }
 0x15e   : > { %1481 = vst [vmem:[%s2959_s12] sm:$0xff] %v1465_v27  ;;  %v1190_v1 = vpop.f32.mrf.mxu2  ;;  %v1518_v10 = vmul.f32 %v1465_v27, %v1465_v27 }
 0x15f   : > { %v1236_v7 = vadd.f32 %v1190_v1, %v1121_v50 }
 0x161   : > { %v1078_v47 = vpop.f32.mrf.mxu1  ;;  %v1305_v20 = vpop.f32.mrf.mxu3 }
 0x162   : > { %v1351_v23 = vadd.f32 %v1305_v20, %v1236_v7  ;;  %v1122_v19 = vadd.f32 %v1078_v47, %v1007_v59 }
 0x163   : > { %v1420_v38 = vpop.f32.mrf.mxu0 }
 0x164   : > { %v1466_v4 = vadd.f32 %v1420_v38, %v1351_v23  ;;  %v1011_v23 = vadd.f32 %v2877_v49, %v2875_v31 }
 0x166   : > { %1482 = vst [vmem:[%s2959_s12 + $0x8] sm:$0xff] %v1466_v4  ;;  %v1497_v44 = vadd.f32 %v1466_v4, %v1465_v27  ;;  %v1519_v58 = vmul.f32 %v1466_v4, %v1466_v4  ;;  %v1193_v30 = vpop.f32.mrf.mxu2 }
 0x167   : > { %v1237_v15 = vadd.f32 %v1193_v30, %v1122_v19 }
 0x168   : > { %v1534_v52 = vadd.f32 %v1519_v58, %v1518_v10 }
 0x169   : > { %v1081_v55 = vpop.f32.mrf.mxu1  ;;  %v1308_v28 = vpop.f32.mrf.mxu3 }
 0x16a   : > { %v1352_v54 = vadd.f32 %v1308_v28, %v1237_v15  ;;  %v1123_v14 = vadd.f32 %v1081_v55, %v1008_v12 }
 0x16b   : > { %v1423_v62 = vpop.f32.mrf.mxu0 }
 0x16c   : > { %v1467_v13 = vadd.f32 %v1423_v62, %v1352_v54 }
 0x16e   : > { %1483 = vst [vmem:[%s2959_s12 + $0x10] sm:$0xff] %v1467_v13  ;;  %v1498_v22 = vadd.f32 %v1497_v44, %v1467_v13  ;;  %v1520_v3 = vmul.f32 %v1467_v13, %v1467_v13  ;;  %v1196_v8 = vpop.f32.mrf.mxu2 }
 0x16f   : > { %v1238_v0 = vadd.f32 %v1196_v8, %v1123_v14 }
 0x170   : > { %v1535_v61 = vadd.f32 %v1534_v52, %v1520_v3  ;;  %v1012_v52 = vadd.f32 %v2887_v26, %v2884_v34 }
 0x171   : > { %v1084_v46 = vpop.f32.mrf.mxu1  ;;  %v1311_v60 = vpop.f32.mrf.mxu3 }
 0x172   : > { %v1353_v17 = vadd.f32 %v1311_v60, %v1238_v0  ;;  %v1124_v24 = vadd.f32 %v1084_v46, %v1009_v11 }
 0x173   : > { %v1426_v35 = vpop.f32.mrf.mxu0 }
 0x174   : > { %v1468_v41 = vadd.f32 %v1426_v35, %v1353_v17 }
 0x176   : > { %1484 = vst [vmem:[%s2959_s12 + $0x18] sm:$0xff] %v1468_v41  ;;  %v1499_v29 = vadd.f32 %v1498_v22, %v1468_v41  ;;  %v1521_v16 = vmul.f32 %v1468_v41, %v1468_v41  ;;  %v1199_v5 = vpop.f32.mrf.mxu2 }
 0x177   : > { %v1239_v32 = vadd.f32 %v1199_v5, %v1124_v24 }
 0x178   : > { %v1536_v6 = vadd.f32 %v1535_v61, %v1521_v16 }
 0x179   : > { %v1087_v2 = vpop.f32.mrf.mxu1  ;;  %v1314_v63 = vpop.f32.mrf.mxu3 }
 0x17a   : > { %v1354_v56 = vadd.f32 %v1314_v63, %v1239_v32  ;;  %v1125_v36 = vadd.f32 %v1087_v2, %v1010_v42 }
 0x17b   : > { %v1429_v43 = vpop.f32.mrf.mxu0 }
 0x17c   : > { %v1469_v40 = vadd.f32 %v1429_v43, %v1354_v56 }
 0x17e   : > { %1485 = vst [vmem:[%s2959_s12 + $0x20] sm:$0xff] %v1469_v40  ;;  %v1500_v37 = vadd.f32 %v1499_v29, %v1469_v40  ;;  %v1522_v25 = vmul.f32 %v1469_v40, %v1469_v40  ;;  %v1202_v27 = vpop.f32.mrf.mxu2 }
 0x17f   : > { %v1240_v50 = vadd.f32 %v1202_v27, %v1125_v36 }
 0x180   : > { %v1537_v1 = vadd.f32 %v1536_v6, %v1522_v25 }
 0x181   : > { %v1090_v7 = vpop.f32.mrf.mxu1  ;;  %v1317_v47 = vpop.f32.mrf.mxu3 }
 0x182   : > { %v1355_v20 = vadd.f32 %v1317_v47, %v1240_v50  ;;  %v1126_v48 = vadd.f32 %v1090_v7, %v1011_v23 }
 0x183   : > { %v1432_v59 = vpop.f32.mrf.mxu0 }
 0x184   : > { %v1470_v38 = vadd.f32 %v1432_v59, %v1355_v20 }
 0x186   : > { %1486 = vst [vmem:[%s2959_s12 + $0x28] sm:$0xff] %v1470_v38  ;;  %v1501_v33 = vadd.f32 %v1500_v37, %v1470_v38  ;;  %v1523_v4 = vmul.f32 %v1470_v38, %v1470_v38  ;;  %v1205_v19 = vpop.f32.mrf.mxu2 }
 0x187   : > { %v1241_v10 = vadd.f32 %v1205_v19, %v1126_v48 }
 0x188   : > { %v1538_v44 = vadd.f32 %v1537_v1, %v1523_v4 }
 0x189   : > { %v1093_v58 = vpop.f32.mrf.mxu1  ;;  %v1320_v30 = vpop.f32.mrf.mxu3 }
 0x18a   : > { %v1356_v15 = vadd.f32 %v1320_v30, %v1241_v10  ;;  %v1127_v31 = vadd.f32 %v1093_v58, %v1012_v52 }
 0x18b   : > { %v1435_v55 = vpop.f32.mrf.mxu0 }
 0x18c   : > { %v1471_v28 = vadd.f32 %v1435_v55, %v1356_v15 }
 0x18e   : > { %1487 = vst [vmem:[%s2959_s12 + $0x30] sm:$0xff] %v1471_v28  ;;  %v1502_v49 = vadd.f32 %v1501_v33, %v1471_v28  ;;  %v1524_v54 = vmul.f32 %v1471_v28, %v1471_v28  ;;  %v1208_v12 = vpop.f32.mrf.mxu2 }
 0x18f   : > { %v1242_v62 = vadd.f32 %v1208_v12, %v1127_v31 }
 0x190   : > { %v1539_v13 = vadd.f32 %v1538_v44, %v1524_v54 }
 0x191   : > { %v1096_v14 = vpop.f32.mrf.mxu1  ;;  %v1323_v22 = vpop.f32.mrf.mxu3 }
 0x192   : > { %v1357_v3 = vadd.f32 %v1323_v22, %v1242_v62  ;;  %v1128_v61 = vadd.f32 %v1096_v14, %v2900_v57 }
 0x193   : > { %v1438_v8 = vpop.f32.mrf.mxu0 }
 0x194   : > { %v1472_v0 = vadd.f32 %v1438_v8, %v1357_v3 }
 0x196   : > { %1488 = vst [vmem:[%s2959_s12 + $0x38] sm:$0xff] %v1472_v0  ;;  %v1503_v34 = vadd.f32 %v1502_v49, %v1472_v0  ;;  %v1525_v26 = vmul.f32 %v1472_v0, %v1472_v0  ;;  %v1211_v46 = vpop.f32.mrf.mxu2 }
 0x197   : > { %v1243_v60 = vadd.f32 %v1211_v46, %v1128_v61 }
 0x198   : > { %v1540_v17 = vadd.f32 %v1539_v13, %v1525_v26 }
 0x199   : > { %v1099_v11 = vpop.f32.mrf.mxu1  ;;  %v1326_v35 = vpop.f32.mrf.mxu3 }
 0x19a   : > { %v1358_v41 = vadd.f32 %v1326_v35, %v1243_v60  ;;  %v1129_v16 = vadd.f32 %v1099_v11, %v2913_v21 }
 0x19b   : > { %v1441_v24 = vpop.f32.mrf.mxu0 }
 0x19c   : > { %v1473_v29 = vadd.f32 %v1441_v24, %v1358_v41 }
 0x19e   : > { %1489 = vst [vmem:[%s2959_s12 + $0x40] sm:$0xff] %v1473_v29  ;;  %v1504_v5 = vadd.f32 %v1503_v34, %v1473_v29  ;;  %v1526_v32 = vmul.f32 %v1473_v29, %v1473_v29  ;;  %v1214_v6 = vpop.f32.mrf.mxu2 }
 0x19f   : > { %v1244_v2 = vadd.f32 %v1214_v6, %v1129_v16 }
 0x1a0   : > { %v1541_v57 = vadd.f32 %v1540_v17, %v1526_v32 }
 0x1a1   : > { %v1102_v63 = vpop.f32.mrf.mxu1  ;;  %v1329_v56 = vpop.f32.mrf.mxu3 }
 0x1a2   : > { %v1359_v42 = vadd.f32 %v1329_v56, %v1244_v2  ;;  %v1130_v36 = vadd.f32 %v1102_v63, %v2919_v39 }
 0x1a3   : > { %v1444_v43 = vpop.f32.mrf.mxu0 }
 0x1a4   : > { %v1474_v40 = vadd.f32 %v1444_v43, %v1359_v42 }
 0x1a6   : > { %1490 = vst [vmem:[%s2959_s12 + $0x48] sm:$0xff] %v1474_v40  ;;  %v1505_v37 = vadd.f32 %v1504_v5, %v1474_v40  ;;  %v1527_v25 = vmul.f32 %v1474_v40, %v1474_v40  ;;  %v1217_v27 = vpop.f32.mrf.mxu2 }
 0x1a7   : > { %v1245_v50 = vadd.f32 %v1217_v27, %v1130_v36 }
 0x1a8   : > { %v1542_v21 = vadd.f32 %v1541_v57, %v1527_v25 }
 0x1a9   : > { %v1105_v1 = vpop.f32.mrf.mxu1  ;;  %v1332_v7 = vpop.f32.mrf.mxu3 }
 0x1aa   : > { %v1360_v47 = vadd.f32 %v1332_v7, %v1245_v50  ;;  %v1131_v59 = vadd.f32 %v1105_v1, %v2925_v53 }
 0x1ab   : > { %v1447_v20 = vpop.f32.mrf.mxu0 }
 0x1ac   : > { %v1475_v23 = vadd.f32 %v1447_v20, %v1360_v47 }
 0x1ae   : > { %1491 = vst [vmem:[%s2959_s12 + $0x50] sm:$0xff] %v1475_v23  ;;  %v1506_v38 = vadd.f32 %v1505_v37, %v1475_v23  ;;  %v1528_v48 = vmul.f32 %v1475_v23, %v1475_v23  ;;  %v1220_v33 = vpop.f32.mrf.mxu2 }
 0x1af   : > { %v1246_v4 = vadd.f32 %v1220_v33, %v1131_v59 }
 0x1b0   : > { %v1543_v39 = vadd.f32 %v1542_v21, %v1528_v48 }
 0x1b1   : > { %v1108_v19 = vpop.f32.mrf.mxu1  ;;  %v1335_v10 = vpop.f32.mrf.mxu3 }
 0x1b2   : > { %v1361_v44 = vadd.f32 %v1335_v10, %v1246_v4  ;;  %v1132_v15 = vadd.f32 %v1108_v19, %v2932_v18 }
 0x1b3   : > { %v1450_v58 = vpop.f32.mrf.mxu0 }
 0x1b4   : > { %v1476_v30 = vadd.f32 %v1450_v58, %v1361_v44 }
 0x1b6   : > { %1492 = vst [vmem:[%s2959_s12 + $0x58] sm:$0xff] %v1476_v30  ;;  %v1507_v52 = vadd.f32 %v1506_v38, %v1476_v30  ;;  %v1529_v55 = vmul.f32 %v1476_v30, %v1476_v30  ;;  %v1223_v28 = vpop.f32.mrf.mxu2 }
 0x1b7   : > { %v1247_v31 = vadd.f32 %v1223_v28, %v1132_v15 }
 0x1b8   : > { %v1544_v53 = vadd.f32 %v1543_v39, %v1529_v55 }
 0x1b9   : > { %v1111_v49 = vpop.f32.mrf.mxu1  ;;  %v1338_v54 = vpop.f32.mrf.mxu3 }
 0x1ba   : > { %v1362_v12 = vadd.f32 %v1338_v54, %v1247_v31  ;;  %v1133_v14 = vadd.f32 %v1111_v49, %v2938_v51 }
 0x1bb   : > { %v1453_v62 = vpop.f32.mrf.mxu0 }
 0x1bc   : > { %v1477_v13 = vadd.f32 %v1453_v62, %v1362_v12 }
 0x1be   : > { %1493 = vst [vmem:[%s2959_s12 + $0x60] sm:$0xff] %v1477_v13  ;;  %v1508_v22 = vadd.f32 %v1507_v52, %v1477_v13  ;;  %v1530_v3 = vmul.f32 %v1477_v13, %v1477_v13  ;;  %v1226_v8 = vpop.f32.mrf.mxu2 }
 0x1bf   : > { %v1248_v0 = vadd.f32 %v1226_v8, %v1133_v14 }
 0x1c0   : > { %v1545_v18 = vadd.f32 %v1544_v53, %v1530_v3 }
 0x1c1   : > { %v1114_v61 = vpop.f32.mrf.mxu1  ;;  %v1341_v34 = vpop.f32.mrf.mxu3 }
 0x1c2   : > { %v1363_v26 = vadd.f32 %v1341_v34, %v1248_v0  ;;  %v1134_v17 = vadd.f32 %v1114_v61, %v2944_v9 }
 0x1c3   : > { %v1456_v46 = vpop.f32.mrf.mxu0 }
 0x1c4   : > { %v1478_v60 = vadd.f32 %v1456_v46, %v1363_v26 }
 0x1c6   : > { %1494 = vst [vmem:[%s2959_s12 + $0x68] sm:$0xff] %v1478_v60  ;;  %v1509_v11 = vadd.f32 %v1508_v22, %v1478_v60  ;;  %v1531_v35 = vmul.f32 %v1478_v60, %v1478_v60  ;;  %v1229_v41 = vpop.f32.mrf.mxu2 }
 0x1c7   : > { %v1249_v24 = vadd.f32 %v1229_v41, %v1134_v17 }
 0x1c8   : > { %v1546_v51 = vadd.f32 %v1545_v18, %v1531_v35 }
 0x1c9   : > { %v1344_v29 = vpop.f32.mrf.mxu3  ;;  %v1117_v16 = vpop.f32.mrf.mxu1 }
 0x1ca   : > { %v1364_v5 = vadd.f32 %v1344_v29, %v1249_v24  ;;  %v1135_v2 = vadd.f32 %v1117_v16, %v2952_v45 }
 0x1cb   : > { %v1459_v32 = vpop.f32.mrf.mxu0 }
 0x1cc   : > { %v1479_v6 = vadd.f32 %v1459_v32, %v1364_v5 }
 0x1ce   : > { %1495 = vst [vmem:[%s2959_s12 + $0x70] sm:$0xff] %v1479_v6  ;;  %v1510_v57 = vadd.f32 %v1509_v11, %v1479_v6  ;;  %v1532_v63 = vmul.f32 %v1479_v6, %v1479_v6  ;;  %v1232_v9 = vpop.f32.mrf.mxu2 }
 0x1cf   : > { %v1250_v56 = vadd.f32 %v1232_v9, %v1135_v2 }
 0x1d0   : > { %v1547_v42 = vadd.f32 %v1546_v51, %v1532_v63 }
 0x1d1   : > { %v1347_v43 = vpop.f32.mrf.mxu3 }
 0x1d2   : > { %v1365_v40 = vadd.f32 %v1347_v43, %v1250_v56 }
 0x1d3   : > { %v1462_v36 = vpop.f32.mrf.mxu0 }
 0x1d4   : > { %v1480_v37 = vadd.f32 %v1462_v36, %v1365_v40 }
 0x1d6   : > { %1496 = vst [vmem:[%s2959_s12 + $0x78] sm:$0xff] %v1480_v37  ;;  %v1511_v25 = vadd.f32 %v1510_v57, %v1480_v37  ;;  %v1533_v27 = vmul.f32 %v1480_v37, %v1480_v37 }
 0x1d8   : > { %v1512_v50 = vrot.slane %v1511_v25, 4  ;;  %v1548_v21 = vadd.f32 %v1547_v42, %v1533_v27 }
 0x1da   : > { %v1513_v45 = vadd.f32 %v1512_v50, %v1511_v25  ;;  %v1549_v1 = vrot.slane %v1548_v21, 4 }
 0x1dc   : > { %v1514_v7 = vrot.slane %v1513_v45, 2  ;;  %v1550_v47 = vadd.f32 %v1549_v1, %v1548_v21 }
 0x1de   : > { %v1515_v20 = vadd.f32 %v1514_v7, %v1513_v45  ;;  %v1551_v23 = vrot.slane %v1550_v47, 2 }
 0x1e0   : > { %v1516_v59 = vrot.slane %v1515_v20, 1  ;;  %v1552_v38 = vadd.f32 %v1551_v23, %v1550_v47 }
 0x1e2   : > { %v1553_v48 = vrot.slane %v1552_v38, 1  ;;  %v1517_v33 = vadd.f32 %v1516_v59, %v1515_v20 }
 0x1e4   : > { %v1554_v4 = vadd.f32 %v1553_v48, %v1552_v38 }
 0x1e6   : > { %v1556_v39 = vsel %vm1555_vm0, %v1517_v33, %v1554_v4 }
 0x1e7   : > { %1557 = vst [vmem:[%s270_s25] sm:$0x3] %v1556_v39 }
 0x1e8 PF: > { %s16_s22 = sadd.s32 1, %s1984_s22   ;;  %s3025_s18 = smov %s1976_s20 }
 0x1e9   : > { %p13_p12 = scmp.ge.s32.totalorder %s16_s22, 6   ;;  %s3026_s19 = smov %s1980_s21 }
 0x1ea   : > { %s3027_s20 = smov %s3030_s23  ;;  %s3028_s21 = smov %s3034_s24 }
 0x1eb   :  { %15 = sbr.rel (!%p13_p12) target bundleno = 3 (0x3), region = 95 }

// kernel: bn_block2d.4
= control target key start
LH: loop header
LB: loop body
LE: loop exit
PB: predicated region body
PF: predicated region fallthrough
CT: control target
= control target key end

     0   :  { %s2037_s18 = smov 0   ;;  %s2039_s19 = smov 0   ;;  %s3038_s0 = inlined_call_operand.vmem [shape: f32[2,16,16,128], index: 0, kind: input, shape index: {}]   ;;  %s3039_s1 = inlined_call_operand.vmem [shape: f32[1,128], index: 1, kind: input, shape index: {}]   ;;  %s3040_s2 = inlined_call_operand.vmem [shape: f32[1,128], index: 2, kind: input, shape index: {}]   ;;  %s3041_s3 = inlined_call_operand.vmem [shape: f32[9,128,128], index: 3, kind: input, shape index: {}]   ;;  %s3042_s4 = inlined_call_operand.vmem [shape: f32[2,16,16,128], index: 4, kind: output, shape index: {0}]   ;;  %s3043_s5 = inlined_call_operand.vmem [shape: f32[2,2,2,128], index: 5, kind: output, shape index: {1}]  }
   0x1   :  { %s2041_s20 = smov 0   ;;  %s2043_s21 = smov 0  }
   0x2   :  { %s2045_s22 = smov 0  }
   0x3 LB: > { %s25_s23 = sadd.s32 1, %s1996_s20  ;;  %s28_s24 = sadd.s32 1, %s2000_s21  ;;  %s2004_s22 = sphi %s2045_s22, %s16_s22   ;;  %s2000_s21 = sphi %s2043_s21, %s3048_s21   ;;  %s1996_s20 = sphi %s2041_s20, %s3047_s20   ;;  %s1992_s19 = sphi %s2039_s19, %s3046_s19   ;;  %s1988_s18 = sphi %s2037_s18, %s3045_s18  }
   0x4   : > { %p26_p0 = scmp.ge.s32.totalorder %s25_s23, 2  ;;  %p1725_p1 = scmp.ge.s32.totalorder %s2004_s22, 1 }
   0x5   : > { %p206_p2 = scmp.lt.s32.totalorder %s2004_s22, 5 }
   0x6   : > { %s3050_s23 = smov (%p26_p0, %s25_s23), 0  ;;  %s3052_s24 = smov (!%p26_p0, %s28_s24), %s2000_s21 }
   0x7   : > { %p207_p3 = pnand %p1725_p1, %p206_p2  ;;  %p30_p4 = scmp.ge.s32.totalorder %s3052_s24, 2 }
   0x8   : > { %p247_p5 = scmp.lt.s32.totalorder (!%p207_p3), %s1992_s19, 1  ;;  %s2076_s29 = sshll.u32 (!%p207_p3), %s1988_s18, 3 }
   0x9   : > { %s3054_s24 = smov (%p30_p4, %s3052_s24), 0  ;;  %210 = sbr.rel (%p207_p3) target bundleno = 488 (0x1e8), region = 36 }
   0xa   : > { %s1870_s7 = sshll.u32 (!%p207_p3), %s1988_s18, 7  ;;  %s1736_s8 = sadd.s32 (!%p207_p3), 4294967295, %s2076_s29 }
   0xb   : > { %p2089_p6 = scmp.gt.s32.totalorder (!%p207_p3), %s1736_s8, 0  ;;  %p372_p7 = scmp.eq.s32.totalorder (!%p207_p3), %s1988_s18, 0 }
   0xc   : > { %s359_s28 = sadd.s32 (!%p207_p3), 8, %s2076_s29  ;;  %p377_p9 = scmp.eq.s32.totalorder (!%p207_p3), %s1988_s18, 1 }
   0xd   : > { %p360_p8 = scmp.lt.s32.totalorder (!%p207_p3), %s359_s28, 15  ;;  %p255_p10 = scmp.lt.s32.totalorder (!%p207_p3), %s2076_s29, 15 }
   0xe   : > { %v1754_v0 = vld [vmem:[%s3041_s3 + $0xf8] sm:$0xff]  ;;  %v1753_v1 = vld [vmem:[%s3041_s3 + $0xf0] sm:$0xff]  ;;  %v1752_v2 = vld [vmem:[%s3041_s3 + $0xe8] sm:$0xff]  ;;  %s3056_s19 = smov (!%p247_p5, %s1992_s19), 1  ;;  %s3058_s8 = smov (!%p2089_p6, %s1736_s8), 0  ;;  %vm1575_vm0 = vcmask 1040384  }
   0xf   : > { %1871 = vmatpush.msra.mxu1 %v1754_v0  ;;  %1872 = vmatpush.msra.mxu2 %v1754_v0  ;;  %v1751_v3 = vld [vmem:[%s3041_s3 + $0xe0] sm:$0xff]  ;;  %s1869_s11 = sshll.u32 %s3056_s19, 8  ;;  %v1750_v5 = vld [vmem:[%s3041_s3 + $0xd8] sm:$0xff]  ;;  %v1749_v9 = vld [vmem:[%s3041_s3 + $0xd0] sm:$0xff]  ;;  %s3060_s28 = smov (!%p360_p8, %s359_s28), 15 }
  0x10   : > { %1873 = vmatpush.msra.mxu3 %v1754_v0  ;;  %567 = vmatpush.msra.mxu0 %v1754_v0  ;;  %s2096_s15 = scalar_lea.vmem %s3038_s0, %s1869_s11  ;;  %v2101_v4 = vld [vmem:[%s3039_s1] ss:$0 sm:$0xff]  ;;  %v1748_v14 = vld [vmem:[%s3041_s3 + $0xc8] sm:$0xff]  ;;  %v1746_v28 = vld [vmem:[%s3041_s3 + $0xb8] sm:$0xff]  ;;  %s1738_s30 = sshll.u32 %s3060_s28, 4 }
  0x11   : > { %1874 = vmatpush.msra.mxu1 %v1753_v1  ;;  %1875 = vmatpush.msra.mxu2 %v1753_v1  ;;  %s2107_s27 = scalar_lea.vmem %s2096_s15, %s1870_s7  ;;  %v2112_v6 = vld [vmem:[%s3040_s2] ss:$0 sm:$0xff]  ;;  %s1737_s7 = sshll.u32 %s3058_s8, 4  ;;  %v1745_v33 = vld [vmem:[%s3041_s3 + $0xb0] sm:$0xff]  ;;  %v1744_v40 = vld [vmem:[%s3041_s3 + $0xa8] sm:$0xff] }
  0x12   : > { %1876 = vmatpush.msra.mxu3 %v1753_v1  ;;  %568 = vmatpush.msra.mxu0 %v1753_v1  ;;  %v276_v7 = vld [vmem:[%s2107_s27 + $0x10] sm:$0xff]  ;;  %s2132_s12 = scalar_lea.vmem %s2096_s15, %s1737_s7  ;;  %v277_v18 = vld [vmem:[%s2107_s27 + $0x18] sm:$0xff]  ;;  %v1747_v20 = vld [vmem:[%s3041_s3 + $0xc0] sm:$0xff]  ;;  %s363_s6 = scalar_lea.vmem %s2096_s15, %s1738_s30 }
  0x13   : > { %1877 = vmatpush.msra.mxu1 %v1752_v2  ;;  %1878 = vmatpush.msra.mxu2 %v1752_v2  ;;  %v280_v8 = vld [vmem:[%s2107_s27 + $0x30] sm:$0xff]  ;;  %v296_v10 = vmul.f32 %v2101_v4, %v276_v7  ;;  %v281_v19 = vld [vmem:[%s2107_s27 + $0x38] sm:$0xff]  ;;  %v297_v22 = vmul.f32 %v2101_v4, %v277_v18  ;;  %v351_v26 = vld [vmem:[%s2132_s12] sm:$0xff]  ;;  %s2151_s14 = scalar_select %p372_p7, 0.0, 1.0 }
  0x14   : > { %1879 = vmatpush.msra.mxu3 %v1752_v2  ;;  %569 = vmatpush.msra.mxu0 %v1752_v2  ;;  %v300_v11 = vmul.f32 %v2101_v4, %v280_v8  ;;  %v284_v12 = vld [vmem:[%s2107_s27 + $0x50] sm:$0xff]  ;;  %v301_v23 = vmul.f32 %v2101_v4, %v281_v19  ;;  %v285_v27 = vld [vmem:[%s2107_s27 + $0x58] sm:$0xff]  ;;  %v353_v31 = vmul.f32 %v2101_v4, %v351_v26  ;;  %v278_v39 = vld [vmem:[%s2107_s27 + $0x20] sm:$0xff]  ;;  %s378_s15 = scalar_select %p377_p9, 0.0, 1.0 }
  0x15   : > { %1880 = vmatpush.msra.mxu1 %v1751_v3  ;;  %1881 = vmatpush.msra.mxu2 %v1751_v3  ;;  %v304_v13 = vmul.f32 %v2101_v4, %v284_v12  ;;  %v316_v15 = vadd.f32 %v2112_v6, %v296_v10  ;;  %v317_v29 = vadd.f32 %v2112_v6, %v297_v22  ;;  %v374_v37 = vstv %s2151_s14  ;;  %v282_v43 = vld [vmem:[%s2107_s27 + $0x40] sm:$0xff]  ;;  %v352_v46 = vld [vmem:[%s2132_s12 + $0x8] sm:$0xff]  ;;  %v1742_v54 = vld [vmem:[%s3041_s3 + $0x98] sm:$0xff]  ;;  %s3062_s29 = smov (!%p255_p10, %s2076_s29), 15  ;;  %s1730_s7 = sshll.u32 %s3056_s19, 5 }
  0x16   : > { %1882 = vmatpush.msra.mxu3 %v1751_v3  ;;  %570 = vmatpush.msra.mxu0 %v1751_v3  ;;  %v320_v16 = vadd.f32 %v2112_v6, %v300_v11  ;;  %v321_v30 = vadd.f32 %v2112_v6, %v301_v23  ;;  %v305_v32 = vmul.f32 %v2101_v4, %v285_v27  ;;  %v1743_v47 = vld [vmem:[%s3041_s3 + $0xa0] sm:$0xff]  ;;  %v279_v57 = vld [vmem:[%s2107_s27 + $0x28] sm:$0xff]  ;;  %v1741_v63 = vld [vmem:[%s3041_s3 + $0x90] sm:$0xff]  ;;  %v2006_v22 = vmov 0.0   ;;  %s1729_s9 = sshll.u32 %s3062_s29, 1  ;;  %p265_p11 = scmp.lt.s32.totalorder %s1988_s18, 1 }
  0x17   : > { %1883 = vmatpush.msra.mxu1 %v1750_v5  ;;  %1884 = vmatpush.msra.mxu2 %v1750_v5  ;;  %v324_v17 = vadd.f32 %v2112_v6, %v304_v13  ;;  %v2140_v21 = vmax.f32 %v316_v15, 0.0  ;;  %v2167_v34 = vmax.f32 %v317_v29, 0.0  ;;  %v355_v35 = vadd.f32 %v2112_v6, %v353_v31  ;;  %v286_v51 = vld [vmem:[%s2107_s27 + $0x60] sm:$0xff]  ;;  %v283_v58 = vld [vmem:[%s2107_s27 + $0x48] sm:$0xff]  ;;  %v533_v19 = vld [vmem:[%s3041_s3 + $0x78] sm:$0xff]  ;;  %s259_s10 = sadd.s32 %s1730_s7, %s1729_s9  ;;  %s1732_s8 = sshll.u32 %s3056_s19, 1 }
  0x18   : > { %1885 = vmatpush.msra.mxu3 %v1750_v5  ;;  %571 = vmatpush.msra.mxu0 %v1750_v5  ;;  %v2144_v24 = vmax.f32 %v320_v16, 0.0  ;;  %v2170_v36 = vmax.f32 %v321_v30, 0.0  ;;  %v325_v38 = vadd.f32 %v2112_v6, %v305_v32  ;;  %v298_v42 = vmul.f32 %v2101_v4, %v278_v39  ;;  %v274_v1 = vld [vmem:[%s2107_s27] sm:$0xff]  ;;  %v287_v7 = vld [vmem:[%s2107_s27 + $0x68] sm:$0xff]  ;;  %442 = vst [vmem:[#allocation2] sm:$0x1] %v2006_v22 }
  0x19   : > { %1886 = vmatpush.msra.mxu1 %v1749_v9  ;;  %1887 = vmatpush.msra.mxu2 %v1749_v9  ;;  %v2146_v25 = vmax.f32 %v324_v17, 0.0  ;;  %386 = vst [vmem:[#allocation3 + $0x20] sm:$0xff] %v2140_v21  ;;  %v357_v41 = vmax.f32 %v355_v35, 0.0  ;;  %v302_v45 = vmul.f32 %v2101_v4, %v282_v43  ;;  %v354_v50 = vmul.f32 %v2101_v4, %v352_v46  ;;  %v1740_v8 = vld [vmem:[%s3041_s3 + $0x88] sm:$0xff]  ;;  %v1739_v13 = vld [vmem:[%s3041_s3 + $0x80] sm:$0xff]  ;;  %v1770_v17 = vld [vmem:[%s3041_s3 + $0x178] sm:$0xff] }
  0x1a   : > { %1888 = vmatpush.msra.mxu3 %v1749_v9  ;;  %572 = vmatpush.msra.mxu0 %v1749_v9  ;;  %390 = vst [vmem:[#allocation3 + $0x40] sm:$0xff] %v2144_v24  ;;  %v2183_v44 = vmax.f32 %v325_v38, 0.0  ;;  %v318_v49 = vadd.f32 %v2112_v6, %v298_v42  ;;  %v306_v53 = vmul.f32 %v2101_v4, %v286_v51  ;;  %v1769_v23 = vld [vmem:[%s3041_s3 + $0x170] sm:$0xff]  ;;  %v1786_v26 = vld [vmem:[%s3041_s3 + $0x1f8] sm:$0xff]  ;;  %v531_v30 = vld [vmem:[%s3041_s3 + $0x68] sm:$0xff]  ;;  %s3064_s18 = smov (!%p265_p11, %s1988_s18), 1 }
  0x1b   : > { %1889 = vmatpush.msra.mxu1 %v1748_v14  ;;  %1890 = vmatpush.msra.mxu2 %v1748_v14  ;;  %394 = vst [vmem:[#allocation3 + $0x60] sm:$0xff] %v2146_v25  ;;  %v2190_v48 = vmul.f32 %v374_v37, %v357_v41  ;;  %v322_v52 = vadd.f32 %v2112_v6, %v302_v45  ;;  %v532_v27 = vld [vmem:[%s3041_s3 + $0x70] sm:$0xff]  ;;  %v1767_v31 = vld [vmem:[%s3041_s3 + $0x160] sm:$0xff]  ;;  %v1784_v32 = vld [vmem:[%s3041_s3 + $0x1e8] sm:$0xff]  ;;  %s268_s13 = sadd.s32 %s1732_s8, %s3064_s18 }
  0x1c   : > { %1891 = vmatpush.msra.mxu3 %v1748_v14  ;;  %573 = vmatpush.msra.mxu0 %v1748_v14  ;;  %426 = vst [vmem:[#allocation2 + $0x21] sm:$0xff] %v2140_v21  ;;  %v2203_v55 = vmax.f32 %v318_v49, 0.0  ;;  %v356_v56 = vadd.f32 %v2112_v6, %v354_v50  ;;  %v326_v60 = vadd.f32 %v2112_v6, %v306_v53  ;;  %v1785_v29 = vld [vmem:[%s3041_s3 + $0x1f0] sm:$0xff]  ;;  %v1766_v35 = vld [vmem:[%s3041_s3 + $0x158] sm:$0xff]  ;;  %v275_v39 = vld [vmem:[%s2107_s27 + $0x8] sm:$0xff]  ;;  %s1733_s14 = sshll.u32 %s268_s13, 1 }
  0x1d   : > { %1892 = vmatpush.msra.mxu1 %v1747_v20  ;;  %1893 = vmatpush.msra.mxu2 %v1747_v20  ;;  %387 = vst [vmem:[#allocation3 + $0x28] sm:$0xff] %v2167_v34  ;;  %v2208_v59 = vmax.f32 %v322_v52, 0.0  ;;  %v299_v61 = vmul.f32 %v2101_v4, %v279_v57  ;;  %v303_v62 = vmul.f32 %v2101_v4, %v283_v58  ;;  %v529_v38 = vld [vmem:[%s3041_s3 + $0x58] sm:$0xff]  ;;  %v528_v43 = vld [vmem:[%s3041_s3 + $0x50] sm:$0xff]  ;;  %v1764_v45 = vld [vmem:[%s3041_s3 + $0x148] sm:$0xff]  ;;  %s270_s25 = scalar_lea.vmem %s3043_s5, %s1733_s14 }
  0x1e   : > { %1894 = vmatpush.msra.mxu3 %v1747_v20  ;;  %574 = vmatpush.msra.mxu0 %v1747_v20  ;;  %391 = vst [vmem:[#allocation3 + $0x48] sm:$0xff] %v2170_v36  ;;  %v358_v0 = vmax.f32 %v356_v56, 0.0  ;;  %v2219_v2 = vmax.f32 %v326_v60, 0.0  ;;  %v294_v10 = vmul.f32 %v2101_v4, %v274_v1  ;;  %v307_v11 = vmul.f32 %v2101_v4, %v287_v7  ;;  %v1782_v41 = vld [vmem:[%s3041_s3 + $0x1d8] sm:$0xff]  ;;  %v527_v49 = vld [vmem:[%s3041_s3 + $0x48] sm:$0xff]  ;;  %v526_v52 = vld [vmem:[%s3041_s3 + $0x40] sm:$0xff] }
  0x1f   : > { %1895 = vmatpush.msra.mxu1 %v1746_v28  ;;  %1896 = vmatpush.msra.mxu2 %v1746_v28  ;;  %430 = vst [vmem:[#allocation2 + $0x41] sm:$0xff] %v2144_v24  ;;  %v319_v3 = vadd.f32 %v2112_v6, %v299_v61  ;;  %v323_v5 = vadd.f32 %v2112_v6, %v303_v62  ;;  %v1802_v42 = vld [vmem:[%s3041_s3 + $0x278] sm:$0xff]  ;;  %v1780_v50 = vld [vmem:[%s3041_s3 + $0x1c8] sm:$0xff]  ;;  %v1779_v56 = vld [vmem:[%s3041_s3 + $0x1c0] sm:$0xff] }
  0x20   : > { %1897 = vmatpush.msra.mxu3 %v1746_v28  ;;  %575 = vmatpush.msra.mxu0 %v1746_v28  ;;  %395 = vst [vmem:[#allocation3 + $0x68] sm:$0xff] %v2183_v44  ;;  %v2227_v9 = vmul.f32 %v374_v37, %v358_v0  ;;  %v314_v15 = vadd.f32 %v2112_v6, %v294_v10  ;;  %v1768_v28 = vld [vmem:[%s3041_s3 + $0x168] sm:$0xff]  ;;  %v1783_v37 = vld [vmem:[%s3041_s3 + $0x1e0] sm:$0xff]  ;;  %v1761_v58 = vld [vmem:[%s3041_s3 + $0x130] sm:$0xff] }
  0x21   : > { %1898 = vmatpush.msra.mxu1 %v1745_v33  ;;  %1899 = vmatpush.msra.mxu2 %v1745_v33  ;;  %382 = vst [vmem:[#allocation3] sm:$0xff] %v2190_v48  ;;  %v2233_v12 = vmax.f32 %v319_v3, 0.0  ;;  %v2239_v14 = vmax.f32 %v323_v5, 0.0  ;;  %v327_v16 = vadd.f32 %v2112_v6, %v307_v11  ;;  %v295_v46 = vmul.f32 %v2101_v4, %v275_v39  ;;  %v1763_v4 = vld [vmem:[%s3041_s3 + $0x140] sm:$0xff]  ;;  %v1800_v51 = vld [vmem:[%s3041_s3 + $0x268] sm:$0xff]  ;;  %v1778_v61 = vld [vmem:[%s3041_s3 + $0x1b8] sm:$0xff] }
  0x22   : > { %1900 = vmatpush.msra.mxu3 %v1745_v33  ;;  %576 = vmatpush.msra.mxu0 %v1745_v33  ;;  %388 = vst [vmem:[#allocation3 + $0x30] sm:$0xff] %v2203_v55  ;;  %v2248_v18 = vmax.f32 %v314_v15, 0.0  ;;  %v530_v33 = vld [vmem:[%s3041_s3 + $0x60] sm:$0xff]  ;;  %v1798_v62 = vld [vmem:[%s3041_s3 + $0x258] sm:$0xff]  ;;  %v1760_v0 = vld [vmem:[%s3041_s3 + $0x128] sm:$0xff] }
  0x23   : > { %1901 = vmatpush.msra.mxu1 %v1744_v40  ;;  %1902 = vmatpush.msra.mxu2 %v1744_v40  ;;  %392 = vst [vmem:[#allocation3 + $0x50] sm:$0xff] %v2208_v59  ;;  %v2253_v20 = vmax.f32 %v327_v16, 0.0  ;;  %v315_v53 = vadd.f32 %v2112_v6, %v295_v46  ;;  %v1799_v57 = vld [vmem:[%s3041_s3 + $0x260] sm:$0xff]  ;;  %v525_v6 = vld [vmem:[%s3041_s3 + $0x38] sm:$0xff]  ;;  %v1777_v3 = vld [vmem:[%s3041_s3 + $0x1b0] sm:$0xff] }
  0x24   : > { %1903 = vmatpush.msra.mxu3 %v1744_v40  ;;  %577 = vmatpush.msra.mxu0 %v1744_v40  ;;  %422 = vst [vmem:[#allocation2 + $0x1] sm:$0xff] %v2190_v48  ;;  %v1765_v40 = vld [vmem:[%s3041_s3 + $0x150] sm:$0xff]  ;;  %v1776_v11 = vld [vmem:[%s3041_s3 + $0x1a8] sm:$0xff]  ;;  %v522_v16 = vld [vmem:[%s3041_s3 + $0x20] sm:$0xff] }
  0x25   : > { %1904 = vmatpush.msra.mxu1 %v1743_v47  ;;  %1905 = vmatpush.msra.mxu2 %v1743_v47  ;;  %396 = vst [vmem:[#allocation3 + $0x70] sm:$0xff] %v2219_v2  ;;  %v2374_v60 = vmax.f32 %v315_v53, 0.0  ;;  %v1797_v5 = vld [vmem:[%s3041_s3 + $0x250] sm:$0xff]  ;;  %v407_v15 = vld [vmem:[#allocation3 + $0x28] sm:$0x7f]  ;;  %v1834_v46 = vld [vmem:[%s3041_s3 + $0x378] sm:$0xff] }
  0x26   : > { %1906 = vmatpush.msra.mxu3 %v1743_v47  ;;  %578 = vmatpush.msra.mxu0 %v1743_v47  ;;  %383 = vst [vmem:[#allocation3 + $0x8] sm:$0xff] %v2227_v9  ;;  %v1781_v47 = vld [vmem:[%s3041_s3 + $0x1d0] sm:$0xff]  ;;  %v1772_v39 = vld [vmem:[%s3041_s3 + $0x188] sm:$0xff] }
  0x27   : > { %1907 = vmatpush.msra.mxu1 %v1742_v54  ;;  %1908 = vmatpush.msra.mxu2 %v1742_v54  ;;  %389 = vst [vmem:[#allocation3 + $0x38] sm:$0xff] %v2233_v12 }
  0x28   : > { %1909 = vmatpush.msra.mxu3 %v1742_v54  ;;  %579 = vmatpush.msra.mxu0 %v1742_v54  ;;  %393 = vst [vmem:[#allocation3 + $0x58] sm:$0xff] %v2239_v14  ;;  %v1762_v54 = vld [vmem:[%s3041_s3 + $0x138] sm:$0xff] }
  0x29   : > { %1910 = vmatpush.msra.mxu1 %v1741_v63  ;;  %1911 = vmatpush.msra.mxu2 %v1741_v63  ;;  %384 = vst [vmem:[#allocation3 + $0x10] sm:$0xff] %v2248_v18 }
  0x2a   : > { %1912 = vmatpush.msra.mxu3 %v1741_v63  ;;  %580 = vmatpush.msra.mxu0 %v1741_v63  ;;  %397 = vst [vmem:[#allocation3 + $0x78] sm:$0xff] %v2253_v20  ;;  %v524_v63 = vld [vmem:[%s3041_s3 + $0x30] sm:$0xff] }
  0x2b   : > { %1913 = vmatpush.msra.mxu1 %v1740_v8  ;;  %1914 = vmatpush.msra.mxu2 %v1740_v8  ;;  %443 = vst [vmem:[#allocation2 + $0x10] sm:$0x1] %v2006_v22 }
  0x2c   : > { %1915 = vmatpush.msra.mxu3 %v1740_v8  ;;  %581 = vmatpush.msra.mxu0 %v1740_v8  ;;  %444 = vst [vmem:[#allocation2 + $0x20] sm:$0x1] %v2006_v22  ;;  %v523_v8 = vld [vmem:[%s3041_s3 + $0x28] sm:$0xff] }
  0x2d   : > { %1916 = vmatpush.msra.mxu1 %v1739_v13  ;;  %1917 = vmatpush.msra.mxu2 %v1739_v13  ;;  %445 = vst [vmem:[#allocation2 + $0x30] sm:$0x1] %v2006_v22  ;;  %v2391_v1 = vld [vmem:[#allocation3 + $0x1] sm:$0xff]  ;;  %v453_v10 = vld [vmem:[#allocation3 + $0x9] sm:$0x7f] }
  0x2e   : > { %595 = vmatmul.f32.vlgmr.msra.gmra.mxu1 %v2140_v21  ;;  %607 = vmatmul.f32.vlgmr.msra.gmra.mxu2 %v2144_v24  ;;  %446 = vst [vmem:[#allocation2 + $0x40] sm:$0x1] %v2006_v22  ;;  %v403_v7 = vld [vmem:[#allocation3 + $0x8] sm:$0x7f]  ;;  %v409_v53 = vld [vmem:[#allocation3 + $0x38] sm:$0x7f] }
  0x2f   : > { %730 = vmatpush.msrb.mxu2 %v1770_v17  ;;  %1918 = vmatpush.msra.mxu3 %v1739_v13  ;;  %447 = vst [vmem:[#allocation2 + $0x50] sm:$0x1] %v2006_v22  ;;  %v1758_v17 = vld [vmem:[%s3041_s3 + $0x118] sm:$0xff] }
  0x30   : > { %632 = vmatpush.msrb.mxu1 %v533_v19  ;;  %619 = vmatmul.f32.vlgmr.msra.gmra.mxu3 %v2146_v25  ;;  %448 = vst [vmem:[#allocation2 + $0x60] sm:$0x1] %v2006_v22  ;;  %v1775_v19 = vld [vmem:[%s3041_s3 + $0x1a0] sm:$0xff] }
  0x31   : > { %731 = vmatpush.msrb.mxu2 %v1769_v23  ;;  %845 = vmatpush.msrb.mxu3 %v1786_v26  ;;  %449 = vst [vmem:[#allocation2 + $0x70] sm:$0x1] %v2006_v22  ;;  %v521_v23 = vld [vmem:[%s3041_s3 + $0x18] sm:$0xff]  ;;  %v1757_v26 = vld [vmem:[%s3041_s3 + $0x110] sm:$0xff] }
  0x32   : > { %633 = vmatpush.msrb.mxu1 %v532_v27  ;;  %582 = vmatpush.msra.mxu0 %v1739_v13  ;;  %450 = vst [vmem:[#allocation2 + $0x80] sm:$0x1] %v2006_v22  ;;  %v1796_v13 = vld [vmem:[%s3041_s3 + $0x248] sm:$0xff]  ;;  %v1774_v27 = vld [vmem:[%s3041_s3 + $0x198] sm:$0xff] }
  0x33   : > { %732 = vmatpush.msrb.mxu2 %v1768_v28  ;;  %846 = vmatpush.msrb.mxu3 %v1785_v29  ;;  %451 = vst [vmem:[#allocation2 + $0x90] sm:$0x1] %v2006_v22  ;;  %v1794_v28 = vld [vmem:[%s3041_s3 + $0x238] sm:$0xff] }
  0x34   : > { %634 = vmatpush.msrb.mxu1 %v531_v30  ;;  %583 = vmatmul.f32.vlgmr.msra.gmra.mxu0 %v2190_v48  ;;  %v1801_v48 = vld [vmem:[%s3041_s3 + $0x270] sm:$0xff]  ;;  %492 = vst [vmem:[#allocation4 + $0xf] sm:$0x1] %v2006_v22 }
  0x35   : > { %733 = vmatpush.msrb.mxu2 %v1767_v31  ;;  %847 = vmatpush.msrb.mxu3 %v1784_v32  ;;  %493 = vst [vmem:[#allocation4 + $0x1f] sm:$0x1] %v2006_v22  ;;  %v520_v31 = vld [vmem:[%s3041_s3 + $0x10] sm:$0xff]  ;;  %v1756_v32 = vld [vmem:[%s3041_s3 + $0x108] sm:$0xff] }
  0x36   : > { %635 = vmatpush.msrb.mxu1 %v530_v33  ;;  %610 = vmatmul.f32.gmra.mxu2 %v2170_v36  ;;  %494 = vst [vmem:[#allocation4 + $0x2f] sm:$0x1] %v2006_v22 }
  0x37   : > { %598 = vmatmul.f32.gmra.mxu1 %v2167_v34  ;;  %734 = vmatpush.msrb.mxu2 %v1766_v35  ;;  %495 = vst [vmem:[#allocation4 + $0x3f] sm:$0x1] %v2006_v22  ;;  %v1793_v35 = vld [vmem:[%s3041_s3 + $0x230] sm:$0xff] }
  0x38   : > { %848 = vmatpush.msrb.mxu3 %v1783_v37  ;;  %636 = vmatpush.msrb.mxu1 %v529_v38  ;;  %496 = vst [vmem:[#allocation4 + $0x4f] sm:$0x1] %v2006_v22  ;;  %v519_v37 = vld [vmem:[%s3041_s3 + $0x8] sm:$0xff]  ;;  %v1755_v38 = vld [vmem:[%s3041_s3 + $0x100] sm:$0xff] }
  0x39   : > { %622 = vmatmul.f32.gmra.mxu3 %v2183_v44  ;;  %735 = vmatpush.msrb.mxu2 %v1765_v40  ;;  %497 = vst [vmem:[#allocation4 + $0x5f] sm:$0x1] %v2006_v22  ;;  %v1792_v40 = vld [vmem:[%s3041_s3 + $0x228] sm:$0xff] }
  0x3a   : > { %849 = vmatpush.msrb.mxu3 %v1782_v41  ;;  %960 = vmatpush.msrb.mxu0 %v1802_v42  ;;  %498 = vst [vmem:[#allocation4 + $0x6f] sm:$0x1] %v2006_v22  ;;  %v518_v41 = vld [vmem:[%s3041_s3] sm:$0xff] }
  0x3b   : > { %637 = vmatpush.msrb.mxu1 %v528_v43  ;;  %736 = vmatpush.msrb.mxu2 %v1764_v45  ;;  %499 = vst [vmem:[#allocation4 + $0x7f] sm:$0x1] %v2006_v22  ;;  %v502_v42 = vld [vmem:[#allocation2] sm:$0xff] }
  0x3c   : > { %850 = vmatpush.msrb.mxu3 %v1781_v47  ;;  %961 = vmatpush.msrb.mxu0 %v1801_v48  ;;  %500 = vst [vmem:[#allocation4 + $0x8f] sm:$0x1] %v2006_v22  ;;  %v1771_v43 = vld [vmem:[%s3041_s3 + $0x180] sm:$0xff] }
  0x3d   : > { %638 = vmatpush.msrb.mxu1 %v527_v49  ;;  %737 = vmatpush.msrb.mxu2 %v1763_v4  ;;  %501 = vst [vmem:[#allocation4 + $0x9f] sm:$0x1] %v2006_v22  ;;  %v1795_v22 = vld [vmem:[%s3041_s3 + $0x240] sm:$0xff]  ;;  %v457_v49 = vld [vmem:[#allocation3 + $0x29] sm:$0x7f]  ;;  %v1790_v4 = vld [vmem:[%s3041_s3 + $0x218] sm:$0xff] }
  0x3e   : > { %851 = vmatpush.msrb.mxu3 %v1780_v50  ;;  %962 = vmatpush.msrb.mxu0 %v1800_v51  ;;  %385 = vst [vmem:[#allocation3 + $0x18] sm:$0xff] %v2374_v60  ;;  %v1791_v45 = vld [vmem:[%s3041_s3 + $0x220] sm:$0xff]  ;;  %v1850_v50 = vld [vmem:[%s3041_s3 + $0x3f8] sm:$0xff] }
  0x3f   : > { %639 = vmatpush.msrb.mxu1 %v526_v52  ;;  %613 = vmatmul.f32.gmra.mxu2 %v2208_v59  ;;  %424 = vst [vmem:[#allocation2 + $0x11] sm:$0xff] %v2248_v18  ;;  %v2487_v48 = vld [vmem:[#allocation3 + $0x21] sm:$0xff]  ;;  %v1818_v51 = vld [vmem:[%s3041_s3 + $0x2f8] sm:$0xff]  ;;  %v1833_v52 = vld [vmem:[%s3041_s3 + $0x370] sm:$0xff] }
  0x40   : > { %601 = vmatmul.f32.gmra.mxu1 %v2203_v55  ;;  %738 = vmatpush.msrb.mxu2 %v1762_v54  ;;  %423 = vst [vmem:[#allocation2 + $0x9] sm:$0x7f] %v403_v7  ;;  %v1789_v54 = vld [vmem:[%s3041_s3 + $0x210] sm:$0xff]  ;;  %v1831_v7 = vld [vmem:[%s3041_s3 + $0x360] sm:$0xff] }
  0x41   : > { %852 = vmatpush.msrb.mxu3 %v1779_v56  ;;  %963 = vmatpush.msrb.mxu0 %v1799_v57  ;;  %473 = vst [vmem:[#allocation4 + $0x8] sm:$0x7f] %v453_v10  ;;  %v1849_v56 = vld [vmem:[%s3041_s3 + $0x3f0] sm:$0xff] }
  0x42   : > { %640 = vmatpush.msrb.mxu1 %v525_v6  ;;  %586 = vmatmul.f32.gmra.mxu0 %v2227_v9  ;;  %v1759_v9 = vld [vmem:[%s3041_s3 + $0x120] sm:$0xff]  ;;  %427 = vst [vmem:[#allocation2 + $0x29] sm:$0x7f] %v407_v15  ;;  %v1817_v57 = vld [vmem:[%s3041_s3 + $0x2f0] sm:$0xff]  ;;  %v1832_v6 = vld [vmem:[%s3041_s3 + $0x368] sm:$0xff] }
  0x43   : > { %625 = vmatmul.f32.gmra.mxu3 %v2219_v2  ;;  %739 = vmatpush.msrb.mxu2 %v1761_v58  ;;  %428 = vst [vmem:[#allocation2 + $0x31] sm:$0xff] %v2203_v55  ;;  %v1788_v58 = vld [vmem:[%s3041_s3 + $0x208] sm:$0xff]  ;;  %v1865_v10 = vld [vmem:[%s3041_s3 + $0x470] sm:$0xff]  ;;  %v1814_v15 = vld [vmem:[%s3041_s3 + $0x2d8] sm:$0xff] }
  0x44   : > { %853 = vmatpush.msrb.mxu3 %v1778_v61  ;;  %964 = vmatpush.msrb.mxu0 %v1798_v62  ;;  %432 = vst [vmem:[#allocation2 + $0x51] sm:$0xff] %v2208_v59 }
  0x45   : > { %641 = vmatpush.msrb.mxu1 %v524_v63  ;;  %740 = vmatpush.msrb.mxu2 %v1760_v0  ;;  %v405_v29 = vld [vmem:[#allocation3 + $0x18] sm:$0x7f]  ;;  %434 = vst [vmem:[#allocation2 + $0x61] sm:$0xff] %v2146_v25  ;;  %v1773_v25 = vld [vmem:[%s3041_s3 + $0x190] sm:$0xff]  ;;  %v1848_v63 = vld [vmem:[%s3041_s3 + $0x3e8] sm:$0xff] }
  0x46   : > { %854 = vmatpush.msrb.mxu3 %v1777_v3  ;;  %965 = vmatpush.msrb.mxu0 %v1797_v5  ;;  %v455_v30 = vld [vmem:[#allocation3 + $0x19] sm:$0x7f]  ;;  %425 = vst [vmem:[#allocation2 + $0x19] sm:$0x7f] %v405_v29  ;;  %v2450_v33 = vld [vmem:[#allocation3 + $0x11] sm:$0xff]  ;;  %v1787_v0 = vld [vmem:[%s3041_s3 + $0x200] sm:$0xff] }
  0x47   : > { %642 = vmatpush.msrb.mxu1 %v523_v8  ;;  %741 = vmatpush.msrb.mxu2 %v1759_v9  ;;  %475 = vst [vmem:[#allocation4 + $0x18] sm:$0x7f] %v455_v30  ;;  %v2485_v47 = vld [vmem:[#allocation2 + $0x10] sm:$0xff]  ;;  %v503_v62 = vld [vmem:[#allocation2 + $0x8] sm:$0xff]  ;;  %v1866_v5 = vld [vmem:[%s3041_s3 + $0x478] sm:$0xff] }
  0x48   : > { %855 = vmatpush.msrb.mxu3 %v1776_v11  ;;  %966 = vmatpush.msrb.mxu0 %v1796_v13  ;;  %436 = vst [vmem:[#allocation2 + $0x71] sm:$0xff] %v2219_v2  ;;  %v698_v61 = vld [vmem:[#allocation4 + $0x8] sm:$0xff]  ;;  %v1847_v8 = vld [vmem:[%s3041_s3 + $0x3e0] sm:$0xff]  ;;  %v1830_v11 = vld [vmem:[%s3041_s3 + $0x358] sm:$0xff] }
  0x49   : > { %643 = vmatpush.msrb.mxu1 %v522_v16  ;;  %616 = vmatmul.f32.gmra.mxu2 %v2239_v14  ;;  %477 = vst [vmem:[#allocation4 + $0x28] sm:$0x7f] %v457_v49  ;;  %v1815_v9 = vld [vmem:[%s3041_s3 + $0x2e0] sm:$0xff]  ;;  %v1846_v13 = vld [vmem:[%s3041_s3 + $0x3d8] sm:$0xff]  ;;  %v1829_v16 = vld [vmem:[%s3041_s3 + $0x350] sm:$0xff] }
  0x4a   : > { %604 = vmatmul.f32.gmra.mxu1 %v2233_v12  ;;  %742 = vmatpush.msrb.mxu2 %v1758_v17  ;;  %429 = vst [vmem:[#allocation2 + $0x39] sm:$0x7f] %v409_v53  ;;  %v1863_v17 = vld [vmem:[%s3041_s3 + $0x460] sm:$0xff]  ;;  %v1828_v29 = vld [vmem:[%s3041_s3 + $0x348] sm:$0xff]  ;;  %v1810_v49 = vld [vmem:[%s3041_s3 + $0x2b8] sm:$0xff] }
  0x4b   : > { %856 = vmatpush.msrb.mxu3 %v1775_v19  ;;  %967 = vmatpush.msrb.mxu0 %v1795_v22  ;;  %v1845_v19 = vld [vmem:[%s3041_s3 + $0x3d0] sm:$0xff]  ;;  %v2565_v22 = vld [vmem:[#allocation2 + $0x20] sm:$0xff]  ;;  %v411_v30 = vld [vmem:[#allocation3 + $0x48] sm:$0x7f] }
  0x4c   : > { %644 = vmatpush.msrb.mxu1 %v521_v23  ;;  %589 = vmatmul.f32.gmra.mxu0 %v2248_v18  ;;  %v2567_v23 = vld [vmem:[#allocation3 + $0x31] sm:$0xff]  ;;  %431 = vst [vmem:[#allocation2 + $0x49] sm:$0x7f] %v411_v30 }
  0x4d   : > { %628 = vmatmul.f32.gmra.mxu3 %v2253_v20  ;;  %743 = vmatpush.msrb.mxu2 %v1757_v26  ;;  %v813_v3 = vld [vmem:[#allocation2 + $0x18] sm:$0xff]  ;;  %v1809_v53 = vld [vmem:[%s3041_s3 + $0x2b0] sm:$0xff] }
  0x4e   : > { %857 = vmatpush.msrb.mxu3 %v1774_v27  ;;  %968 = vmatpush.msrb.mxu0 %v1794_v28  ;;  %v459_v26 = vld [vmem:[#allocation3 + $0x39] sm:$0x7f]  ;;  %v1813_v28 = vld [vmem:[%s3041_s3 + $0x2d0] sm:$0xff] }
  0x4f   : > { %645 = vmatpush.msrb.mxu1 %v520_v31  ;;  %744 = vmatpush.msrb.mxu2 %v1756_v32  ;;  %v1862_v27 = vld [vmem:[%s3041_s3 + $0x458] sm:$0xff]  ;;  %479 = vst [vmem:[#allocation4 + $0x38] sm:$0x7f] %v459_v26  ;;  %v1844_v31 = vld [vmem:[%s3041_s3 + $0x3c8] sm:$0xff]  ;;  %v1861_v32 = vld [vmem:[%s3041_s3 + $0x450] sm:$0xff] }
  0x50   : > { %858 = vmatpush.msrb.mxu3 %v1773_v25  ;;  %969 = vmatpush.msrb.mxu0 %v1793_v35  ;;  %v1812_v25 = vld [vmem:[%s3041_s3 + $0x2c8] sm:$0xff]  ;;  %v2590_v35 = vld [vmem:[#allocation4 + $0x18] sm:$0xff] }
  0x51   : > { %646 = vmatpush.msrb.mxu1 %v519_v37  ;;  %745 = vmatpush.msrb.mxu2 %v1755_v38  ;;  %v1827_v37 = vld [vmem:[%s3041_s3 + $0x340] sm:$0xff] }
  0x52   : > { %859 = vmatpush.msrb.mxu3 %v1772_v39  ;;  %970 = vmatpush.msrb.mxu0 %v1792_v40  ;;  %v1843_v38 = vld [vmem:[%s3041_s3 + $0x3c0] sm:$0xff]  ;;  %v1860_v39 = vld [vmem:[%s3041_s3 + $0x448] sm:$0xff] }
  0x53   : > { %647 = vmatpush.msrb.mxu1 %v518_v41  ;;  %746 = vmatmul.f32.vlgmr.msrb.gmra.mxu2 %v2391_v1  ;;  %v1816_v1 = vld [vmem:[%s3041_s3 + $0x2e8] sm:$0xff]  ;;  %v1811_v40 = vld [vmem:[%s3041_s3 + $0x2c0] sm:$0xff]  ;;  %v2610_v41 = vld [vmem:[#allocation2 + $0x30] sm:$0xff] }
  0x54   : > { %648 = vmatmul.f32.vlgmr.msrb.gmra.mxu1 %v502_v42  ;;  %860 = vmatpush.msrb.mxu3 %v1771_v43  ;;  %v461_v42 = vld [vmem:[#allocation3 + $0x49] sm:$0x7f]  ;;  %v1826_v43 = vld [vmem:[%s3041_s3 + $0x338] sm:$0xff] }
  0x55   : > { %971 = vmatpush.msrb.mxu0 %v1791_v45  ;;  %1190 = vmatpush.msra.mxu2 %v1834_v46  ;;  %481 = vst [vmem:[#allocation4 + $0x48] sm:$0x7f] %v461_v42  ;;  %v413_v45 = vld [vmem:[#allocation3 + $0x58] sm:$0x7f] }
  0x56   : > { %592 = vmatmul.f32.gmra.mxu0 %v2374_v60  ;;  %861 = vmatmul.f32.vlgmr.msrb.gmra.mxu3 %v2485_v47  ;;  %v1842_v46 = vld [vmem:[%s3041_s3 + $0x3b8] sm:$0xff]  ;;  %433 = vst [vmem:[#allocation2 + $0x59] sm:$0x7f] %v413_v45  ;;  %v1836_v45 = vld [vmem:[%s3041_s3 + $0x388] sm:$0xff] }
  0x57   : > { %972 = vmatpush.msrb.mxu0 %v1790_v4  ;;  %1305 = vmatpush.msra.mxu3 %v1850_v50  ;;  %v2629_v4 = vld [vmem:[#allocation4 + $0x28] sm:$0xff]  ;;  %v1825_v50 = vld [vmem:[%s3041_s3 + $0x330] sm:$0xff]  ;;  %v467_v42 = vld [vmem:[#allocation3 + $0x79] sm:$0x7f] }
  0x58   : > { %1075 = vmatpush.msra.mxu1 %v1818_v51  ;;  %1191 = vmatpush.msra.mxu2 %v1833_v52  ;;  %v1841_v51 = vld [vmem:[%s3041_s3 + $0x3b0] sm:$0xff]  ;;  %v1858_v52 = vld [vmem:[%s3041_s3 + $0x438] sm:$0xff]  ;;  %487 = vst [vmem:[#allocation4 + $0x78] sm:$0x7f] %v467_v42 }
  0x59   : > { %973 = vmatpush.msrb.mxu0 %v1789_v54  ;;  %1306 = vmatpush.msra.mxu3 %v1849_v56  ;;  %v2650_v54 = vld [vmem:[#allocation2 + $0x40] sm:$0xff]  ;;  %v463_v56 = vld [vmem:[#allocation3 + $0x59] sm:$0x7f] }
  0x5a   : > { %1076 = vmatpush.msra.mxu1 %v1817_v57  ;;  %1192 = vmatpush.msra.mxu2 %v1832_v6  ;;  %v1824_v57 = vld [vmem:[%s3041_s3 + $0x328] sm:$0xff]  ;;  %483 = vst [vmem:[#allocation4 + $0x58] sm:$0x7f] %v463_v56  ;;  %v1835_v56 = vld [vmem:[%s3041_s3 + $0x380] sm:$0xff] }
  0x5b   : > { %974 = vmatpush.msrb.mxu0 %v1788_v58  ;;  %749 = vmatmul.f32.gmra.mxu2 %v698_v61  ;;  %v415_v6 = vld [vmem:[#allocation3 + $0x68] sm:$0x7f]  ;;  %v1857_v61 = vld [vmem:[%s3041_s3 + $0x430] sm:$0xff] }
  0x5c   : > { %651 = vmatmul.f32.gmra.mxu1 %v503_v62  ;;  %1307 = vmatpush.msra.mxu3 %v1848_v63  ;;  %v1840_v58 = vld [vmem:[%s3041_s3 + $0x3a8] sm:$0xff]  ;;  %435 = vst [vmem:[#allocation2 + $0x69] sm:$0x7f] %v415_v6  ;;  %v2669_v63 = vld [vmem:[#allocation4 + $0x38] sm:$0xff]  ;;  %v1803_v6 = vld [vmem:[%s3041_s3 + $0x280] sm:$0xff] }
  0x5d   : > { %975 = vmatpush.msrb.mxu0 %v1787_v0  ;;  %1077 = vmatpush.msra.mxu1 %v1816_v1  ;;  %v1808_v62 = vld [vmem:[%s3041_s3 + $0x2a8] sm:$0xff]  ;;  %v1823_v0 = vld [vmem:[%s3041_s3 + $0x320] sm:$0xff]  ;;  %v2728_v30 = vld [vmem:[#allocation2 + $0x58] sm:$0xff] }
  0x5e   : > { %864 = vmatmul.f32.gmra.mxu3 %v813_v3  ;;  %976 = vmatmul.f32.vlgmr.msrb.gmra.mxu0 %v2248_v18  ;;  %v1864_v18 = vld [vmem:[%s3041_s3 + $0x468] sm:$0xff]  ;;  %v1839_v1 = vld [vmem:[%s3041_s3 + $0x3a0] sm:$0xff] }
  0x5f   : > { %1420 = vmatpush.msra.mxu0 %v1866_v5  ;;  %1193 = vmatpush.msra.mxu2 %v1831_v7  ;;  %v1807_v5 = vld [vmem:[%s3041_s3 + $0x2a0] sm:$0xff]  ;;  %v2690_v7 = vld [vmem:[#allocation2 + $0x50] sm:$0xff] }
  0x60   : > { %1308 = vmatpush.msra.mxu3 %v1847_v8  ;;  %1078 = vmatpush.msra.mxu1 %v1815_v9  ;;  %v465_v8 = vld [vmem:[#allocation3 + $0x69] sm:$0x7f]  ;;  %v1822_v9 = vld [vmem:[%s3041_s3 + $0x318] sm:$0xff] }
  0x61   : > { %1421 = vmatpush.msra.mxu0 %v1865_v10  ;;  %1194 = vmatpush.msra.mxu2 %v1830_v11  ;;  %485 = vst [vmem:[#allocation4 + $0x68] sm:$0x7f] %v465_v8  ;;  %v417_v10 = vld [vmem:[#allocation3 + $0x78] sm:$0x7f] }
  0x62   : > { %1309 = vmatpush.msra.mxu3 %v1846_v13  ;;  %1079 = vmatpush.msra.mxu1 %v1814_v15  ;;  %v1838_v11 = vld [vmem:[%s3041_s3 + $0x398] sm:$0xff]  ;;  %v1855_v13 = vld [vmem:[%s3041_s3 + $0x420] sm:$0xff]  ;;  %437 = vst [vmem:[#allocation2 + $0x79] sm:$0x7f] %v417_v10 }
  0x63   : > { %752 = vmatmul.f32.gmra.mxu2 %v2450_v33  ;;  %1422 = vmatpush.msra.mxu0 %v1864_v18  ;;  %v1806_v15 = vld [vmem:[%s3041_s3 + $0x298] sm:$0xff]  ;;  %v288_v18 = vld [vmem:[%s2107_s27 + $0x70] sm:$0xff] }
  0x64   : > { %654 = vmatmul.f32.gmra.mxu1 %v2485_v47  ;;  %1195 = vmatpush.msra.mxu2 %v1829_v16  ;;  %v1859_v47 = vld [vmem:[%s3041_s3 + $0x440] sm:$0xff]  ;;  %v289_v16 = vld [vmem:[%s2107_s27 + $0x78] sm:$0xff]  ;;  %s1731_s27 = sshll.u32 %s259_s10, 3 }
  0x65   : > { %1423 = vmatpush.msra.mxu0 %v1863_v17  ;;  %1310 = vmatpush.msra.mxu3 %v1845_v19  ;;  %v2711_v17 = vld [vmem:[#allocation4 + $0x48] sm:$0xff]  ;;  %s2979_s12 = scalar_lea.vmem %s3042_s4, %s1731_s27 }
  0x66   : > { %867 = vmatmul.f32.gmra.mxu3 %v2565_v22  ;;  %979 = vmatmul.f32.gmra.mxu0 %v2374_v60  ;;  %v2593_v60 = vld [vmem:[#allocation2 + $0x28] sm:$0xff] }
  0x67   : > { %1424 = vmatpush.msra.mxu0 %v1862_v27  ;;  %1080 = vmatpush.msra.mxu1 %v1813_v28  ;;  %v2723_v27 = vld [vmem:[%s3040_s2] ss:$0 sm:$0xff] }
  0x68   : > { %1196 = vmatpush.msra.mxu2 %v1828_v29  ;;  %1311 = vmatpush.msra.mxu3 %v1844_v31  ;;  %v1821_v31 = vld [vmem:[%s3041_s3 + $0x310] sm:$0xff] }
  0x69   : > { %1425 = vmatpush.msra.mxu0 %v1861_v32  ;;  %1081 = vmatpush.msra.mxu1 %v1812_v25 }
  0x6a   : > { %1197 = vmatpush.msra.mxu2 %v1827_v37  ;;  %1312 = vmatpush.msra.mxu3 %v1843_v38  ;;  %v1837_v37 = vld [vmem:[%s3041_s3 + $0x390] sm:$0xff]  ;;  %v1854_v38 = vld [vmem:[%s3041_s3 + $0x418] sm:$0xff] }
  0x6b   : > { %755 = vmatmul.f32.gmra.mxu2 %v2590_v35  ;;  %1426 = vmatpush.msra.mxu0 %v1860_v39  ;;  %v1805_v39 = vld [vmem:[%s3041_s3 + $0x290] sm:$0xff] }
  0x6c   : > { %657 = vmatmul.f32.gmra.mxu1 %v813_v3  ;;  %1198 = vmatpush.msra.mxu2 %v1826_v43  ;;  %v1856_v3 = vld [vmem:[%s3041_s3 + $0x428] sm:$0xff] }
  0x6d   : > { %1082 = vmatpush.msra.mxu1 %v1811_v40  ;;  %1313 = vmatpush.msra.mxu3 %v1842_v46  ;;  %v2755_v40 = vld [vmem:[#allocation3 + $0x71] sm:$0xff]  ;;  %v1820_v43 = vld [vmem:[%s3041_s3 + $0x308] sm:$0xff] }
  0x6e   : > { %870 = vmatmul.f32.gmra.mxu3 %v2593_v60  ;;  %982 = vmatmul.f32.gmra.mxu0 %v2140_v21  ;;  %v2612_v21 = vld [vmem:[#allocation3 + $0x41] sm:$0xff]  ;;  %v1853_v46 = vld [vmem:[%s3041_s3 + $0x410] sm:$0xff] }
  0x6f   : > { %1427 = vmatpush.msra.mxu0 %v1859_v47  ;;  %1083 = vmatpush.msra.mxu1 %v1810_v49  ;;  %v1804_v47 = vld [vmem:[%s3041_s3 + $0x288] sm:$0xff] }
  0x70   : > { %1199 = vmatpush.msra.mxu2 %v1825_v50  ;;  %1314 = vmatpush.msra.mxu3 %v1841_v51  ;;  %v2772_v50 = vld [vmem:[#allocation4 + $0x58] sm:$0xff] }
  0x71   : > { %1428 = vmatpush.msra.mxu0 %v1858_v52  ;;  %1084 = vmatpush.msra.mxu1 %v1809_v53  ;;  %v1819_v52 = vld [vmem:[%s3041_s3 + $0x300] sm:$0xff] }
  0x72   : > { %1200 = vmatpush.msra.mxu2 %v1824_v57  ;;  %1315 = vmatpush.msra.mxu3 %v1840_v58  ;;  %v1964_v53 = vld [vmem:[#allocation3 + $0x60] sm:$0xff]  ;;  %v1852_v57 = vld [vmem:[%s3041_s3 + $0x408] sm:$0xff] }
  0x73   : > { %758 = vmatmul.f32.gmra.mxu2 %v2487_v48  ;;  %1429 = vmatpush.msra.mxu0 %v1857_v61  ;;  %v2796_v61 = vld [vmem:[#allocation2 + $0x70] sm:$0xff] }
  0x74   : > { %660 = vmatmul.f32.gmra.mxu1 %v2565_v22  ;;  %1201 = vmatpush.msra.mxu2 %v1823_v0 }
  0x75   : > { %1085 = vmatpush.msra.mxu1 %v1808_v62  ;;  %1316 = vmatpush.msra.mxu3 %v1839_v1 }
  0x76   : > { %873 = vmatmul.f32.gmra.mxu3 %v2610_v41  ;;  %985 = vmatmul.f32.gmra.mxu0 %v2167_v34  ;;  %v2632_v34 = vld [vmem:[#allocation2 + $0x38] sm:$0xff] }
  0x77   : > { %1430 = vmatpush.msra.mxu0 %v1856_v3  ;;  %1086 = vmatpush.msra.mxu1 %v1807_v5  ;;  %v1851_v3 = vld [vmem:[%s3041_s3 + $0x400] sm:$0xff]  ;;  %v2808_v5 = vld [vmem:[#allocation4 + $0x68] sm:$0xff] }
  0x78   : > { %1202 = vmatpush.msra.mxu2 %v1822_v9  ;;  %1317 = vmatpush.msra.mxu3 %v1838_v11  ;;  %v2813_v9 = vld [vmem:[#allocation2 + $0x78] sm:$0xff] }
  0x79   : > { %1431 = vmatpush.msra.mxu0 %v1855_v13  ;;  %1087 = vmatpush.msra.mxu1 %v1806_v15 }
  0x7a   : > { %1203 = vmatpush.msra.mxu2 %v1821_v31  ;;  %1318 = vmatpush.msra.mxu3 %v1837_v37  ;;  %v1272_v37 = vld [vmem:[#allocation3 + $0x20] sm:$0xff] }
  0x7b   : > { %761 = vmatmul.f32.gmra.mxu2 %v2629_v4  ;;  %1432 = vmatpush.msra.mxu0 %v1854_v38 }
  0x7c   : > { %663 = vmatmul.f32.gmra.mxu1 %v2593_v60  ;;  %1204 = vmatpush.msra.mxu2 %v1820_v43 }
  0x7d   : > { %1088 = vmatpush.msra.mxu1 %v1805_v39  ;;  %1319 = vmatpush.msra.mxu3 %v1836_v45 }
  0x7e   : > { %876 = vmatmul.f32.gmra.mxu3 %v2632_v34  ;;  %988 = vmatmul.f32.gmra.mxu0 %v2203_v55  ;;  %v2652_v55 = vld [vmem:[#allocation3 + $0x51] sm:$0xff] }
  0x7f   : > { %1433 = vmatpush.msra.mxu0 %v1853_v46  ;;  %1089 = vmatpush.msra.mxu1 %v1804_v47 }
  0x80   : > { %1205 = vmatpush.msra.mxu2 %v1819_v52  ;;  %1320 = vmatpush.msra.mxu3 %v1835_v56 }
  0x81   : > { %1434 = vmatpush.msra.mxu0 %v1852_v57  ;;  %1090 = vmatpush.msra.mxu1 %v1803_v6 }
  0x83   : > { %764 = vmatmul.f32.gmra.mxu2 %v2567_v23  ;;  %1435 = vmatpush.msra.mxu0 %v1851_v3 }
  0x84   : > { %666 = vmatmul.f32.gmra.mxu1 %v2610_v41 }
  0x86   : > { %879 = vmatmul.f32.gmra.mxu3 %v2650_v54  ;;  %991 = vmatmul.f32.gmra.mxu0 %v2233_v12  ;;  %v2672_v12 = vld [vmem:[#allocation2 + $0x48] sm:$0xff] }
  0x8b   : > { %767 = vmatmul.f32.gmra.mxu2 %v2669_v63 }
  0x8c   : > { %669 = vmatmul.f32.gmra.mxu1 %v2632_v34 }
  0x8e   : > { %882 = vmatmul.f32.gmra.mxu3 %v2672_v12  ;;  %994 = vmatmul.f32.gmra.mxu0 %v2144_v24  ;;  %v2692_v24 = vld [vmem:[#allocation3 + $0x61] sm:$0xff] }
  0x93   : > { %770 = vmatmul.f32.gmra.mxu2 %v2612_v21 }
  0x94   : > { %672 = vmatmul.f32.gmra.mxu1 %v2650_v54 }
  0x96   : > { %885 = vmatmul.f32.gmra.mxu3 %v2690_v7  ;;  %997 = vmatmul.f32.gmra.mxu0 %v2170_v36  ;;  %v2716_v36 = vld [vmem:[%s3039_s1] ss:$0 sm:$0xff] }
  0x97   : > { %v308_v19 = vmul.f32 %v2716_v36, %v288_v18  ;;  %v309_v26 = vmul.f32 %v2716_v36, %v289_v16 }
  0x99   : > { %v328_v28 = vadd.f32 %v2723_v27, %v308_v19  ;;  %v329_v29 = vadd.f32 %v2723_v27, %v309_v26  ;;  %v2834_v19 = vld [vmem:[#allocation4 + $0x78] sm:$0xff] }
  0x9b   : > { %773 = vmatmul.f32.gmra.mxu2 %v2711_v17  ;;  %v2734_v32 = vmax.f32 %v328_v28, 0.0  ;;  %v2736_v25 = vmax.f32 %v329_v29, 0.0 }
  0x9c   : > { %675 = vmatmul.f32.gmra.mxu1 %v2672_v12 }
  0x9d   : > { %398 = vst [vmem:[#allocation3 + $0x80] sm:$0xff] %v2734_v32 }
  0x9e   : > { %888 = vmatmul.f32.gmra.mxu3 %v2728_v30  ;;  %1000 = vmatmul.f32.gmra.mxu0 %v2208_v59  ;;  %438 = vst [vmem:[#allocation2 + $0x81] sm:$0xff] %v2734_v32  ;;  %v2753_v59 = vld [vmem:[#allocation2 + $0x60] sm:$0xff] }
  0x9f   : > { %399 = vst [vmem:[#allocation3 + $0x88] sm:$0xff] %v2736_v25 }
  0xa3   : > { %776 = vmatmul.f32.gmra.mxu2 %v2652_v55 }
  0xa4   : > { %678 = vmatmul.f32.gmra.mxu1 %v2690_v7 }
  0xa5   : > { %v2825_v15 = vld [vmem:[#allocation2 + $0x80] sm:$0xff] }
  0xa6   : > { %891 = vmatmul.f32.gmra.mxu3 %v2753_v59  ;;  %1003 = vmatmul.f32.gmra.mxu0 %v2239_v14  ;;  %v419_v49 = vld [vmem:[#allocation3 + $0x88] sm:$0x7f] }
  0xa7   : > { %439 = vst [vmem:[#allocation2 + $0x89] sm:$0x7f] %v419_v49  ;;  %v2775_v14 = vld [vmem:[#allocation2 + $0x68] sm:$0xff] }
  0xa8   : > { %v1273_v49 = vld [vmem:[#allocation3 + $0x28] sm:$0xff] }
  0xab   : > { %779 = vmatmul.f32.gmra.mxu2 %v2772_v50  ;;  %v2777_v51 = vpop.f32.mrf.mxu1 }
  0xac   : > { %681 = vmatmul.f32.gmra.mxu1 %v2728_v30 }
  0xae   : > { %894 = vmatmul.f32.gmra.mxu3 %v2775_v14  ;;  %1006 = vmatmul.f32.gmra.mxu0 %v1964_v53  ;;  %v2837_v26 = vld [vmem:[#allocation2 + $0x88] sm:$0xff] }
  0xb1   : > { %v2793_v58 = vpop.f32.mrf.mxu2  ;;  %v584_v1 = vpop.f32.mrf.mxu0 }
  0xb3   : > { %782 = vmatmul.f32.gmra.mxu2 %v2692_v24  ;;  %v2798_v62 = vpop.f32.mrf.mxu3 }
  0xb4   : > { %684 = vmatmul.f32.gmra.mxu1 %v2753_v59  ;;  %v2801_v0 = vpop.f32.mrf.mxu1 }
  0xb6   : > { %897 = vmatmul.f32.gmra.mxu3 %v2796_v61  ;;  %1009 = vmatmul.f32.gmra.mxu0 %v2183_v44 }
  0xb9   : > { %v2810_v8 = vpop.f32.mrf.mxu2 }
  0xbb   : > { %785 = vmatmul.f32.gmra.mxu2 %v2808_v5 }
  0xbc   : > { %687 = vmatmul.f32.gmra.mxu1 %v2775_v14  ;;  %v2816_v10 = vpop.f32.mrf.mxu3 }
  0xbd   : > { %v2818_v11 = vpop.f32.mrf.mxu1 }
  0xbe   : > { %900 = vmatmul.f32.gmra.mxu3 %v2813_v9  ;;  %1012 = vmatmul.f32.gmra.mxu0 %v2219_v2 }
  0xbf   : > { %v587_v44 = vpop.f32.mrf.mxu0 }
  0xc2   : > { %v2822_v13 = vpop.f32.mrf.mxu2 }
  0xc3   : > { %788 = vmatmul.f32.gmra.mxu2 %v2755_v40 }
  0xc4   : > { %690 = vmatmul.f32.gmra.mxu1 %v2796_v61 }
  0xc6   : > { %903 = vmatmul.f32.gmra.mxu3 %v2825_v15  ;;  %1015 = vmatmul.f32.gmra.mxu0 %v2253_v20  ;;  %v2830_v18 = vpop.f32.mrf.mxu3 }
  0xc7   : > { %v2832_v16 = vpop.f32.mrf.mxu1 }
  0xc9   : > { %v590_v2 = vpop.f32.mrf.mxu0 }
  0xcb   : > { %791 = vmatmul.f32.gmra.mxu2 %v2834_v19 }
  0xcc   : > { %693 = vmatmul.f32.gmra.mxu1 %v2813_v9  ;;  %v2840_v28 = vpop.f32.mrf.mxu2 }
  0xce   : > { %906 = vmatmul.f32.gmra.mxu3 %v2837_v26  ;;  %1018 = vmatmul.f32.gmra.mxu0 %v2734_v32 }
  0xd0   : > { %v2844_v20 = vpop.f32.mrf.mxu3 }
  0xd1   : > { %v649_v29 = vpop.f32.mrf.mxu1 }
  0xd2   : > { %v650_v38 = vadd.f32 %v649_v29, %v584_v1  ;;  %v1274_v1 = vld [vmem:[#allocation3 + $0x30] sm:$0xff] }
  0xd3   : > { %v593_v31 = vpop.f32.mrf.mxu0  ;;  %1206 = vmatmul.f32.vlgmr.msra.gmra.mxu2 %v2565_v22 }
  0xd4   : > { %1091 = vmatmul.f32.vlgmr.msra.gmra.mxu1 %v2450_v33 }
  0xd6   : > { %1021 = vmatmul.f32.gmra.mxu0 %v2736_v25  ;;  %1321 = vmatmul.f32.vlgmr.msra.gmra.mxu3 %v1272_v37  ;;  %v747_v39 = vpop.f32.mrf.mxu2 }
  0xd7   : > { %v795_v42 = vadd.f32 %v747_v39, %v650_v38  ;;  %v1965_v39 = vld [vmem:[#allocation3 + $0x38] sm:$0xff] }
  0xd9   : > { %v652_v43 = vpop.f32.mrf.mxu1  ;;  %v862_v45 = vpop.f32.mrf.mxu3 }
  0xda   : > { %v2849_v46 = vadd.f32 %v862_v45, %v795_v42  ;;  %v653_v22 = vadd.f32 %v652_v43, %v587_v44 }
  0xdb   : > { %v2851_v47 = vpop.f32.mrf.mxu0  ;;  %1209 = vmatmul.f32.gmra.mxu2 %v2593_v60 }
  0xdc   : > { %1094 = vmatmul.f32.gmra.mxu1 %v2590_v35 }
  0xde   : > { %1324 = vmatmul.f32.gmra.mxu3 %v1273_v49  ;;  %1436 = vmatmul.f32.vlgmr.msra.gmra.mxu0 %v2487_v48  ;;  %v750_v33 = vpop.f32.mrf.mxu2 }
  0xdf   : > { %v796_v52 = vadd.f32 %v750_v33, %v653_v22  ;;  %v1276_v22 = vld [vmem:[#allocation3 + $0x40] sm:$0xff] }
  0xe1   : > { %v655_v53 = vpop.f32.mrf.mxu1  ;;  %v865_v56 = vpop.f32.mrf.mxu3 }
  0xe2   : > { %v2856_v57 = vadd.f32 %v865_v56, %v796_v52  ;;  %v656_v60 = vadd.f32 %v655_v53, %v590_v2 }
  0xe3   : > { %v2858_v6 = vpop.f32.mrf.mxu0  ;;  %1212 = vmatmul.f32.gmra.mxu2 %v2610_v41 }
  0xe4   : > { %1097 = vmatmul.f32.gmra.mxu1 %v2487_v48 }
  0xe6   : > { %1327 = vmatmul.f32.gmra.mxu3 %v1274_v1  ;;  %1439 = vmatmul.f32.gmra.mxu0 %v2629_v4  ;;  %v753_v35 = vpop.f32.mrf.mxu2 }
  0xe7   : > { %v797_v3 = vadd.f32 %v753_v35, %v656_v60 }
  0xe9   : > { %v658_v44 = vpop.f32.mrf.mxu1  ;;  %v868_v29 = vpop.f32.mrf.mxu3 }
  0xea   : > { %v2863_v37 = vadd.f32 %v868_v29, %v797_v3  ;;  %v659_v41 = vadd.f32 %v658_v44, %v593_v31 }
  0xeb   : > { %v2865_v38 = vpop.f32.mrf.mxu0  ;;  %1215 = vmatmul.f32.gmra.mxu2 %v2632_v34 }
  0xec   : > { %1100 = vmatmul.f32.gmra.mxu1 %v2629_v4 }
  0xee   : > { %1330 = vmatmul.f32.gmra.mxu3 %v1965_v39  ;;  %1442 = vmatmul.f32.gmra.mxu0 %v2567_v23  ;;  %v756_v48 = vpop.f32.mrf.mxu2 }
  0xef   : > { %v798_v2 = vadd.f32 %v756_v48, %v659_v41 }
  0xf1   : > { %v661_v42 = vpop.f32.mrf.mxu1  ;;  %v871_v43 = vpop.f32.mrf.mxu3 }
  0xf2   : > { %v2870_v45 = vadd.f32 %v871_v43, %v798_v2  ;;  %v662_v4 = vadd.f32 %v661_v42, %v2777_v51 }
  0xf3   : > { %v2872_v49 = vpop.f32.mrf.mxu0  ;;  %1218 = vmatmul.f32.gmra.mxu2 %v2650_v54  ;;  %v1277_v54 = vld [vmem:[#allocation3 + $0x48] sm:$0xff] }
  0xf4   : > { %1103 = vmatmul.f32.gmra.mxu1 %v2567_v23 }
  0xf6   : > { %1333 = vmatmul.f32.gmra.mxu3 %v1276_v22  ;;  %1445 = vmatmul.f32.gmra.mxu0 %v2669_v63  ;;  %v759_v34 = vpop.f32.mrf.mxu2 }
  0xf7   : > { %v799_v31 = vadd.f32 %v759_v34, %v662_v4 }
  0xf9   : > { %v664_v33 = vpop.f32.mrf.mxu1  ;;  %v874_v52 = vpop.f32.mrf.mxu3 }
  0xfa   : > { %v2878_v53 = vadd.f32 %v874_v52, %v799_v31  ;;  %v665_v23 = vadd.f32 %v664_v33, %v2801_v0  ;;  %v365_v31 = vld [vmem:[%s363_s6 + $0x8] sm:$0xff] }
  0xfb   : > { %v2880_v56 = vpop.f32.mrf.mxu0  ;;  %1221 = vmatmul.f32.gmra.mxu2 %v2672_v12  ;;  %v1278_v12 = vld [vmem:[#allocation3 + $0x50] sm:$0xff]  ;;  %v367_v33 = vmul.f32 %v2716_v36, %v365_v31 }
  0xfc   : > { %1106 = vmatmul.f32.gmra.mxu1 %v2669_v63 }
  0xfe   : > { %1336 = vmatmul.f32.gmra.mxu3 %v1277_v54  ;;  %1448 = vmatmul.f32.gmra.mxu0 %v2612_v21  ;;  %v762_v51 = vpop.f32.mrf.mxu2 }
  0xff   : > { %v800_v1 = vadd.f32 %v762_v51, %v665_v23 }
 0x101   : > { %v667_v60 = vpop.f32.mrf.mxu1  ;;  %v877_v35 = vpop.f32.mrf.mxu3 }
 0x102   : > { %v2886_v3 = vadd.f32 %v877_v35, %v800_v1  ;;  %v668_v63 = vadd.f32 %v667_v60, %v2818_v11 }
 0x103   : > { %v2889_v44 = vpop.f32.mrf.mxu0  ;;  %1224 = vmatmul.f32.gmra.mxu2 %v2690_v7 }
 0x104   : > { %1109 = vmatmul.f32.gmra.mxu1 %v2612_v21  ;;  %v1279_v21 = vld [vmem:[#allocation3 + $0x58] sm:$0xff] }
 0x106   : > { %1339 = vmatmul.f32.gmra.mxu3 %v1278_v12  ;;  %1451 = vmatmul.f32.gmra.mxu0 %v2711_v17  ;;  %v765_v0 = vpop.f32.mrf.mxu2  ;;  %v379_v12 = vstv %s378_s15 }
 0x107   : > { %v801_v29 = vadd.f32 %v765_v0, %v668_v63 }
 0x109   : > { %v670_v41 = vpop.f32.mrf.mxu1  ;;  %v880_v39 = vpop.f32.mrf.mxu3 }
 0x10a   : > { %v2895_v48 = vadd.f32 %v880_v39, %v801_v29  ;;  %v671_v7 = vadd.f32 %v670_v41, %v2832_v16  ;;  %v2927_v39 = vld [vmem:[#allocation3 + $0x81] sm:$0xff] }
 0x10b   : > { %v2897_v2 = vpop.f32.mrf.mxu0  ;;  %1227 = vmatmul.f32.gmra.mxu2 %v2728_v30  ;;  %v1280_v30 = vld [vmem:[#allocation3 + $0x60] sm:$0xff] }
 0x10c   : > { %1112 = vmatmul.f32.gmra.mxu1 %v2711_v17  ;;  %v364_v17 = vld [vmem:[%s363_s6] sm:$0xff] }
 0x10d   : > { %v366_v16 = vmul.f32 %v2716_v36, %v364_v17 }
 0x10e   : > { %1342 = vmatmul.f32.gmra.mxu3 %v1279_v21  ;;  %1454 = vmatmul.f32.gmra.mxu0 %v2652_v55  ;;  %v768_v11 = vpop.f32.mrf.mxu2  ;;  %v469_v21 = vld [vmem:[#allocation3 + $0x89] sm:$0x7f] }
 0x10f   : > { %v802_v42 = vadd.f32 %v768_v11, %v671_v7  ;;  %v368_v23 = vadd.f32 %v2723_v27, %v366_v16  ;;  %489 = vst [vmem:[#allocation4 + $0x88] sm:$0x7f] %v469_v21 }
 0x111   : > { %v673_v43 = vpop.f32.mrf.mxu1  ;;  %v883_v22 = vpop.f32.mrf.mxu3  ;;  %v370_v1 = vmax.f32 %v368_v23, 0.0 }
 0x112   : > { %v2905_v4 = vadd.f32 %v883_v22, %v802_v42  ;;  %v674_v52 = vadd.f32 %v673_v43, %v2793_v58  ;;  %v1281_v58 = vld [vmem:[#allocation3 + $0x68] sm:$0xff] }
 0x113   : > { %v2907_v34 = vpop.f32.mrf.mxu0  ;;  %1230 = vmatmul.f32.gmra.mxu2 %v2753_v59  ;;  %v369_v59 = vadd.f32 %v2723_v27, %v367_v33  ;;  %v2917_v0 = vmul.f32 %v379_v12, %v370_v1 }
 0x114   : > { %1115 = vmatmul.f32.gmra.mxu1 %v2652_v55 }
 0x115   : > { %v371_v60 = vmax.f32 %v369_v59, 0.0  ;;  %400 = vst [vmem:[#allocation3 + $0x90] sm:$0xff] %v2917_v0 }
 0x116   : > { %1345 = vmatmul.f32.gmra.mxu3 %v1280_v30  ;;  %1457 = vmatmul.f32.gmra.mxu0 %v2772_v50  ;;  %v771_v54 = vpop.f32.mrf.mxu2  ;;  %440 = vst [vmem:[#allocation2 + $0x91] sm:$0xff] %v2917_v0 }
 0x117   : > { %v803_v51 = vadd.f32 %v771_v54, %v674_v52  ;;  %v2924_v27 = vmul.f32 %v379_v12, %v371_v60 }
 0x119   : > { %v676_v35 = vpop.f32.mrf.mxu1  ;;  %v886_v55 = vpop.f32.mrf.mxu3  ;;  %401 = vst [vmem:[#allocation3 + $0x98] sm:$0xff] %v2924_v27 }
 0x11a   : > { %v918_v63 = vadd.f32 %v886_v55, %v803_v51  ;;  %v677_v41 = vadd.f32 %v676_v35, %v2810_v8  ;;  %v1282_v8 = vld [vmem:[#allocation3 + $0x70] sm:$0xff] }
 0x11b   : > { %v1001_v36 = vpop.f32.mrf.mxu0  ;;  %1233 = vmatmul.f32.gmra.mxu2 %v2775_v14 }
 0x11c   : > { %v2920_v29 = vadd.f32 %v1001_v36, %v918_v63  ;;  %1118 = vmatmul.f32.gmra.mxu1 %v2772_v50 }
 0x11e   : > { %1348 = vmatmul.f32.gmra.mxu3 %v1281_v58  ;;  %1460 = vmatmul.f32.gmra.mxu0 %v2692_v24  ;;  %v774_v14 = vpop.f32.mrf.mxu2 }
 0x11f   : > { %v804_v7 = vadd.f32 %v774_v14, %v677_v41 }
 0x120   : > { %v421_v16 = vld [vmem:[#allocation3 + $0x98] sm:$0x7f] }
 0x121   : > { %v679_v50 = vpop.f32.mrf.mxu1  ;;  %v889_v11 = vpop.f32.mrf.mxu3  ;;  %441 = vst [vmem:[#allocation2 + $0x99] sm:$0x7f] %v421_v16  ;;  %v471_v51 = vld [vmem:[#allocation3 + $0x99] sm:$0x7f] }
 0x122   : > { %v919_v42 = vadd.f32 %v889_v11, %v804_v7  ;;  %v680_v30 = vadd.f32 %v679_v50, %v2822_v13  ;;  %v470_v13 = vld [vmem:[#allocation3 + $0x91] sm:$0xff]  ;;  %491 = vst [vmem:[#allocation4 + $0x98] sm:$0x7f] %v471_v51 }
 0x123   : > { %v1004_v43 = vpop.f32.mrf.mxu0  ;;  %1236 = vmatmul.f32.gmra.mxu2 %v2796_v61  ;;  %v1283_v61 = vld [vmem:[#allocation3 + $0x78] sm:$0xff] }
 0x124   : > { %v2933_v22 = vadd.f32 %v1004_v43, %v919_v42  ;;  %1121 = vmatmul.f32.gmra.mxu1 %v2692_v24 }
 0x126   : > { %1351 = vmatmul.f32.gmra.mxu3 %v1282_v8  ;;  %1463 = vmatmul.f32.gmra.mxu0 %v2808_v5  ;;  %v777_v17 = vpop.f32.mrf.mxu2 }
 0x127   : > { %v805_v31 = vadd.f32 %v777_v17, %v680_v30 }
 0x128   : > { %v1172_v30 = vld [vmem:[#allocation2 + $0x98] sm:$0xff] }
 0x129   : > { %v682_v33 = vpop.f32.mrf.mxu1  ;;  %v892_v52 = vpop.f32.mrf.mxu3 }
 0x12a   : > { %v920_v54 = vadd.f32 %v892_v52, %v805_v31  ;;  %v683_v24 = vadd.f32 %v682_v33, %v2840_v28 }
 0x12b   : > { %v1007_v23 = vpop.f32.mrf.mxu0  ;;  %1239 = vmatmul.f32.gmra.mxu2 %v2813_v9 }
 0x12c   : > { %v2939_v59 = vadd.f32 %v1007_v23, %v920_v54  ;;  %1124 = vmatmul.f32.gmra.mxu1 %v2808_v5 }
 0x12e   : > { %1354 = vmatmul.f32.gmra.mxu3 %v1283_v61  ;;  %1466 = vmatmul.f32.gmra.mxu0 %v2755_v40  ;;  %v780_v1 = vpop.f32.mrf.mxu2 }
 0x12f   : > { %v806_v60 = vadd.f32 %v780_v1, %v683_v24  ;;  %v1025_v24 = vadd.f32 %v2851_v47, %v2849_v46  ;;  %v1402_v1 = vld [vmem:[#allocation4 + $0x98] sm:$0xff] }
 0x131   : > { %v685_v35 = vpop.f32.mrf.mxu1  ;;  %v895_v55 = vpop.f32.mrf.mxu3 }
 0x132   : > { %v921_v12 = vadd.f32 %v895_v55, %v806_v60  ;;  %v686_v5 = vadd.f32 %v685_v35, %v2798_v62 }
 0x133   : > { %v1010_v63 = vpop.f32.mrf.mxu0  ;;  %1242 = vmatmul.f32.gmra.mxu2 %v2825_v15  ;;  %v1171_v15 = vld [vmem:[#allocation2 + $0x90] sm:$0xff] }
 0x134   : > { %v2945_v9 = vadd.f32 %v1010_v63, %v921_v12  ;;  %1127 = vmatmul.f32.gmra.mxu1 %v2755_v40  ;;  %v1026_v63 = vadd.f32 %v2858_v6, %v2856_v57 }
 0x136   : > { %1357 = vmatmul.f32.gmra.mxu3 %v2734_v32  ;;  %1469 = vmatmul.f32.gmra.mxu0 %v2834_v19  ;;  %v783_v28 = vpop.f32.mrf.mxu2 }
 0x137   : > { %v807_v36 = vadd.f32 %v783_v28, %v686_v5 }
 0x139   : > { %v688_v58 = vpop.f32.mrf.mxu1  ;;  %v898_v41 = vpop.f32.mrf.mxu3 }
 0x13a   : > { %v922_v21 = vadd.f32 %v898_v41, %v807_v36  ;;  %v689_v40 = vadd.f32 %v688_v58, %v2816_v10 }
 0x13b   : > { %v1013_v14 = vpop.f32.mrf.mxu0  ;;  %1245 = vmatmul.f32.gmra.mxu2 %v2837_v26  ;;  %v1400_v26 = vld [vmem:[#allocation4 + $0x88] sm:$0xff] }
 0x13c   : > { %v2952_v7 = vadd.f32 %v1013_v14, %v922_v21  ;;  %1130 = vmatmul.f32.gmra.mxu1 %v2834_v19  ;;  %v1027_v14 = vadd.f32 %v2865_v38, %v2863_v37 }
 0x13e   : > { %1360 = vmatmul.f32.gmra.mxu3 %v2736_v25  ;;  %1472 = vmatmul.f32.gmra.mxu0 %v2927_v39  ;;  %v786_v32 = vpop.f32.mrf.mxu2 }
 0x13f   : > { %v808_v62 = vadd.f32 %v786_v32, %v689_v40 }
 0x141   : > { %v691_v50 = vpop.f32.mrf.mxu1  ;;  %v901_v11 = vpop.f32.mrf.mxu3 }
 0x142   : > { %v923_v42 = vadd.f32 %v901_v11, %v808_v62  ;;  %v692_v10 = vadd.f32 %v691_v50, %v2830_v18 }
 0x143   : > { %v1016_v43 = vpop.f32.mrf.mxu0  ;;  %1248 = vmatmul.f32.gmra.mxu2 %v1171_v15 }
 0x144   : > { %v2958_v8 = vadd.f32 %v1016_v43, %v923_v42  ;;  %1133 = vmatmul.f32.gmra.mxu1 %v2927_v39 }
 0x146   : > { %1363 = vmatmul.f32.gmra.mxu3 %v2917_v0  ;;  %1475 = vmatmul.f32.gmra.mxu0 %v1400_v26  ;;  %v789_v25 = vpop.f32.mrf.mxu2 }
 0x147   : > { %v809_v19 = vadd.f32 %v789_v25, %v692_v10  ;;  %v1028_v25 = vadd.f32 %v2872_v49, %v2870_v45 }
 0x149   : > { %v694_v17 = vpop.f32.mrf.mxu1  ;;  %v904_v31 = vpop.f32.mrf.mxu3 }
 0x14a   : > { %v924_v16 = vadd.f32 %v904_v31, %v809_v19  ;;  %v695_v39 = vadd.f32 %v694_v17, %v2844_v20 }
 0x14b   : > { %v1019_v33 = vpop.f32.mrf.mxu0  ;;  %1251 = vmatmul.f32.gmra.mxu2 %v1172_v30 }
 0x14c   : > { %v2964_v52 = vadd.f32 %v1019_v33, %v924_v16  ;;  %1136 = vmatmul.f32.gmra.mxu1 %v1400_v26 }
 0x14e   : > { %1366 = vmatmul.f32.gmra.mxu3 %v2924_v27  ;;  %1478 = vmatmul.f32.gmra.mxu0 %v470_v13  ;;  %v792_v18 = vpop.f32.mrf.mxu2 }
 0x14f   : > { %v810_v0 = vadd.f32 %v792_v18, %v695_v39 }
 0x151   : > { %v907_v54 = vpop.f32.mrf.mxu3  ;;  %v1092_v23 = vpop.f32.mrf.mxu1 }
 0x152   : > { %v925_v61 = vadd.f32 %v907_v54, %v810_v0  ;;  %v1140_v35 = vadd.f32 %v1092_v23, %v1025_v24  ;;  %v1029_v54 = vadd.f32 %v2880_v56, %v2878_v53 }
 0x153   : > { %v1022_v51 = vpop.f32.mrf.mxu0 }
 0x154   : > { %v2972_v60 = vadd.f32 %v1022_v51, %v925_v61 }
 0x156   : > { %1481 = vmatmul.f32.gmra.mxu0 %v1402_v1  ;;  %v1207_v20 = vpop.f32.mrf.mxu2 }
 0x157   : > { %v1255_v27 = vadd.f32 %v1207_v20, %v1140_v35 }
 0x159   : > { %v1095_v13 = vpop.f32.mrf.mxu1  ;;  %v1322_v55 = vpop.f32.mrf.mxu3 }
 0x15a   : > { %v1370_v12 = vadd.f32 %v1322_v55, %v1255_v27  ;;  %v1141_v5 = vadd.f32 %v1095_v13, %v1026_v63  ;;  %v1030_v55 = vadd.f32 %v2889_v44, %v2886_v3 }
 0x15b   : > { %v1437_v46 = vpop.f32.mrf.mxu0 }
 0x15c   : > { %v1485_v47 = vadd.f32 %v1437_v46, %v1370_v12 }
 0x15e   : > { %1501 = vst [vmem:[%s2979_s12] sm:$0xff] %v1485_v47  ;;  %v1210_v28 = vpop.f32.mrf.mxu2  ;;  %v1538_v32 = vmul.f32 %v1485_v47, %v1485_v47 }
 0x15f   : > { %v1256_v36 = vadd.f32 %v1210_v28, %v1141_v5 }
 0x161   : > { %v1098_v58 = vpop.f32.mrf.mxu1  ;;  %v1325_v41 = vpop.f32.mrf.mxu3 }
 0x162   : > { %v1371_v21 = vadd.f32 %v1325_v41, %v1256_v36  ;;  %v1142_v40 = vadd.f32 %v1098_v58, %v1027_v14 }
 0x163   : > { %v1440_v57 = vpop.f32.mrf.mxu0 }
 0x164   : > { %v1486_v6 = vadd.f32 %v1440_v57, %v1371_v21  ;;  %v1031_v21 = vadd.f32 %v2897_v2, %v2895_v48 }
 0x166   : > { %1502 = vst [vmem:[%s2979_s12 + $0x8] sm:$0xff] %v1486_v6  ;;  %v1517_v62 = vadd.f32 %v1486_v6, %v1485_v47  ;;  %v1539_v15 = vmul.f32 %v1486_v6, %v1486_v6  ;;  %v1213_v50 = vpop.f32.mrf.mxu2 }
 0x167   : > { %v1257_v11 = vadd.f32 %v1213_v50, %v1142_v40 }
 0x168   : > { %v1554_v42 = vadd.f32 %v1539_v15, %v1538_v32 }
 0x169   : > { %v1101_v43 = vpop.f32.mrf.mxu1  ;;  %v1328_v26 = vpop.f32.mrf.mxu3 }
 0x16a   : > { %v1372_v10 = vadd.f32 %v1328_v26, %v1257_v11  ;;  %v1143_v38 = vadd.f32 %v1101_v43, %v1028_v25 }
 0x16b   : > { %v1443_v19 = vpop.f32.mrf.mxu0 }
 0x16c   : > { %v1487_v37 = vadd.f32 %v1443_v19, %v1372_v10 }
 0x16e   : > { %1503 = vst [vmem:[%s2979_s12 + $0x10] sm:$0xff] %v1487_v37  ;;  %v1518_v30 = vadd.f32 %v1517_v62, %v1487_v37  ;;  %v1540_v17 = vmul.f32 %v1487_v37, %v1487_v37  ;;  %v1216_v31 = vpop.f32.mrf.mxu2 }
 0x16f   : > { %v1258_v16 = vadd.f32 %v1216_v31, %v1143_v38 }
 0x170   : > { %v1555_v33 = vadd.f32 %v1554_v42, %v1540_v17  ;;  %v1032_v42 = vadd.f32 %v2907_v34, %v2905_v4 }
 0x171   : > { %v1104_v39 = vpop.f32.mrf.mxu1  ;;  %v1331_v18 = vpop.f32.mrf.mxu3 }
 0x172   : > { %v1373_v0 = vadd.f32 %v1331_v18, %v1258_v16  ;;  %v1144_v45 = vadd.f32 %v1104_v39, %v1029_v54 }
 0x173   : > { %v1446_v23 = vpop.f32.mrf.mxu0 }
 0x174   : > { %v1488_v61 = vadd.f32 %v1446_v23, %v1373_v0 }
 0x176   : > { %1504 = vst [vmem:[%s2979_s12 + $0x18] sm:$0xff] %v1488_v61  ;;  %v1519_v49 = vadd.f32 %v1518_v30, %v1488_v61  ;;  %v1541_v24 = vmul.f32 %v1488_v61, %v1488_v61  ;;  %v1219_v51 = vpop.f32.mrf.mxu2 }
 0x177   : > { %v1259_v1 = vadd.f32 %v1219_v51, %v1144_v45 }
 0x178   : > { %v1556_v35 = vadd.f32 %v1555_v33, %v1541_v24 }
 0x179   : > { %v1107_v20 = vpop.f32.mrf.mxu1  ;;  %v1334_v27 = vpop.f32.mrf.mxu3 }
 0x17a   : > { %v1374_v13 = vadd.f32 %v1334_v27, %v1259_v1  ;;  %v1145_v53 = vadd.f32 %v1107_v20, %v1030_v55 }
 0x17b   : > { %v1449_v12 = vpop.f32.mrf.mxu0 }
 0x17c   : > { %v1489_v63 = vadd.f32 %v1449_v12, %v1374_v13 }
 0x17e   : > { %1505 = vst [vmem:[%s2979_s12 + $0x20] sm:$0xff] %v1489_v63  ;;  %v1520_v56 = vadd.f32 %v1519_v49, %v1489_v63  ;;  %v1542_v46 = vmul.f32 %v1489_v63, %v1489_v63  ;;  %v1222_v47 = vpop.f32.mrf.mxu2 }
 0x17f   : > { %v1260_v5 = vadd.f32 %v1222_v47, %v1145_v53 }
 0x180   : > { %v1557_v28 = vadd.f32 %v1556_v35, %v1542_v46 }
 0x181   : > { %v1110_v36 = vpop.f32.mrf.mxu1  ;;  %v1337_v58 = vpop.f32.mrf.mxu3 }
 0x182   : > { %v1375_v41 = vadd.f32 %v1337_v58, %v1260_v5  ;;  %v1146_v3 = vadd.f32 %v1110_v36, %v1031_v21 }
 0x183   : > { %v1452_v14 = vpop.f32.mrf.mxu0 }
 0x184   : > { %v1490_v57 = vadd.f32 %v1452_v14, %v1375_v41 }
 0x186   : > { %1506 = vst [vmem:[%s2979_s12 + $0x28] sm:$0xff] %v1490_v57  ;;  %v1521_v44 = vadd.f32 %v1520_v56, %v1490_v57  ;;  %v1543_v6 = vmul.f32 %v1490_v57, %v1490_v57  ;;  %v1225_v40 = vpop.f32.mrf.mxu2 }
 0x187   : > { %v1261_v32 = vadd.f32 %v1225_v40, %v1146_v3 }
 0x188   : > { %v1558_v62 = vadd.f32 %v1557_v28, %v1543_v6 }
 0x189   : > { %v1113_v15 = vpop.f32.mrf.mxu1  ;;  %v1340_v50 = vpop.f32.mrf.mxu3 }
 0x18a   : > { %v1376_v11 = vadd.f32 %v1340_v50, %v1261_v32  ;;  %v1147_v48 = vadd.f32 %v1113_v15, %v1032_v42 }
 0x18b   : > { %v1455_v43 = vpop.f32.mrf.mxu0 }
 0x18c   : > { %v1491_v26 = vadd.f32 %v1455_v43, %v1376_v11 }
 0x18e   : > { %1507 = vst [vmem:[%s2979_s12 + $0x30] sm:$0xff] %v1491_v26  ;;  %v1522_v2 = vadd.f32 %v1521_v44, %v1491_v26  ;;  %v1544_v10 = vmul.f32 %v1491_v26, %v1491_v26  ;;  %v1228_v25 = vpop.f32.mrf.mxu2 }
 0x18f   : > { %v1262_v19 = vadd.f32 %v1228_v25, %v1147_v48 }
 0x190   : > { %v1559_v37 = vadd.f32 %v1558_v62, %v1544_v10 }
 0x191   : > { %v1116_v38 = vpop.f32.mrf.mxu1  ;;  %v1343_v30 = vpop.f32.mrf.mxu3 }
 0x192   : > { %v1377_v17 = vadd.f32 %v1343_v30, %v1262_v19  ;;  %v1148_v33 = vadd.f32 %v1116_v38, %v2920_v29 }
 0x193   : > { %v1458_v31 = vpop.f32.mrf.mxu0 }
 0x194   : > { %v1492_v16 = vadd.f32 %v1458_v31, %v1377_v17 }
 0x196   : > { %1508 = vst [vmem:[%s2979_s12 + $0x38] sm:$0xff] %v1492_v16  ;;  %v1523_v4 = vadd.f32 %v1522_v2, %v1492_v16  ;;  %v1545_v34 = vmul.f32 %v1492_v16, %v1492_v16  ;;  %v1231_v39 = vpop.f32.mrf.mxu2 }
 0x197   : > { %v1263_v18 = vadd.f32 %v1231_v39, %v1148_v33 }
 0x198   : > { %v1560_v0 = vadd.f32 %v1559_v37, %v1545_v34 }
 0x199   : > { %v1119_v54 = vpop.f32.mrf.mxu1  ;;  %v1346_v23 = vpop.f32.mrf.mxu3 }
 0x19a   : > { %v1378_v61 = vadd.f32 %v1346_v23, %v1263_v18  ;;  %v1149_v24 = vadd.f32 %v1119_v54, %v2933_v22 }
 0x19b   : > { %v1461_v45 = vpop.f32.mrf.mxu0 }
 0x19c   : > { %v1493_v49 = vadd.f32 %v1461_v45, %v1378_v61 }
 0x19e   : > { %1509 = vst [vmem:[%s2979_s12 + $0x40] sm:$0xff] %v1493_v49  ;;  %v1524_v51 = vadd.f32 %v1523_v4, %v1493_v49  ;;  %v1546_v1 = vmul.f32 %v1493_v49, %v1493_v49  ;;  %v1234_v35 = vpop.f32.mrf.mxu2 }
 0x19f   : > { %v1264_v20 = vadd.f32 %v1234_v35, %v1149_v24 }
 0x1a0   : > { %v1561_v29 = vadd.f32 %v1560_v0, %v1546_v1 }
 0x1a1   : > { %v1122_v27 = vpop.f32.mrf.mxu1  ;;  %v1349_v13 = vpop.f32.mrf.mxu3 }
 0x1a2   : > { %v1379_v55 = vadd.f32 %v1349_v13, %v1264_v20  ;;  %v1150_v53 = vadd.f32 %v1122_v27, %v2939_v59 }
 0x1a3   : > { %v1464_v12 = vpop.f32.mrf.mxu0 }
 0x1a4   : > { %v1494_v63 = vadd.f32 %v1464_v12, %v1379_v55 }
 0x1a6   : > { %1510 = vst [vmem:[%s2979_s12 + $0x48] sm:$0xff] %v1494_v63  ;;  %v1525_v56 = vadd.f32 %v1524_v51, %v1494_v63  ;;  %v1547_v46 = vmul.f32 %v1494_v63, %v1494_v63  ;;  %v1237_v47 = vpop.f32.mrf.mxu2 }
 0x1a7   : > { %v1265_v5 = vadd.f32 %v1237_v47, %v1150_v53 }
 0x1a8   : > { %v1562_v22 = vadd.f32 %v1561_v29, %v1547_v46 }
 0x1a9   : > { %v1125_v28 = vpop.f32.mrf.mxu1  ;;  %v1352_v36 = vpop.f32.mrf.mxu3 }
 0x1aa   : > { %v1380_v58 = vadd.f32 %v1352_v36, %v1265_v5  ;;  %v1151_v14 = vadd.f32 %v1125_v28, %v2945_v9 }
 0x1ab   : > { %v1467_v41 = vpop.f32.mrf.mxu0 }
 0x1ac   : > { %v1495_v21 = vadd.f32 %v1467_v41, %v1380_v58 }
 0x1ae   : > { %1511 = vst [vmem:[%s2979_s12 + $0x50] sm:$0xff] %v1495_v21  ;;  %v1526_v57 = vadd.f32 %v1525_v56, %v1495_v21  ;;  %v1548_v3 = vmul.f32 %v1495_v21, %v1495_v21  ;;  %v1240_v44 = vpop.f32.mrf.mxu2 }
 0x1af   : > { %v1266_v6 = vadd.f32 %v1240_v44, %v1151_v14 }
 0x1b0   : > { %v1563_v59 = vadd.f32 %v1562_v22, %v1548_v3 }
 0x1b1   : > { %v1128_v40 = vpop.f32.mrf.mxu1  ;;  %v1355_v32 = vpop.f32.mrf.mxu3 }
 0x1b2   : > { %v1381_v62 = vadd.f32 %v1355_v32, %v1266_v6  ;;  %v1152_v11 = vadd.f32 %v1128_v40, %v2952_v7 }
 0x1b3   : > { %v1470_v15 = vpop.f32.mrf.mxu0 }
 0x1b4   : > { %v1496_v50 = vadd.f32 %v1470_v15, %v1381_v62 }
 0x1b6   : > { %1512 = vst [vmem:[%s2979_s12 + $0x58] sm:$0xff] %v1496_v50  ;;  %v1527_v42 = vadd.f32 %v1526_v57, %v1496_v50  ;;  %v1549_v43 = vmul.f32 %v1496_v50, %v1496_v50  ;;  %v1243_v26 = vpop.f32.mrf.mxu2 }
 0x1b7   : > { %v1267_v48 = vadd.f32 %v1243_v26, %v1152_v11 }
 0x1b8   : > { %v1564_v9 = vadd.f32 %v1563_v59, %v1549_v43 }
 0x1b9   : > { %v1131_v2 = vpop.f32.mrf.mxu1  ;;  %v1358_v10 = vpop.f32.mrf.mxu3 }
 0x1ba   : > { %v1382_v25 = vadd.f32 %v1358_v10, %v1267_v48  ;;  %v1153_v38 = vadd.f32 %v1131_v2, %v2958_v8 }
 0x1bb   : > { %v1473_v19 = vpop.f32.mrf.mxu0 }
 0x1bc   : > { %v1497_v37 = vadd.f32 %v1473_v19, %v1382_v25 }
 0x1be   : > { %1513 = vst [vmem:[%s2979_s12 + $0x60] sm:$0xff] %v1497_v37  ;;  %v1528_v30 = vadd.f32 %v1527_v42, %v1497_v37  ;;  %v1550_v17 = vmul.f32 %v1497_v37, %v1497_v37  ;;  %v1246_v31 = vpop.f32.mrf.mxu2 }
 0x1bf   : > { %v1268_v16 = vadd.f32 %v1246_v31, %v1153_v38 }
 0x1c0   : > { %v1565_v7 = vadd.f32 %v1564_v9, %v1550_v17 }
 0x1c1   : > { %v1134_v33 = vpop.f32.mrf.mxu1  ;;  %v1361_v4 = vpop.f32.mrf.mxu3 }
 0x1c2   : > { %v1383_v34 = vadd.f32 %v1361_v4, %v1268_v16  ;;  %v1154_v0 = vadd.f32 %v1134_v33, %v2964_v52 }
 0x1c3   : > { %v1476_v39 = vpop.f32.mrf.mxu0 }
 0x1c4   : > { %v1498_v18 = vadd.f32 %v1476_v39, %v1383_v34 }
 0x1c6   : > { %1514 = vst [vmem:[%s2979_s12 + $0x68] sm:$0xff] %v1498_v18  ;;  %v1529_v54 = vadd.f32 %v1528_v30, %v1498_v18  ;;  %v1551_v23 = vmul.f32 %v1498_v18, %v1498_v18  ;;  %v1249_v61 = vpop.f32.mrf.mxu2 }
 0x1c7   : > { %v1269_v45 = vadd.f32 %v1249_v61, %v1154_v0 }
 0x1c8   : > { %v1566_v8 = vadd.f32 %v1565_v7, %v1551_v23 }
 0x1c9   : > { %v1364_v49 = vpop.f32.mrf.mxu3  ;;  %v1137_v24 = vpop.f32.mrf.mxu1 }
 0x1ca   : > { %v1384_v51 = vadd.f32 %v1364_v49, %v1269_v45  ;;  %v1155_v20 = vadd.f32 %v1137_v24, %v2972_v60 }
 0x1cb   : > { %v1479_v1 = vpop.f32.mrf.mxu0 }
 0x1cc   : > { %v1499_v35 = vadd.f32 %v1479_v1, %v1384_v51 }
 0x1ce   : > { %1515 = vst [vmem:[%s2979_s12 + $0x70] sm:$0xff] %v1499_v35  ;;  %v1530_v29 = vadd.f32 %v1529_v54, %v1499_v35  ;;  %v1552_v27 = vmul.f32 %v1499_v35, %v1499_v35  ;;  %v1252_v52 = vpop.f32.mrf.mxu2 }
 0x1cf   : > { %v1270_v13 = vadd.f32 %v1252_v52, %v1155_v20 }
 0x1d0   : > { %v1567_v55 = vadd.f32 %v1566_v8, %v1552_v27 }
 0x1d1   : > { %v1367_v12 = vpop.f32.mrf.mxu3 }
 0x1d2   : > { %v1385_v63 = vadd.f32 %v1367_v12, %v1270_v13 }
 0x1d3   : > { %v1482_v53 = vpop.f32.mrf.mxu0 }
 0x1d4   : > { %v1500_v56 = vadd.f32 %v1482_v53, %v1385_v63 }
 0x1d6   : > { %1516 = vst [vmem:[%s2979_s12 + $0x78] sm:$0xff] %v1500_v56  ;;  %v1531_v46 = vadd.f32 %v1530_v29, %v1500_v56  ;;  %v1553_v47 = vmul.f32 %v1500_v56, %v1500_v56 }
 0x1d8   : > { %v1532_v5 = vrot.slane %v1531_v46, 4  ;;  %v1568_v22 = vadd.f32 %v1567_v55, %v1553_v47 }
 0x1da   : > { %v1533_v60 = vadd.f32 %v1532_v5, %v1531_v46  ;;  %v1569_v28 = vrot.slane %v1568_v22, 4 }
 0x1dc   : > { %v1534_v36 = vrot.slane %v1533_v60, 2  ;;  %v1570_v58 = vadd.f32 %v1569_v28, %v1568_v22 }
 0x1de   : > { %v1535_v41 = vadd.f32 %v1534_v36, %v1533_v60  ;;  %v1571_v21 = vrot.slane %v1570_v58, 2 }
 0x1e0   : > { %v1536_v14 = vrot.slane %v1535_v41, 1  ;;  %v1572_v57 = vadd.f32 %v1571_v21, %v1570_v58 }
 0x1e2   : > { %v1573_v3 = vrot.slane %v1572_v57, 1  ;;  %v1537_v44 = vadd.f32 %v1536_v14, %v1535_v41 }
 0x1e4   : > { %v1574_v6 = vadd.f32 %v1573_v3, %v1572_v57 }
 0x1e6   : > { %v1576_v59 = vsel %vm1575_vm0, %v1537_v44, %v1574_v6 }
 0x1e7   : > { %1577 = vst [vmem:[%s270_s25] sm:$0x3] %v1576_v59 }
 0x1e8 PF: > { %s16_s22 = sadd.s32 1, %s2004_s22   ;;  %s3045_s18 = smov %s1996_s20 }
 0x1e9   : > { %p13_p12 = scmp.ge.s32.totalorder %s16_s22, 6   ;;  %s3046_s19 = smov %s2000_s21 }
 0x1ea   : > { %s3047_s20 = smov %s3050_s23  ;;  %s3048_s21 = smov %s3054_s24 }
 0x1eb   :  { %15 = sbr.rel (!%p13_p12) target bundleno = 3 (0x3), region = 95 }

</bundles_post_ra>
